<compile_context>
chip_gen: v5e
topology: v5e:2x2
jax: 0.10.0
libtpu: 0.0.40
codegen_flags: <defaults>
</compile_context>

<pallas_src>
import functools

import jax
import jax.numpy as jnp
from jax.experimental import pallas as pl
from jax.experimental.pallas import tpu as pltpu


def _round_up(x, m):
    return (x + m - 1) // m * m


def _fused_conv3x3_relu_kernel(w_padded, x_ref, w_ref, b_ref, o_ref):
    # x_ref: (Lin, Cpad)      bf16 flattened zero-padded NHWC image (+ spare rows)
    # w_ref: (3, 3, Cpad, Cpad) bf16 HWIO weights for this branch
    # b_ref: (1, Cpad)        f32 bias (zero-padded)
    # o_ref: (Lacc, Cpad)     f32, Lacc = H*(W+2); columns x in {W, W+1} are
    #                         wrap-around garbage and are dropped by the wrapper.
    lacc, cpad = o_ref.shape
    acc = jnp.zeros((lacc, cpad), jnp.float32)
    # 9 taps = 9 contiguous sublane-offset views (zero-cost, no relayout), each
    # a lane-dense (Lacc, Cpad) @ (Cpad, Cpad) MXU matmul with f32 accumulation.
    for ky in range(3):
        for kx in range(3):
            off = ky * w_padded + kx               # static Python int offset
            patch = x_ref[off:off + lacc, :]
            acc = acc + jnp.dot(patch, w_ref[ky, kx],
                                preferred_element_type=jnp.float32)
    acc = acc + b_ref[...]                         # (1, Cpad) broadcasts over rows
    o_ref[...] = jnp.maximum(acc, 0.0).astype(o_ref.dtype)


def fused_conv3x3_relu(xs, ws, bs):
    """Fused 3x3 conv (stride 1, pad 1) + ReLU over several same-shaped branches.

    xs: list of B NCHW inputs (identical shapes)
    ws: list of B OIHW weights (C, C, 3, 3)
    bs: list of B biases (C,)
    Returns a list of B NCHW outputs (nn.Conv2d + ReLU semantics per branch).
    """
    x = jnp.stack(xs)                              # (B, N, C, H, W)
    w = jnp.stack(ws)                              # (B, C, C, 3, 3)
    b = jnp.stack(bs)                              # (B, C)
    nb, n, c, h, wdt = x.shape
    wp = wdt + 2                                   # padded width
    cpad = _round_up(c, 128)                       # lane-dense channels
    lacc = h * wp                                  # flattened output rows
    lin = _round_up((h + 2) * wp + 2, 8)           # flattened input rows (+spare)

    # NCHW -> NHWC, spatial pad=1, channel pad to Cpad, flatten spatial, bf16.
    xt = jnp.transpose(x, (0, 1, 3, 4, 2))                             # (B,N,H,W,C)
    xt = jnp.pad(xt, ((0, 0), (0, 0), (1, 1), (1, 1), (0, cpad - c)))  # pad H,W,C
    xt = xt.reshape(nb, n, (h + 2) * wp, cpad)
    xt = jnp.pad(xt, ((0, 0), (0, 0), (0, lin - (h + 2) * wp), (0, 0)))
    xt = xt.astype(jnp.bfloat16)

    # OIHW -> HWIO, zero-pad channels, bf16.
    wt = jnp.transpose(w, (0, 3, 4, 2, 1))                             # (B,3,3,Ci,Co)
    wt = jnp.pad(wt, ((0, 0), (0, 0), (0, 0), (0, cpad - c), (0, cpad - c)))
    wt = wt.astype(jnp.bfloat16)

    bt = jnp.pad(b, ((0, 0), (0, cpad - c))).reshape(nb, 1, cpad).astype(jnp.float32)

    out = pl.pallas_call(
        functools.partial(_fused_conv3x3_relu_kernel, wp),
        out_shape=jax.ShapeDtypeStruct((nb, n, lacc, cpad), jnp.float32),
        grid=(nb, n),
        in_specs=[
            pl.BlockSpec((None, None, lin, cpad), lambda bi, ni: (bi, ni, 0, 0)),
            pl.BlockSpec((None, 3, 3, cpad, cpad), lambda bi, ni: (bi, 0, 0, 0, 0)),
            pl.BlockSpec((None, 1, cpad), lambda bi, ni: (bi, 0, 0)),
        ],
        out_specs=pl.BlockSpec((None, None, lacc, cpad),
                               lambda bi, ni: (bi, ni, 0, 0)),
        compiler_params=pltpu.CompilerParams(
            dimension_semantics=("parallel", "parallel")),
    )(xt, wt, bt)

    # Drop the wrap-around boundary columns and the channel padding, back to NCHW.
    out = out.reshape(nb, n, h, wp, cpad)[:, :, :, :wdt, :c]
    out = jnp.transpose(out, (0, 1, 4, 2, 3))                          # (B,N,C,H,W)
    return [out[i] for i in range(nb)]


def _init_conv_params(key, c):
    kw, kb = jax.random.split(key)
    w = jax.random.normal(kw, (c, c, 3, 3), jnp.float32) * 0.05        # OIHW
    b = jax.random.normal(kb, (c,), jnp.float32) * 0.01
    return w, b


class VGGStylizedMlmodelPallas:
    """Pallas port of VGG_Stylized_Mlmodel.forward."""

    def __init__(self, channels, key):
        keys = jax.random.split(key, 4)
        self.content_conv4 = _init_conv_params(keys[0], channels)
        self.content_conv5 = _init_conv_params(keys[1], channels)
        self.style_conv4 = _init_conv_params(keys[2], channels)
        self.style_conv5 = _init_conv_params(keys[3], channels)
        self._fwd = jax.jit(self._forward)

    def _forward(self, content4, style4, content5, style5):
        # conv_4-sized branches fused into one pallas_call; conv_5-sized into another.
        new_c4, new_s4 = fused_conv3x3_relu(
            [content4, style4],
            [self.content_conv4[0], self.style_conv4[0]],
            [self.content_conv4[1], self.style_conv4[1]],
        )
        new_c5, new_s5 = fused_conv3x3_relu(
            [content5, style5],
            [self.content_conv5[0], self.style_conv5[0]],
            [self.content_conv5[1], self.style_conv5[1]],
        )
        # Same return ordering as the PyTorch module.
        return (new_c4, new_s4, new_c5, new_s5)

    def __call__(self, content4, style4, content5, style5):
        return self._fwd(content4, style4, content5, style5)


def _reference_conv3x3_relu(x, w, b):
    y = jax.lax.conv_general_dilated(
        x, w, window_strides=(1, 1), padding=((1, 1), (1, 1)),
        dimension_numbers=("NCHW", "OIHW", "NCHW"),
    )
    return jnp.maximum(y + b[None, :, None, None], 0.0)


if __name__ == "__main__":
    key = jax.random.PRNGKey(0)
    k_model, k_c4, k_s4, k_c5, k_s5 = jax.random.split(key, 5)

    C = 4
    content4 = jax.random.normal(k_c4, (2, C, 16, 16), jnp.float32)
    style4 = jax.random.normal(k_s4, (2, C, 16, 16), jnp.float32)
    content5 = jax.random.normal(k_c5, (2, C, 8, 8), jnp.float32)
    style5 = jax.random.normal(k_s5, (2, C, 8, 8), jnp.float32)

    model = VGGStylizedMlmodelPallas(C, k_model)

    outs = jax.block_until_ready(model(content4, style4, content5, style5))

    # Cross-check against a pure-JAX f32 reference of the same conv+ReLU
    # semantics.  Tolerance loosened because MXU inputs are bf16 (accumulation
    # stays f32).
    refs = (
        _reference_conv3x3_relu(content4, *model.content_conv4),
        _reference_conv3x3_relu(style4, *model.style_conv4),
        _reference_conv3x3_relu(content5, *model.content_conv5),
        _reference_conv3x3_relu(style5, *model.style_conv5),
    )
    for got, ref in zip(outs, refs):
        assert got.shape == ref.shape and got.dtype == ref.dtype
        assert jnp.allclose(got, ref, atol=3e-2, rtol=3e-2)

    print("KERNEL_OK")
</pallas_src>

<mosaic_0001>
module attributes {stable_mosaic.version = 11 : i64} {
  func.func @_fused_conv3x3_relu_kernel(%arg0: i32, %arg1: i32, %arg2: memref<1x1x328x128xbf16, #tpu.memory_space<vmem>>, %arg3: memref<1x3x3x128x128xbf16, #tpu.memory_space<vmem>>, %arg4: memref<1x1x128xf32, #tpu.memory_space<vmem>>, %arg5: memref<1x1x288x128xf32, #tpu.memory_space<vmem>>) attributes {dimension_semantics = [#tpu.dimension_semantics<parallel>, #tpu.dimension_semantics<parallel>], iteration_bounds = array<i64: 2, 2>, scalar_prefetch = 0 : i64, scratch_operands = 0 : i64, tpu.core_type = #tpu.core_type<tc>, window_params = [{transform_indices = @transform_0, window_bounds = array<i64: 1, 1, 328, 128>}, {transform_indices = @transform_1, window_bounds = array<i64: 1, 3, 3, 128, 128>}, {transform_indices = @transform_2, window_bounds = array<i64: 1, 1, 128>}, {transform_indices = @transform_3, window_bounds = array<i64: 1, 1, 288, 128>}]} {
    %cst = arith.constant 0.000000e+00 : f32
    %0 = vector.broadcast %cst : f32 to vector<288x128xf32>
    %c0 = arith.constant 0 : index
    %c0_0 = arith.constant 0 : index
    %c0_1 = arith.constant 0 : index
    %c0_2 = arith.constant 0 : index
    %1 = vector.load %arg2[%c0, %c0_0, %c0_1, %c0_2] : memref<1x1x328x128xbf16, #tpu.memory_space<vmem>>, vector<1x1x288x128xbf16>
    %2 = vector.shape_cast %1 : vector<1x1x288x128xbf16> to vector<288x128xbf16>
    %c0_3 = arith.constant 0 : index
    %c0_4 = arith.constant 0 : index
    %c0_5 = arith.constant 0 : index
    %c0_6 = arith.constant 0 : index
    %c0_7 = arith.constant 0 : index
    %3 = vector.load %arg3[%c0_3, %c0_4, %c0_5, %c0_6, %c0_7] : memref<1x3x3x128x128xbf16, #tpu.memory_space<vmem>>, vector<1x1x1x128x128xbf16>
    %4 = vector.shape_cast %3 : vector<1x1x1x128x128xbf16> to vector<128x128xbf16>
    %cst_8 = arith.constant dense<0.000000e+00> : vector<288x128xf32>
    %5 = tpu.matmul %2, %4, %cst_8 {dimension_numbers = #tpu.dot_dimension_numbers<[1], [0], [0], [1], [0, 0, 1, 1], [], []>} : vector<288x128xbf16>, vector<128x128xbf16>, vector<288x128xf32> -> vector<288x128xf32>
    %6 = arith.addf %0, %5 : vector<288x128xf32>
    %c0_9 = arith.constant 0 : index
    %c0_10 = arith.constant 0 : index
    %c1 = arith.constant 1 : index
    %c0_11 = arith.constant 0 : index
    %7 = vector.load %arg2[%c0_9, %c0_10, %c1, %c0_11] : memref<1x1x328x128xbf16, #tpu.memory_space<vmem>>, vector<1x1x288x128xbf16>
    %8 = vector.shape_cast %7 : vector<1x1x288x128xbf16> to vector<288x128xbf16>
    %c0_12 = arith.constant 0 : index
    %c0_13 = arith.constant 0 : index
    %c1_14 = arith.constant 1 : index
    %c0_15 = arith.constant 0 : index
    %c0_16 = arith.constant 0 : index
    %9 = vector.load %arg3[%c0_12, %c0_13, %c1_14, %c0_15, %c0_16] : memref<1x3x3x128x128xbf16, #tpu.memory_space<vmem>>, vector<1x1x1x128x128xbf16>
    %10 = vector.shape_cast %9 : vector<1x1x1x128x128xbf16> to vector<128x128xbf16>
    %cst_17 = arith.constant dense<0.000000e+00> : vector<288x128xf32>
    %11 = tpu.matmul %8, %10, %cst_17 {dimension_numbers = #tpu.dot_dimension_numbers<[1], [0], [0], [1], [0, 0, 1, 1], [], []>} : vector<288x128xbf16>, vector<128x128xbf16>, vector<288x128xf32> -> vector<288x128xf32>
    %12 = arith.addf %6, %11 : vector<288x128xf32>
    %c0_18 = arith.constant 0 : index
    %c0_19 = arith.constant 0 : index
    %c2 = arith.constant 2 : index
    %c0_20 = arith.constant 0 : index
    %13 = vector.load %arg2[%c0_18, %c0_19, %c2, %c0_20] : memref<1x1x328x128xbf16, #tpu.memory_space<vmem>>, vector<1x1x288x128xbf16>
    %14 = vector.shape_cast %13 : vector<1x1x288x128xbf16> to vector<288x128xbf16>
    %c0_21 = arith.constant 0 : index
    %c0_22 = arith.constant 0 : index
    %c2_23 = arith.constant 2 : index
    %c0_24 = arith.constant 0 : index
    %c0_25 = arith.constant 0 : index
    %15 = vector.load %arg3[%c0_21, %c0_22, %c2_23, %c0_24, %c0_25] : memref<1x3x3x128x128xbf16, #tpu.memory_space<vmem>>, vector<1x1x1x128x128xbf16>
    %16 = vector.shape_cast %15 : vector<1x1x1x128x128xbf16> to vector<128x128xbf16>
    %cst_26 = arith.constant dense<0.000000e+00> : vector<288x128xf32>
    %17 = tpu.matmul %14, %16, %cst_26 {dimension_numbers = #tpu.dot_dimension_numbers<[1], [0], [0], [1], [0, 0, 1, 1], [], []>} : vector<288x128xbf16>, vector<128x128xbf16>, vector<288x128xf32> -> vector<288x128xf32>
    %18 = arith.addf %12, %17 : vector<288x128xf32>
    %c0_27 = arith.constant 0 : index
    %c0_28 = arith.constant 0 : index
    %c18 = arith.constant 18 : index
    %c0_29 = arith.constant 0 : index
    %19 = vector.load %arg2[%c0_27, %c0_28, %c18, %c0_29] : memref<1x1x328x128xbf16, #tpu.memory_space<vmem>>, vector<1x1x288x128xbf16>
    %20 = vector.shape_cast %19 : vector<1x1x288x128xbf16> to vector<288x128xbf16>
    %c0_30 = arith.constant 0 : index
    %c1_31 = arith.constant 1 : index
    %c0_32 = arith.constant 0 : index
    %c0_33 = arith.constant 0 : index
    %c0_34 = arith.constant 0 : index
    %21 = vector.load %arg3[%c0_30, %c1_31, %c0_32, %c0_33, %c0_34] : memref<1x3x3x128x128xbf16, #tpu.memory_space<vmem>>, vector<1x1x1x128x128xbf16>
    %22 = vector.shape_cast %21 : vector<1x1x1x128x128xbf16> to vector<128x128xbf16>
    %cst_35 = arith.constant dense<0.000000e+00> : vector<288x128xf32>
    %23 = tpu.matmul %20, %22, %cst_35 {dimension_numbers = #tpu.dot_dimension_numbers<[1], [0], [0], [1], [0, 0, 1, 1], [], []>} : vector<288x128xbf16>, vector<128x128xbf16>, vector<288x128xf32> -> vector<288x128xf32>
    %24 = arith.addf %18, %23 : vector<288x128xf32>
    %c0_36 = arith.constant 0 : index
    %c0_37 = arith.constant 0 : index
    %c19 = arith.constant 19 : index
    %c0_38 = arith.constant 0 : index
    %25 = vector.load %arg2[%c0_36, %c0_37, %c19, %c0_38] : memref<1x1x328x128xbf16, #tpu.memory_space<vmem>>, vector<1x1x288x128xbf16>
    %26 = vector.shape_cast %25 : vector<1x1x288x128xbf16> to vector<288x128xbf16>
    %c0_39 = arith.constant 0 : index
    %c1_40 = arith.constant 1 : index
    %c1_41 = arith.constant 1 : index
    %c0_42 = arith.constant 0 : index
    %c0_43 = arith.constant 0 : index
    %27 = vector.load %arg3[%c0_39, %c1_40, %c1_41, %c0_42, %c0_43] : memref<1x3x3x128x128xbf16, #tpu.memory_space<vmem>>, vector<1x1x1x128x128xbf16>
    %28 = vector.shape_cast %27 : vector<1x1x1x128x128xbf16> to vector<128x128xbf16>
    %cst_44 = arith.constant dense<0.000000e+00> : vector<288x128xf32>
    %29 = tpu.matmul %26, %28, %cst_44 {dimension_numbers = #tpu.dot_dimension_numbers<[1], [0], [0], [1], [0, 0, 1, 1], [], []>} : vector<288x128xbf16>, vector<128x128xbf16>, vector<288x128xf32> -> vector<288x128xf32>
    %30 = arith.addf %24, %29 : vector<288x128xf32>
    %c0_45 = arith.constant 0 : index
    %c0_46 = arith.constant 0 : index
    %c20 = arith.constant 20 : index
    %c0_47 = arith.constant 0 : index
    %31 = vector.load %arg2[%c0_45, %c0_46, %c20, %c0_47] : memref<1x1x328x128xbf16, #tpu.memory_space<vmem>>, vector<1x1x288x128xbf16>
    %32 = vector.shape_cast %31 : vector<1x1x288x128xbf16> to vector<288x128xbf16>
    %c0_48 = arith.constant 0 : index
    %c1_49 = arith.constant 1 : index
    %c2_50 = arith.constant 2 : index
    %c0_51 = arith.constant 0 : index
    %c0_52 = arith.constant 0 : index
    %33 = vector.load %arg3[%c0_48, %c1_49, %c2_50, %c0_51, %c0_52] : memref<1x3x3x128x128xbf16, #tpu.memory_space<vmem>>, vector<1x1x1x128x128xbf16>
    %34 = vector.shape_cast %33 : vector<1x1x1x128x128xbf16> to vector<128x128xbf16>
    %cst_53 = arith.constant dense<0.000000e+00> : vector<288x128xf32>
    %35 = tpu.matmul %32, %34, %cst_53 {dimension_numbers = #tpu.dot_dimension_numbers<[1], [0], [0], [1], [0, 0, 1, 1], [], []>} : vector<288x128xbf16>, vector<128x128xbf16>, vector<288x128xf32> -> vector<288x128xf32>
    %36 = arith.addf %30, %35 : vector<288x128xf32>
    %c0_54 = arith.constant 0 : index
    %c0_55 = arith.constant 0 : index
    %c36 = arith.constant 36 : index
    %c0_56 = arith.constant 0 : index
    %37 = vector.load %arg2[%c0_54, %c0_55, %c36, %c0_56] : memref<1x1x328x128xbf16, #tpu.memory_space<vmem>>, vector<1x1x288x128xbf16>
    %38 = vector.shape_cast %37 : vector<1x1x288x128xbf16> to vector<288x128xbf16>
    %c0_57 = arith.constant 0 : index
    %c2_58 = arith.constant 2 : index
    %c0_59 = arith.constant 0 : index
    %c0_60 = arith.constant 0 : index
    %c0_61 = arith.constant 0 : index
    %39 = vector.load %arg3[%c0_57, %c2_58, %c0_59, %c0_60, %c0_61] : memref<1x3x3x128x128xbf16, #tpu.memory_space<vmem>>, vector<1x1x1x128x128xbf16>
    %40 = vector.shape_cast %39 : vector<1x1x1x128x128xbf16> to vector<128x128xbf16>
    %cst_62 = arith.constant dense<0.000000e+00> : vector<288x128xf32>
    %41 = tpu.matmul %38, %40, %cst_62 {dimension_numbers = #tpu.dot_dimension_numbers<[1], [0], [0], [1], [0, 0, 1, 1], [], []>} : vector<288x128xbf16>, vector<128x128xbf16>, vector<288x128xf32> -> vector<288x128xf32>
    %42 = arith.addf %36, %41 : vector<288x128xf32>
    %c0_63 = arith.constant 0 : index
    %c0_64 = arith.constant 0 : index
    %c37 = arith.constant 37 : index
    %c0_65 = arith.constant 0 : index
    %43 = vector.load %arg2[%c0_63, %c0_64, %c37, %c0_65] : memref<1x1x328x128xbf16, #tpu.memory_space<vmem>>, vector<1x1x288x128xbf16>
    %44 = vector.shape_cast %43 : vector<1x1x288x128xbf16> to vector<288x128xbf16>
    %c0_66 = arith.constant 0 : index
    %c2_67 = arith.constant 2 : index
    %c1_68 = arith.constant 1 : index
    %c0_69 = arith.constant 0 : index
    %c0_70 = arith.constant 0 : index
    %45 = vector.load %arg3[%c0_66, %c2_67, %c1_68, %c0_69, %c0_70] : memref<1x3x3x128x128xbf16, #tpu.memory_space<vmem>>, vector<1x1x1x128x128xbf16>
    %46 = vector.shape_cast %45 : vector<1x1x1x128x128xbf16> to vector<128x128xbf16>
    %cst_71 = arith.constant dense<0.000000e+00> : vector<288x128xf32>
    %47 = tpu.matmul %44, %46, %cst_71 {dimension_numbers = #tpu.dot_dimension_numbers<[1], [0], [0], [1], [0, 0, 1, 1], [], []>} : vector<288x128xbf16>, vector<128x128xbf16>, vector<288x128xf32> -> vector<288x128xf32>
    %48 = arith.addf %42, %47 : vector<288x128xf32>
    %c0_72 = arith.constant 0 : index
    %c0_73 = arith.constant 0 : index
    %c38 = arith.constant 38 : index
    %c0_74 = arith.constant 0 : index
    %49 = vector.load %arg2[%c0_72, %c0_73, %c38, %c0_74] : memref<1x1x328x128xbf16, #tpu.memory_space<vmem>>, vector<1x1x288x128xbf16>
    %50 = vector.shape_cast %49 : vector<1x1x288x128xbf16> to vector<288x128xbf16>
    %c0_75 = arith.constant 0 : index
    %c2_76 = arith.constant 2 : index
    %c2_77 = arith.constant 2 : index
    %c0_78 = arith.constant 0 : index
    %c0_79 = arith.constant 0 : index
    %51 = vector.load %arg3[%c0_75, %c2_76, %c2_77, %c0_78, %c0_79] : memref<1x3x3x128x128xbf16, #tpu.memory_space<vmem>>, vector<1x1x1x128x128xbf16>
    %52 = vector.shape_cast %51 : vector<1x1x1x128x128xbf16> to vector<128x128xbf16>
    %cst_80 = arith.constant dense<0.000000e+00> : vector<288x128xf32>
    %53 = tpu.matmul %50, %52, %cst_80 {dimension_numbers = #tpu.dot_dimension_numbers<[1], [0], [0], [1], [0, 0, 1, 1], [], []>} : vector<288x128xbf16>, vector<128x128xbf16>, vector<288x128xf32> -> vector<288x128xf32>
    %54 = arith.addf %48, %53 : vector<288x128xf32>
    %c0_81 = arith.constant 0 : index
    %c0_82 = arith.constant 0 : index
    %c0_83 = arith.constant 0 : index
    %55 = vector.load %arg4[%c0_81, %c0_82, %c0_83] : memref<1x1x128xf32, #tpu.memory_space<vmem>>, vector<1x1x128xf32>
    %56 = vector.shape_cast %55 : vector<1x1x128xf32> to vector<1x128xf32>
    %57 = vector.broadcast %56 : vector<1x128xf32> to vector<288x128xf32>
    %58 = arith.addf %54, %57 : vector<288x128xf32>
    %cst_84 = arith.constant 0.000000e+00 : f32
    %59 = vector.broadcast %cst_84 : f32 to vector<288x128xf32>
    %60 = arith.maximumf %58, %59 : vector<288x128xf32>
    %c0_85 = arith.constant 0 : index
    %c0_86 = arith.constant 0 : index
    %c0_87 = arith.constant 0 : index
    %c0_88 = arith.constant 0 : index
    %61 = vector.load %arg5[%c0_85, %c0_86, %c0_87, %c0_88] : memref<1x1x288x128xf32, #tpu.memory_space<vmem>>, vector<1x1x288x128xf32>
    %62 = vector.shape_cast %61 : vector<1x1x288x128xf32> to vector<288x128xf32>
    %63 = vector.shape_cast %60 : vector<288x128xf32> to vector<1x1x288x128xf32>
    tpu.vector_store %arg5[%c0_85, %c0_86, %c0_87, %c0_88], %63 {strides = array<i32>} : memref<1x1x288x128xf32, #tpu.memory_space<vmem>>, vector<1x1x288x128xf32>,
    return
  }
  func.func @transform_0(%arg0: i32, %arg1: i32) -> (i32, i32, i32, i32) {
    %c0_i32 = arith.constant 0 : i32
    %c0_i32_0 = arith.constant 0 : i32
    %c0_i32_1 = arith.constant 0 : i32
    return %arg0, %arg1, %c0_i32, %c0_i32_0 : i32, i32, i32, i32
  }
  func.func @transform_1(%arg0: i32, %arg1: i32) -> (i32, i32, i32, i32, i32) {
    %c0_i32 = arith.constant 0 : i32
    %c0_i32_0 = arith.constant 0 : i32
    %c0_i32_1 = arith.constant 0 : i32
    %c0_i32_2 = arith.constant 0 : i32
    %c0_i32_3 = arith.constant 0 : i32
    return %arg0, %c0_i32, %c0_i32_0, %c0_i32_1, %c0_i32_2 : i32, i32, i32, i32, i32
  }
  func.func @transform_2(%arg0: i32, %arg1: i32) -> (i32, i32, i32) {
    %c0_i32 = arith.constant 0 : i32
    %c0_i32_0 = arith.constant 0 : i32
    %c0_i32_1 = arith.constant 0 : i32
    return %arg0, %c0_i32, %c0_i32_0 : i32, i32, i32
  }
  func.func @transform_3(%arg0: i32, %arg1: i32) -> (i32, i32, i32, i32) {
    %c0_i32 = arith.constant 0 : i32
    %c0_i32_0 = arith.constant 0 : i32
    %c0_i32_1 = arith.constant 0 : i32
    return %arg0, %arg1, %c0_i32, %c0_i32_0 : i32, i32, i32, i32
  }
}

module attributes {stable_mosaic.version = 11 : i64} {
  func.func @_fused_conv3x3_relu_kernel(%arg0: i32, %arg1: i32, %arg2: memref<1x1x104x128xbf16, #tpu.memory_space<vmem>>, %arg3: memref<1x3x3x128x128xbf16, #tpu.memory_space<vmem>>, %arg4: memref<1x1x128xf32, #tpu.memory_space<vmem>>, %arg5: memref<1x1x80x128xf32, #tpu.memory_space<vmem>>) attributes {dimension_semantics = [#tpu.dimension_semantics<parallel>, #tpu.dimension_semantics<parallel>], iteration_bounds = array<i64: 2, 2>, scalar_prefetch = 0 : i64, scratch_operands = 0 : i64, tpu.core_type = #tpu.core_type<tc>, window_params = [{transform_indices = @transform_0, window_bounds = array<i64: 1, 1, 104, 128>}, {transform_indices = @transform_1, window_bounds = array<i64: 1, 3, 3, 128, 128>}, {transform_indices = @transform_2, window_bounds = array<i64: 1, 1, 128>}, {transform_indices = @transform_3, window_bounds = array<i64: 1, 1, 80, 128>}]} {
    %cst = arith.constant 0.000000e+00 : f32
    %0 = vector.broadcast %cst : f32 to vector<80x128xf32>
    %c0 = arith.constant 0 : index
    %c0_0 = arith.constant 0 : index
    %c0_1 = arith.constant 0 : index
    %c0_2 = arith.constant 0 : index
    %1 = vector.load %arg2[%c0, %c0_0, %c0_1, %c0_2] : memref<1x1x104x128xbf16, #tpu.memory_space<vmem>>, vector<1x1x80x128xbf16>
    %2 = vector.shape_cast %1 : vector<1x1x80x128xbf16> to vector<80x128xbf16>
    %c0_3 = arith.constant 0 : index
    %c0_4 = arith.constant 0 : index
    %c0_5 = arith.constant 0 : index
    %c0_6 = arith.constant 0 : index
    %c0_7 = arith.constant 0 : index
    %3 = vector.load %arg3[%c0_3, %c0_4, %c0_5, %c0_6, %c0_7] : memref<1x3x3x128x128xbf16, #tpu.memory_space<vmem>>, vector<1x1x1x128x128xbf16>
    %4 = vector.shape_cast %3 : vector<1x1x1x128x128xbf16> to vector<128x128xbf16>
    %cst_8 = arith.constant dense<0.000000e+00> : vector<80x128xf32>
    %5 = tpu.matmul %2, %4, %cst_8 {dimension_numbers = #tpu.dot_dimension_numbers<[1], [0], [0], [1], [0, 0, 1, 1], [], []>} : vector<80x128xbf16>, vector<128x128xbf16>, vector<80x128xf32> -> vector<80x128xf32>
    %6 = arith.addf %0, %5 : vector<80x128xf32>
    %c0_9 = arith.constant 0 : index
    %c0_10 = arith.constant 0 : index
    %c1 = arith.constant 1 : index
    %c0_11 = arith.constant 0 : index
    %7 = vector.load %arg2[%c0_9, %c0_10, %c1, %c0_11] : memref<1x1x104x128xbf16, #tpu.memory_space<vmem>>, vector<1x1x80x128xbf16>
    %8 = vector.shape_cast %7 : vector<1x1x80x128xbf16> to vector<80x128xbf16>
    %c0_12 = arith.constant 0 : index
    %c0_13 = arith.constant 0 : index
    %c1_14 = arith.constant 1 : index
    %c0_15 = arith.constant 0 : index
    %c0_16 = arith.constant 0 : index
    %9 = vector.load %arg3[%c0_12, %c0_13, %c1_14, %c0_15, %c0_16] : memref<1x3x3x128x128xbf16, #tpu.memory_space<vmem>>, vector<1x1x1x128x128xbf16>
    %10 = vector.shape_cast %9 : vector<1x1x1x128x128xbf16> to vector<128x128xbf16>
    %cst_17 = arith.constant dense<0.000000e+00> : vector<80x128xf32>
    %11 = tpu.matmul %8, %10, %cst_17 {dimension_numbers = #tpu.dot_dimension_numbers<[1], [0], [0], [1], [0, 0, 1, 1], [], []>} : vector<80x128xbf16>, vector<128x128xbf16>, vector<80x128xf32> -> vector<80x128xf32>
    %12 = arith.addf %6, %11 : vector<80x128xf32>
    %c0_18 = arith.constant 0 : index
    %c0_19 = arith.constant 0 : index
    %c2 = arith.constant 2 : index
    %c0_20 = arith.constant 0 : index
    %13 = vector.load %arg2[%c0_18, %c0_19, %c2, %c0_20] : memref<1x1x104x128xbf16, #tpu.memory_space<vmem>>, vector<1x1x80x128xbf16>
    %14 = vector.shape_cast %13 : vector<1x1x80x128xbf16> to vector<80x128xbf16>
    %c0_21 = arith.constant 0 : index
    %c0_22 = arith.constant 0 : index
    %c2_23 = arith.constant 2 : index
    %c0_24 = arith.constant 0 : index
    %c0_25 = arith.constant 0 : index
    %15 = vector.load %arg3[%c0_21, %c0_22, %c2_23, %c0_24, %c0_25] : memref<1x3x3x128x128xbf16, #tpu.memory_space<vmem>>, vector<1x1x1x128x128xbf16>
    %16 = vector.shape_cast %15 : vector<1x1x1x128x128xbf16> to vector<128x128xbf16>
    %cst_26 = arith.constant dense<0.000000e+00> : vector<80x128xf32>
    %17 = tpu.matmul %14, %16, %cst_26 {dimension_numbers = #tpu.dot_dimension_numbers<[1], [0], [0], [1], [0, 0, 1, 1], [], []>} : vector<80x128xbf16>, vector<128x128xbf16>, vector<80x128xf32> -> vector<80x128xf32>
    %18 = arith.addf %12, %17 : vector<80x128xf32>
    %c0_27 = arith.constant 0 : index
    %c0_28 = arith.constant 0 : index
    %c10 = arith.constant 10 : index
    %c0_29 = arith.constant 0 : index
    %19 = vector.load %arg2[%c0_27, %c0_28, %c10, %c0_29] : memref<1x1x104x128xbf16, #tpu.memory_space<vmem>>, vector<1x1x80x128xbf16>
    %20 = vector.shape_cast %19 : vector<1x1x80x128xbf16> to vector<80x128xbf16>
    %c0_30 = arith.constant 0 : index
    %c1_31 = arith.constant 1 : index
    %c0_32 = arith.constant 0 : index
    %c0_33 = arith.constant 0 : index
    %c0_34 = arith.constant 0 : index
    %21 = vector.load %arg3[%c0_30, %c1_31, %c0_32, %c0_33, %c0_34] : memref<1x3x3x128x128xbf16, #tpu.memory_space<vmem>>, vector<1x1x1x128x128xbf16>
    %22 = vector.shape_cast %21 : vector<1x1x1x128x128xbf16> to vector<128x128xbf16>
    %cst_35 = arith.constant dense<0.000000e+00> : vector<80x128xf32>
    %23 = tpu.matmul %20, %22, %cst_35 {dimension_numbers = #tpu.dot_dimension_numbers<[1], [0], [0], [1], [0, 0, 1, 1], [], []>} : vector<80x128xbf16>, vector<128x128xbf16>, vector<80x128xf32> -> vector<80x128xf32>
    %24 = arith.addf %18, %23 : vector<80x128xf32>
    %c0_36 = arith.constant 0 : index
    %c0_37 = arith.constant 0 : index
    %c11 = arith.constant 11 : index
    %c0_38 = arith.constant 0 : index
    %25 = vector.load %arg2[%c0_36, %c0_37, %c11, %c0_38] : memref<1x1x104x128xbf16, #tpu.memory_space<vmem>>, vector<1x1x80x128xbf16>
    %26 = vector.shape_cast %25 : vector<1x1x80x128xbf16> to vector<80x128xbf16>
    %c0_39 = arith.constant 0 : index
    %c1_40 = arith.constant 1 : index
    %c1_41 = arith.constant 1 : index
    %c0_42 = arith.constant 0 : index
    %c0_43 = arith.constant 0 : index
    %27 = vector.load %arg3[%c0_39, %c1_40, %c1_41, %c0_42, %c0_43] : memref<1x3x3x128x128xbf16, #tpu.memory_space<vmem>>, vector<1x1x1x128x128xbf16>
    %28 = vector.shape_cast %27 : vector<1x1x1x128x128xbf16> to vector<128x128xbf16>
    %cst_44 = arith.constant dense<0.000000e+00> : vector<80x128xf32>
    %29 = tpu.matmul %26, %28, %cst_44 {dimension_numbers = #tpu.dot_dimension_numbers<[1], [0], [0], [1], [0, 0, 1, 1], [], []>} : vector<80x128xbf16>, vector<128x128xbf16>, vector<80x128xf32> -> vector<80x128xf32>
    %30 = arith.addf %24, %29 : vector<80x128xf32>
    %c0_45 = arith.constant 0 : index
    %c0_46 = arith.constant 0 : index
    %c12 = arith.constant 12 : index
    %c0_47 = arith.constant 0 : index
    %31 = vector.load %arg2[%c0_45, %c0_46, %c12, %c0_47] : memref<1x1x104x128xbf16, #tpu.memory_space<vmem>>, vector<1x1x80x128xbf16>
    %32 = vector.shape_cast %31 : vector<1x1x80x128xbf16> to vector<80x128xbf16>
    %c0_48 = arith.constant 0 : index
    %c1_49 = arith.constant 1 : index
    %c2_50 = arith.constant 2 : index
    %c0_51 = arith.constant 0 : index
    %c0_52 = arith.constant 0 : index
    %33 = vector.load %arg3[%c0_48, %c1_49, %c2_50, %c0_51, %c0_52] : memref<1x3x3x128x128xbf16, #tpu.memory_space<vmem>>, vector<1x1x1x128x128xbf16>
    %34 = vector.shape_cast %33 : vector<1x1x1x128x128xbf16> to vector<128x128xbf16>
    %cst_53 = arith.constant dense<0.000000e+00> : vector<80x128xf32>
    %35 = tpu.matmul %32, %34, %cst_53 {dimension_numbers = #tpu.dot_dimension_numbers<[1], [0], [0], [1], [0, 0, 1, 1], [], []>} : vector<80x128xbf16>, vector<128x128xbf16>, vector<80x128xf32> -> vector<80x128xf32>
    %36 = arith.addf %30, %35 : vector<80x128xf32>
    %c0_54 = arith.constant 0 : index
    %c0_55 = arith.constant 0 : index
    %c20 = arith.constant 20 : index
    %c0_56 = arith.constant 0 : index
    %37 = vector.load %arg2[%c0_54, %c0_55, %c20, %c0_56] : memref<1x1x104x128xbf16, #tpu.memory_space<vmem>>, vector<1x1x80x128xbf16>
    %38 = vector.shape_cast %37 : vector<1x1x80x128xbf16> to vector<80x128xbf16>
    %c0_57 = arith.constant 0 : index
    %c2_58 = arith.constant 2 : index
    %c0_59 = arith.constant 0 : index
    %c0_60 = arith.constant 0 : index
    %c0_61 = arith.constant 0 : index
    %39 = vector.load %arg3[%c0_57, %c2_58, %c0_59, %c0_60, %c0_61] : memref<1x3x3x128x128xbf16, #tpu.memory_space<vmem>>, vector<1x1x1x128x128xbf16>
    %40 = vector.shape_cast %39 : vector<1x1x1x128x128xbf16> to vector<128x128xbf16>
    %cst_62 = arith.constant dense<0.000000e+00> : vector<80x128xf32>
    %41 = tpu.matmul %38, %40, %cst_62 {dimension_numbers = #tpu.dot_dimension_numbers<[1], [0], [0], [1], [0, 0, 1, 1], [], []>} : vector<80x128xbf16>, vector<128x128xbf16>, vector<80x128xf32> -> vector<80x128xf32>
    %42 = arith.addf %36, %41 : vector<80x128xf32>
    %c0_63 = arith.constant 0 : index
    %c0_64 = arith.constant 0 : index
    %c21 = arith.constant 21 : index
    %c0_65 = arith.constant 0 : index
    %43 = vector.load %arg2[%c0_63, %c0_64, %c21, %c0_65] : memref<1x1x104x128xbf16, #tpu.memory_space<vmem>>, vector<1x1x80x128xbf16>
    %44 = vector.shape_cast %43 : vector<1x1x80x128xbf16> to vector<80x128xbf16>
    %c0_66 = arith.constant 0 : index
    %c2_67 = arith.constant 2 : index
    %c1_68 = arith.constant 1 : index
    %c0_69 = arith.constant 0 : index
    %c0_70 = arith.constant 0 : index
    %45 = vector.load %arg3[%c0_66, %c2_67, %c1_68, %c0_69, %c0_70] : memref<1x3x3x128x128xbf16, #tpu.memory_space<vmem>>, vector<1x1x1x128x128xbf16>
    %46 = vector.shape_cast %45 : vector<1x1x1x128x128xbf16> to vector<128x128xbf16>
    %cst_71 = arith.constant dense<0.000000e+00> : vector<80x128xf32>
    %47 = tpu.matmul %44, %46, %cst_71 {dimension_numbers = #tpu.dot_dimension_numbers<[1], [0], [0], [1], [0, 0, 1, 1], [], []>} : vector<80x128xbf16>, vector<128x128xbf16>, vector<80x128xf32> -> vector<80x128xf32>
    %48 = arith.addf %42, %47 : vector<80x128xf32>
    %c0_72 = arith.constant 0 : index
    %c0_73 = arith.constant 0 : index
    %c22 = arith.constant 22 : index
    %c0_74 = arith.constant 0 : index
    %49 = vector.load %arg2[%c0_72, %c0_73, %c22, %c0_74] : memref<1x1x104x128xbf16, #tpu.memory_space<vmem>>, vector<1x1x80x128xbf16>
    %50 = vector.shape_cast %49 : vector<1x1x80x128xbf16> to vector<80x128xbf16>
    %c0_75 = arith.constant 0 : index
    %c2_76 = arith.constant 2 : index
    %c2_77 = arith.constant 2 : index
    %c0_78 = arith.constant 0 : index
    %c0_79 = arith.constant 0 : index
    %51 = vector.load %arg3[%c0_75, %c2_76, %c2_77, %c0_78, %c0_79] : memref<1x3x3x128x128xbf16, #tpu.memory_space<vmem>>, vector<1x1x1x128x128xbf16>
    %52 = vector.shape_cast %51 : vector<1x1x1x128x128xbf16> to vector<128x128xbf16>
    %cst_80 = arith.constant dense<0.000000e+00> : vector<80x128xf32>
    %53 = tpu.matmul %50, %52, %cst_80 {dimension_numbers = #tpu.dot_dimension_numbers<[1], [0], [0], [1], [0, 0, 1, 1], [], []>} : vector<80x128xbf16>, vector<128x128xbf16>, vector<80x128xf32> -> vector<80x128xf32>
    %54 = arith.addf %48, %53 : vector<80x128xf32>
    %c0_81 = arith.constant 0 : index
    %c0_82 = arith.constant 0 : index
    %c0_83 = arith.constant 0 : index
    %55 = vector.load %arg4[%c0_81, %c0_82, %c0_83] : memref<1x1x128xf32, #tpu.memory_space<vmem>>, vector<1x1x128xf32>
    %56 = vector.shape_cast %55 : vector<1x1x128xf32> to vector<1x128xf32>
    %57 = vector.broadcast %56 : vector<1x128xf32> to vector<80x128xf32>
    %58 = arith.addf %54, %57 : vector<80x128xf32>
    %cst_84 = arith.constant 0.000000e+00 : f32
    %59 = vector.broadcast %cst_84 : f32 to vector<80x128xf32>
    %60 = arith.maximumf %58, %59 : vector<80x128xf32>
    %c0_85 = arith.constant 0 : index
    %c0_86 = arith.constant 0 : index
    %c0_87 = arith.constant 0 : index
    %c0_88 = arith.constant 0 : index
    %61 = vector.load %arg5[%c0_85, %c0_86, %c0_87, %c0_88] : memref<1x1x80x128xf32, #tpu.memory_space<vmem>>, vector<1x1x80x128xf32>
    %62 = vector.shape_cast %61 : vector<1x1x80x128xf32> to vector<80x128xf32>
    %63 = vector.shape_cast %60 : vector<80x128xf32> to vector<1x1x80x128xf32>
    tpu.vector_store %arg5[%c0_85, %c0_86, %c0_87, %c0_88], %63 {strides = array<i32>} : memref<1x1x80x128xf32, #tpu.memory_space<vmem>>, vector<1x1x80x128xf32>,
    return
  }
  func.func @transform_0(%arg0: i32, %arg1: i32) -> (i32, i32, i32, i32) {
    %c0_i32 = arith.constant 0 : i32
    %c0_i32_0 = arith.constant 0 : i32
    %c0_i32_1 = arith.constant 0 : i32
    return %arg0, %arg1, %c0_i32, %c0_i32_0 : i32, i32, i32, i32
  }
  func.func @transform_1(%arg0: i32, %arg1: i32) -> (i32, i32, i32, i32, i32) {
    %c0_i32 = arith.constant 0 : i32
    %c0_i32_0 = arith.constant 0 : i32
    %c0_i32_1 = arith.constant 0 : i32
    %c0_i32_2 = arith.constant 0 : i32
    %c0_i32_3 = arith.constant 0 : i32
    return %arg0, %c0_i32, %c0_i32_0, %c0_i32_1, %c0_i32_2 : i32, i32, i32, i32, i32
  }
  func.func @transform_2(%arg0: i32, %arg1: i32) -> (i32, i32, i32) {
    %c0_i32 = arith.constant 0 : i32
    %c0_i32_0 = arith.constant 0 : i32
    %c0_i32_1 = arith.constant 0 : i32
    return %arg0, %c0_i32, %c0_i32_0 : i32, i32, i32
  }
  func.func @transform_3(%arg0: i32, %arg1: i32) -> (i32, i32, i32, i32) {
    %c0_i32 = arith.constant 0 : i32
    %c0_i32_0 = arith.constant 0 : i32
    %c0_i32_1 = arith.constant 0 : i32
    return %arg0, %arg1, %c0_i32, %c0_i32_0 : i32, i32, i32, i32
  }
}

</mosaic_0001>

<bundles_post_ra>
// kernel: _forward.2
= control target key start
LH: loop header
LB: loop body
LE: loop exit
PB: predicated region body
PF: predicated region fallthrough
CT: control target
= control target key end

     0   :  { %s4361_s12 = smov 0   ;;  %s4363_s13 = smov 0   ;;  %s5467_s0 = inlined_call_operand.vmem [shape: bf16[2,2,328,128], index: 0, kind: input, shape index: {}]   ;;  %s5468_s1 = inlined_call_operand.vmem [shape: bf16[2,3,3,128,128], index: 1, kind: input, shape index: {}]   ;;  %s5469_s2 = inlined_call_operand.vmem [shape: f32[2,1,128], index: 2, kind: input, shape index: {}]   ;;  %s5470_s3 = inlined_call_operand.vmem [shape: f32[2,2,288,128], index: 3, kind: output, shape index: {}]  }
   0x1   :  { %s4365_s14 = smov 0   ;;  %s4367_s15 = smov 0  }
   0x2   :  { %s4369_s16 = smov 0  }
   0x3 LB: > { %s22_s17 = sadd.s32 1, %s4331_s14  ;;  %s25_s18 = sadd.s32 1, %s4335_s15  ;;  %s4339_s16 = sphi %s4369_s16, %s13_s16   ;;  %s4335_s15 = sphi %s4367_s15, %s5500_s15   ;;  %s4331_s14 = sphi %s4365_s14, %s5499_s14   ;;  %s4327_s13 = sphi %s4363_s13, %s5498_s13   ;;  %s4323_s12 = sphi %s4361_s12, %s5497_s12  }
   0x4   : > { %p23_p0 = scmp.ge.s32.totalorder %s22_s17, 2  ;;  %p3451_p1 = scmp.ge.s32.totalorder %s4339_s16, 1 }
   0x5   : > { %p175_p2 = scmp.lt.s32.totalorder %s4339_s16, 5 }
   0x6   : > { %s5502_s17 = smov (%p23_p0, %s22_s17), 0  ;;  %s5504_s18 = smov (!%p23_p0, %s25_s18), %s4335_s15 }
   0x7   : > { %p176_p3 = pnand %p3451_p1, %p175_p2  ;;  %p27_p4 = scmp.ge.s32.totalorder %s5504_s18, 2 }
   0x9   : > { %s5506_s18 = smov (%p27_p4, %s5504_s18), 0  ;;  %179 = sbr.rel (%p176_p3) target bundleno = 843 (0x34b), region = 32 }
   0xe   : > { %p215_p5 = scmp.lt.s32.totalorder %s4327_s13, 1  ;;  %p217_p6 = scmp.lt.s32.totalorder %s4323_s12, 1  ;;  %vm404_vm0 = vsmask.f32 7424  ;;  %vm904_vm1 = vcmask 1046528   ;;  %vm1942_vm4 = vcmask 1045504  }
   0xf   : > { %vm1549_vm2 = vsmask.f32 6400  ;;  %vm2587_vm3 = vsmask.f32 5376  ;;  %vm2980_vm5 = vcmask 1044480  }
  0x10   : > { %s5508_s13 = smov (!%p215_p5, %s4327_s13), 1  ;;  %s5510_s12 = smov (!%p217_p6, %s4323_s12), 1 }
  0x11   : > { %s4233_s19 = smul.u32 576, %s5508_s13  ;;  %s4999_s5 = scalar_lea.vmem %s5469_s2, %s5508_s13 }
  0x12   : > { %s4231_s23 = smul.u32 41, %s5510_s12 }
  0x13   : > { %s4399_s22 = scalar_lea.vmem %s5468_s1, %s4233_s19  ;;  %s4232_s24 = smul.u32 82, %s5508_s13 }
  0x14   : > { %v4109_v0 = vld [vmem:[%s4399_s22 + $0x78] sm:$0xff]  ;;  %v4108_v1 = vld [vmem:[%s4399_s22 + $0x70] sm:$0xff]  ;;  %v4107_v2 = vld [vmem:[%s4399_s22 + $0x68] sm:$0xff]  ;;  %s4234_s6 = smul.u32 36, %s5510_s12 }
  0x15   : > { %4207 = vmatpush.bf16.msra.mxu1 %v4109_v0  ;;  %4208 = vmatpush.bf16.msra.mxu2 %v4109_v0  ;;  %s221_s25 = sadd.s32 %s4232_s24, %s4231_s23  ;;  %v4106_v3 = vld [vmem:[%s4399_s22 + $0x60] sm:$0xff]  ;;  %v4105_v5 = vld [vmem:[%s4399_s22 + $0x58] sm:$0xff]  ;;  %v4104_v11 = vld [vmem:[%s4399_s22 + $0x50] sm:$0xff]  ;;  %s4235_s7 = smul.u32 72, %s5508_s13 }
  0x16   : > { %619 = vmatpush.bf16.msra.mxu0 %v4109_v0  ;;  %4209 = vmatpush.bf16.msra.mxu3 %v4109_v0  ;;  %s3452_s26 = sshll.u32 %s221_s25, 2  ;;  %v4103_v20 = vld [vmem:[%s4399_s22 + $0x48] sm:$0xff]  ;;  %v4102_v31 = vld [vmem:[%s4399_s22 + $0x40] sm:$0xff]  ;;  %v4117_v36 = vld [vmem:[%s4399_s22 + $0xb8] sm:$0xff] }
  0x17   : > { %s4410_s29 = scalar_lea.vmem %s5467_s0, %s3452_s26  ;;  %v4101_v39 = vld [vmem:[%s4399_s22 + $0x38] sm:$0xff]  ;;  %v4116_v46 = vld [vmem:[%s4399_s22 + $0xb0] sm:$0xff]  ;;  %v4115_v54 = vld [vmem:[%s4399_s22 + $0xa8] sm:$0xff]  ;;  %s238_s8 = sadd.s32 %s4235_s7, %s4234_s6 }
  0x18   : > { %v4413_v4 = vld [vmem:[%s4410_s29 + $0x28] sm:$0xff]  ;;  %v4417_v6 = vld [vmem:[%s4410_s29 + $0x50] sm:$0xff]  ;;  %v4420_v7 = vld [vmem:[%s4410_s29] sm:$0xff]   ;;  %s3454_s9 = sshll.u32 %s238_s8, 3 }
  0x19   : > { %4210 = vmatpush.bf16.msra.mxu1 %v4108_v1  ;;  %4211 = vmatpush.bf16.msra.mxu2 %v4108_v1  ;;  %v4423_v8 = vld [vmem:[%s4410_s29 + $0x30] sm:$0xff]  ;;  %v445_v9 = vshll.u32 %v4413_v4, 16  ;;  %v4427_v10 = vld [vmem:[%s4410_s29 + $0x58] sm:$0xff]  ;;  %v485_v12 = vshll.u32 %v4417_v6, 16  ;;  %v4432_v13 = vld [vmem:[%s4410_s29 + $0x8] sm:$0xff]  ;;  %v408_v14 = vshll.u32 %v4420_v7, 16  ;;  %s5212_s12 = scalar_lea.vmem %s5470_s3, %s3454_s9 }
  0x1a   : > { %620 = vmatpush.bf16.msra.mxu0 %v4108_v1  ;;  %4212 = vmatpush.bf16.msra.mxu3 %v4108_v1  ;;  %v4091_v15 = vld [vmem:[%s4410_s29 + $0x78] sm:$0xff]  ;;  %v449_v17 = vshrl.u32 %v4413_v4, 16  ;;  %v453_v18 = vshll.u32 %v4423_v8, 16  ;;  %v493_v19 = vshll.u32 %v4427_v10, 16  ;;  %v489_v22 = vshrl.u32 %v4417_v6, 16  ;;  %v4446_v23 = vld [vmem:[%s4410_s29 + $0x80] sm:$0xff] }
  0x1b   : > { %v4436_v16 = vrot.slane %v445_v9, 1  ;;  %v4442_v21 = vrot.slane %v485_v12, 1  ;;  %v525_v24 = vshll.u32 %v4091_v15, 16  ;;  %v406_v25 = vshrl.u32 %v4420_v7, 16  ;;  %v4150_v40 = vld [vmem:[%s4399_s22 + $0x138] sm:$0xff]  ;;  %v4100_v47 = vld [vmem:[%s4399_s22 + $0x30] sm:$0xff] }
  0x1c   : > { %v410_v26 = vrot.slane %v408_v14, 1  ;;  %v413_v27 = vshll.u32 %v4432_v13, 16  ;;  %v455_v29 = vrot.slane %v453_v18, 1  ;;  %v4451_v30 = vrot.slane %v493_v19, 1  ;;  %v4149_v48 = vld [vmem:[%s4399_s22 + $0x130] sm:$0xff]  ;;  %v4470_v49 = vld [vmem:[%s4410_s29 + $0x38] sm:$0xff] }
  0x1d   : > { %4213 = vmatpush.bf16.msra.mxu1 %v4107_v2  ;;  %4214 = vmatpush.bf16.msra.mxu2 %v4107_v2  ;;  %v451_v28 = vor.u32 %v449_v17, %v4436_v16  ;;  %v491_v32 = vor.u32 %v489_v22, %v4442_v21  ;;  %v4455_v33 = vrot.slane %v525_v24, 1  ;;  %v529_v34 = vshrl.u32 %v4091_v15, 16  ;;  %v4473_v50 = vld [vmem:[%s4410_s29 + $0x60] sm:$0xff]  ;;  %v4142_v52 = vld [vmem:[%s4399_s22 + $0xf8] sm:$0xff]  ;;  %v4478_v53 = vld [vmem:[%s4410_s29 + $0x10] sm:$0xff] }
  0x1e   : > { %621 = vmatpush.bf16.msra.mxu0 %v4107_v2  ;;  %4215 = vmatpush.bf16.msra.mxu3 %v4107_v2  ;;  %v533_v35 = vshll.u32 %v4446_v23, 16  ;;  %v411_v37 = vor.u32 %v410_v26, %v406_v25  ;;  %v415_v38 = vrot.slane %v413_v27, 1  ;;  %v4099_v55 = vld [vmem:[%s4399_s22 + $0x28] sm:$0xff]  ;;  %v457_v57 = vshrl.u32 %v4423_v8, 16  ;;  %v4141_v61 = vld [vmem:[%s4399_s22 + $0xf0] sm:$0xff]  ;;  %v4114_v1 = vld [vmem:[%s4399_s22 + $0xa0] sm:$0xff] }
  0x1f   : > { %v456_v41 = vsel %vm404_vm0, %v451_v28, %v455_v29  ;;  %v496_v42 = vsel %vm404_vm0, %v491_v32, %v4451_v30  ;;  %v531_v43 = vor.u32 %v529_v34, %v4455_v33  ;;  %v4148_v56 = vld [vmem:[%s4399_s22 + $0x128] sm:$0xff]  ;;  %v461_v58 = vshll.u32 %v4470_v49, 16  ;;  %v4098_v2 = vld [vmem:[%s4399_s22 + $0x20] sm:$0xff]  ;;  %v4113_v22 = vld [vmem:[%s4399_s22 + $0x98] sm:$0xff] }
  0x20   : > { %v535_v44 = vrot.slane %v533_v35, 1  ;;  %v416_v45 = vsel %vm404_vm0, %v411_v37, %v415_v38  ;;  %v497_v59 = vshrl.u32 %v4427_v10, 16  ;;  %v501_v60 = vshll.u32 %v4473_v50, 16  ;;  %v4489_v62 = vld [vmem:[%s4410_s29 + $0x88] sm:$0xff]  ;;  %v4097_v24 = vld [vmem:[%s4399_s22 + $0x18] sm:$0xff] }
  0x21   : > { %4216 = vmatpush.bf16.msra.mxu1 %v4106_v3  ;;  %4217 = vmatpush.bf16.msra.mxu2 %v4106_v3  ;;  %v417_v63 = vshrl.u32 %v4432_v13, 16  ;;  %v421_v0 = vshll.u32 %v4478_v53, 16  ;;  %v463_v9 = vrot.slane %v461_v58, 1  ;;  %v537_v14 = vshrl.u32 %v4446_v23, 16  ;;  %v4140_v17 = vld [vmem:[%s4399_s22 + $0xe8] sm:$0xff]  ;;  %v4146_v37 = vld [vmem:[%s4399_s22 + $0x118] sm:$0xff] }
  0x22   : > { %622 = vmatpush.bf16.msra.mxu0 %v4106_v3  ;;  %4218 = vmatpush.bf16.msra.mxu3 %v4106_v3  ;;  %v536_v51 = vsel %vm404_vm0, %v531_v43, %v535_v44  ;;  %v4147_v3 = vld [vmem:[%s4399_s22 + $0x120] sm:$0xff]  ;;  %v503_v12 = vrot.slane %v501_v60, 1  ;;  %v541_v15 = vshll.u32 %v4489_v62, 16  ;;  %v4501_v18 = vld [vmem:[%s4410_s29 + $0x48] sm:$0xff]  ;;  %v293_v32 = vld [vmem:[%s4410_s29 + $0x90] sm:$0x1] }
  0x23   : > { %v419_v19 = vor.u32 %v417_v63, %v415_v38  ;;  %v539_v23 = vor.u32 %v537_v14, %v535_v44  ;;  %v477_v28 = vshll.u32 %v4501_v18, 16  ;;  %v4139_v38 = vld [vmem:[%s4399_s22 + $0xe0] sm:$0xff]  ;;  %v4111_v43 = vld [vmem:[%s4399_s22 + $0x88] sm:$0xff]  ;;  %v4145_v44 = vld [vmem:[%s4399_s22 + $0x110] sm:$0xff] }
  0x24   : > { %v543_v27 = vrot.slane %v541_v15, 1 }
  0x25   : > { %4219 = vmatpush.bf16.msra.mxu1 %v4105_v5  ;;  %4220 = vmatpush.bf16.msra.mxu2 %v4105_v5  ;;  %v4517_v35 = vrot.slane %v477_v28, 1  ;;  %v4094_v28 = vld [vmem:[%s4399_s22] sm:$0xff] }
  0x26   : > { %623 = vmatpush.bf16.msra.mxu0 %v4105_v5  ;;  %4221 = vmatpush.bf16.msra.mxu3 %v4105_v5  ;;  %v459_v5 = vor.u32 %v457_v57, %v455_v29  ;;  %v544_v34 = vsel %vm404_vm0, %v539_v23, %v543_v27  ;;  %v425_v57 = vshrl.u32 %v4478_v53, 16  ;;  %v4110_v23 = vld [vmem:[%s4399_s22 + $0x80] sm:$0xff] }
  0x28   : > { %v464_v25 = vsel %vm404_vm0, %v459_v5, %v463_v9 }
  0x29   : > { %4222 = vmatpush.bf16.msra.mxu1 %v4104_v11  ;;  %4223 = vmatpush.bf16.msra.mxu2 %v4104_v11 }
  0x2a   : > { %624 = vmatpush.bf16.msra.mxu0 %v4104_v11  ;;  %4224 = vmatpush.bf16.msra.mxu3 %v4104_v11  ;;  %v499_v11 = vor.u32 %v497_v59, %v4451_v30  ;;  %v4510_v30 = vld [vmem:[%s4410_s29 + $0x40] sm:$0xff] }
  0x2c   : > { %v504_v26 = vsel %vm404_vm0, %v499_v11, %v503_v12 }
  0x2d   : > { %4225 = vmatpush.bf16.msra.mxu1 %v4103_v20  ;;  %4226 = vmatpush.bf16.msra.mxu2 %v4103_v20 }
  0x2e   : > { %625 = vmatpush.bf16.msra.mxu0 %v4103_v20  ;;  %4227 = vmatpush.bf16.msra.mxu3 %v4103_v20  ;;  %v423_v20 = vrot.slane %v421_v0, 1 }
  0x30   : > { %v424_v29 = vsel %vm404_vm0, %v419_v19, %v423_v20 }
  0x31   : > { %4228 = vmatpush.bf16.msra.mxu1 %v4102_v31  ;;  %4229 = vmatpush.bf16.msra.mxu2 %v4102_v31 }
  0x32   : > { %626 = vmatpush.bf16.msra.mxu0 %v4102_v31  ;;  %4230 = vmatpush.bf16.msra.mxu3 %v4102_v31  ;;  %v4513_v31 = vld [vmem:[%s4410_s29 + $0x68] sm:$0xff] }
  0x34   : > { %652 = vmatmul.bf16.vlgmr.msra.gmra.mxu1 %v456_v41  ;;  %677 = vmatmul.bf16.vlgmr.msra.gmra.mxu2 %v496_v42  ;;  %v4524_v41 = vld [vmem:[%s4410_s29 + $0x18] sm:$0xff]  ;;  %v4096_v42 = vld [vmem:[%s4399_s22 + $0x10] sm:$0xff] }
  0x35   : > { %1008 = vmatpush.bf16.msrb.mxu2 %v4117_v36  ;;  %784 = vmatpush.bf16.msrb.mxu1 %v4101_v39  ;;  %v4112_v36 = vld [vmem:[%s4399_s22 + $0x90] sm:$0xff]  ;;  %v384_v39 = vunpack.c.l.b16 %v293_v32  ;;  %v429_v58 = vshll.u32 %v4524_v41, 16  ;;  %v4135_v32 = vld [vmem:[%s4399_s22 + $0xc0] sm:$0xff] }
  0x36   : > { %1786 = vmatpush.bf16.msrb.mxu0 %v4150_v40  ;;  %702 = vmatmul.bf16.vlgmr.msra.gmra.mxu3 %v536_v51  ;;  %v481_v40 = vshrl.u32 %v4501_v18, 16  ;;  %v509_v51 = vshll.u32 %v4513_v31, 16 }
  0x37   : > { %627 = vmatmul.bf16.vlgmr.msra.gmra.mxu0 %v416_v45  ;;  %1393 = vmatpush.bf16.msrb.mxu3 %v4142_v52  ;;  %v4535_v52 = vld [vmem:[%s4410_s29 + $0x20] sm:$0xff]  ;;  %v431_v5 = vrot.slane %v429_v58, 1 }
  0x38   : > { %v483_v45 = vor.u32 %v481_v40, %v4517_v35  ;;  %v511_v63 = vrot.slane %v509_v51, 1  ;;  %v437_v0 = vshll.u32 %v4535_v52, 16 }
  0x39   : > { %1009 = vmatpush.bf16.msrb.mxu2 %v4116_v46  ;;  %785 = vmatpush.bf16.msrb.mxu1 %v4100_v47  ;;  %v465_v46 = vshrl.u32 %v4470_v49, 16  ;;  %v469_v47 = vshll.u32 %v4510_v30, 16 }
  0x3a   : > { %1787 = vmatpush.bf16.msrb.mxu0 %v4149_v48  ;;  %v505_v48 = vshrl.u32 %v4473_v50, 16 }
  0x3b   : > { %1394 = vmatpush.bf16.msrb.mxu3 %v4141_v61  ;;  %v467_v59 = vor.u32 %v465_v46, %v463_v9  ;;  %v471_v60 = vrot.slane %v469_v47, 1  ;;  %v4118_v46 = vld [vmem:[%s4410_s29 + $0x10] sm:$0xff] }
  0x3c   : > { %v507_v61 = vor.u32 %v505_v48, %v503_v12  ;;  %v439_v12 = vrot.slane %v437_v0, 1  ;;  %v1291_v58 = vrot.slane %v4118_v46, 1  ;;  %v4158_v0 = vld [vmem:[%s4399_s22 + $0x178] sm:$0xff] }
  0x3d   : > { %1010 = vmatpush.bf16.msrb.mxu2 %v4115_v54  ;;  %786 = vmatpush.bf16.msrb.mxu1 %v4099_v55  ;;  %v4537_v54 = vpack.c.b16 %v384_v39, %v384_v39  ;;  %v4138_v55 = vld [vmem:[%s4399_s22 + $0xd8] sm:$0xff]  ;;  %v472_v11 = vsel %vm404_vm0, %v467_v59, %v471_v60 }
  0x3e   : > { %1788 = vmatpush.bf16.msrb.mxu0 %v4148_v56  ;;  %v4542_v56 = vsel %vm404_vm0, %v483_v45, %v4442_v21  ;;  %v4137_v21 = vld [vmem:[%s4399_s22 + $0xd0] sm:$0xff]  ;;  %v512_v9 = vsel %vm404_vm0, %v507_v61, %v511_v63 }
  0x3f   : > { %1395 = vmatpush.bf16.msrb.mxu3 %v4140_v17 }
  0x41   : > { %1011 = vmatpush.bf16.msrb.mxu2 %v4114_v1  ;;  %787 = vmatpush.bf16.msrb.mxu1 %v4098_v2  ;;  %v545_v1 = vshrl.u32 %v4489_v62, 16  ;;  %v549_v2 = vshll.u32 %v4537_v54, 16  ;;  %v441_v62 = vshrl.u32 %v4535_v52, 16 }
  0x42   : > { %1789 = vmatpush.bf16.msrb.mxu0 %v4147_v3  ;;  %v427_v3 = vor.u32 %v425_v57, %v423_v20  ;;  %v4555_v20 = vld [vmem:[%s4410_s29 + $0x70] sm:$0xff] }
  0x43   : > { %1396 = vmatpush.bf16.msrb.mxu3 %v4139_v38  ;;  %v547_v14 = vor.u32 %v545_v1, %v543_v27  ;;  %v551_v15 = vrot.slane %v549_v2, 1  ;;  %v443_v19 = vor.u32 %v441_v62, %v439_v12  ;;  %v4144_v27 = vld [vmem:[%s4399_s22 + $0x108] sm:$0xff]  ;;  %v513_v38 = vshrl.u32 %v4513_v31, 16 }
  0x44   : > { %657 = vmatmul.bf16.gmra.mxu1 %v464_v25  ;;  %682 = vmatmul.bf16.gmra.mxu2 %v504_v26  ;;  %v432_v17 = vsel %vm404_vm0, %v427_v3, %v431_v5  ;;  %v4136_v26 = vld [vmem:[%s4399_s22 + $0xc8] sm:$0xff]  ;;  %v521_v1 = vshrl.u32 %v4555_v20, 16  ;;  %v1559_v62 = vshrl.u32 %v4118_v46, 16 }
  0x45   : > { %1012 = vmatpush.bf16.msrb.mxu2 %v4113_v22  ;;  %788 = vmatpush.bf16.msrb.mxu1 %v4097_v24  ;;  %v4095_v22 = vld [vmem:[%s4399_s22 + $0x8] sm:$0xff]  ;;  %v552_v24 = vsel %vm404_vm0, %v547_v14, %v551_v15  ;;  %v448_v25 = vsel %vm404_vm0, %v443_v19, %v4436_v16  ;;  %v517_v16 = vshll.u32 %v4555_v20, 16 }
  0x46   : > { %1790 = vmatpush.bf16.msrb.mxu0 %v4146_v37  ;;  %707 = vmatmul.bf16.gmra.mxu3 %v544_v34  ;;  %v4568_v34 = vld [vmem:[%s4410_s29 + $0xc] sm:$0xf]  ;;  %v4143_v37 = vld [vmem:[%s4399_s22 + $0x100] sm:$0xff] }
  0x47   : > { %632 = vmatmul.bf16.gmra.mxu0 %v424_v29  ;;  %1397 = vmatpush.bf16.msrb.mxu3 %v4138_v55  ;;  %v1143_v29 = vld [vmem:[%s4410_s29 + $0x8] sm:$0xe]  ;;  %v5471_v40 = vunpack.c.l.b16 %v4568_v34  ;;  %v519_v45 = vrot.slane %v517_v16, 1  ;;  %v4190_v16 = vld [vmem:[%s4399_s22 + $0x1f0] sm:$0xff] }
  0x48   : > { %v1234_v39 = vunpack.c.l.b16 %v1143_v29 }
  0x49   : > { %1013 = vmatpush.bf16.msrb.mxu2 %v4112_v36  ;;  %789 = vmatpush.bf16.msrb.mxu1 %v4096_v42  ;;  %v473_v36 = vshrl.u32 %v4510_v30, 16  ;;  %v433_v42 = vshrl.u32 %v4524_v41, 16  ;;  %v523_v2 = vor.u32 %v521_v1, %v519_v45 }
  0x4a   : > { %1791 = vmatpush.bf16.msrb.mxu0 %v4145_v44  ;;  %v515_v44 = vor.u32 %v513_v38, %v511_v63  ;;  %v1271_v47 = vpack.c.b16 %v5471_v40, %v1234_v39  ;;  %v4191_v63 = vld [vmem:[%s4399_s22 + $0x1f8] sm:$0xff]  ;;  %v4182_v38 = vld [vmem:[%s4399_s22 + $0x1b0] sm:$0xff] }
  0x4b   : > { %1398 = vmatpush.bf16.msrb.mxu3 %v4137_v21  ;;  %v435_v48 = vor.u32 %v433_v42, %v431_v5  ;;  %v4119_v21 = vld [vmem:[%s4410_s29 + $0x18] sm:$0xff]  ;;  %v528_v3 = vsel %vm404_vm0, %v523_v2, %v4455_v33  ;;  %v1561_v33 = vrot.slane %v1559_v62, 1  ;;  %v4157_v39 = vld [vmem:[%s4399_s22 + $0x170] sm:$0xff]  ;;  %v912_v62 = vrot.slane %v4535_v52, 1 }
  0x4c   : > { %v520_v55 = vsel %vm404_vm0, %v515_v44, %v519_v45  ;;  %v1290_v57 = vrot.slane %v1271_v47, 1  ;;  %v1293_v5 = vrot.slane %v4119_v21, 1  ;;  %v1551_v14 = vshrl.u32 %v1271_v47, 16 }
  0x4d   : > { %1014 = vmatpush.bf16.msrb.mxu2 %v4111_v43  ;;  %790 = vmatpush.bf16.msrb.mxu1 %v4095_v22  ;;  %v475_v43 = vor.u32 %v473_v36, %v471_v60  ;;  %v440_v59 = vsel %vm404_vm0, %v435_v48, %v439_v12  ;;  %v4183_v60 = vld [vmem:[%s4399_s22 + $0x1b8] sm:$0xff]  ;;  %v4205_v12 = vld [vmem:[%s4410_s29] sm:$0xe]  ;;  %v1554_v15 = vshll.u32 %v1271_v47, 16  ;;  %v1568_v42 = vshrl.u32 %v4119_v21, 16 }
  0x4e   : > { %1792 = vmatpush.bf16.msrb.mxu0 %v4144_v27  ;;  %v1292_v61 = vsel %vm904_vm1, %v1290_v57, %v1291_v58  ;;  %v1553_v22 = vrot.slane %v1551_v14, 1  ;;  %v4181_v14 = vld [vmem:[%s4399_s22 + $0x1a8] sm:$0xff] }
  0x4f   : > { %1399 = vmatpush.bf16.msrb.mxu3 %v4136_v26  ;;  %v480_v51 = vsel %vm404_vm0, %v475_v43, %v4517_v35  ;;  %v4199_v35 = vld [vmem:[%s4399_s22 + $0x238] sm:$0xff]  ;;  %v1571_v43 = vshll.u32 %v4119_v21, 16  ;;  %v1570_v44 = vrot.slane %v1568_v42, 1 }
  0x51   : > { %1015 = vmatpush.bf16.msrb.mxu2 %v4110_v23  ;;  %791 = vmatpush.bf16.msrb.mxu1 %v4094_v28  ;;  %v4120_v23 = vld [vmem:[%s4410_s29 + $0x20] sm:$0xff]  ;;  %v1573_v45 = vrot.slane %v1571_v43, 2 }
  0x52   : > { %1793 = vmatpush.bf16.msrb.mxu0 %v4143_v37 }
  0x53   : > { %1400 = vmatpush.bf16.msrb.mxu3 %v4135_v32  ;;  %v1295_v32 = vrot.slane %v4120_v23, 1  ;;  %v1574_v47 = vor.u32 %v1573_v45, %v1570_v44 }
  0x54   : > { %662 = vmatmul.bf16.gmra.mxu1 %v472_v11  ;;  %687 = vmatmul.bf16.gmra.mxu2 %v512_v9  ;;  %v4204_v11 = vld [vmem:[%s4410_s29] sm:$0xf0]  ;;  %v1294_v9 = vsel %vm904_vm1, %v1291_v58, %v1293_v5 }
  0x55   : > { %2431 = vmatpush.bf16.msra.mxu2 %v4183_v60  ;;  %2046 = vmatpush.bf16.msra.mxu1 %v4158_v0  ;;  %v4206_v19 = vor.u32 %v4205_v12, %v4204_v11  ;;  %v1296_v37 = vsel %vm904_vm1, %v1293_v5, %v1295_v32  ;;  %v1580_v60 = vshll.u32 %v4120_v23, 16  ;;  %v910_v0 = vrot.slane %v4524_v41, 1 }
  0x56   : > { %712 = vmatmul.bf16.gmra.mxu3 %v552_v24  ;;  %3084 = vmatpush.bf16.msra.mxu0 %v4199_v35  ;;  %v1556_v24 = vrot.slane %v1554_v15, 2  ;;  %v4122_v35 = vld [vmem:[%s4410_s29 + $0x30] sm:$0xff]  ;;  %v4189_v15 = vld [vmem:[%s4399_s22 + $0x1e8] sm:$0xff] }
  0x57   : > { %637 = vmatmul.bf16.gmra.mxu0 %v432_v17  ;;  %2824 = vmatpush.bf16.msra.mxu3 %v4191_v63  ;;  %v1562_v17 = vshll.u32 %v4118_v46, 16  ;;  %v908_v46 = vrot.slane %v4478_v53, 1  ;;  %v1582_v63 = vrot.slane %v1580_v60, 2  ;;  %v1299_v21 = vrot.slane %v4122_v35, 1 }
  0x58   : > { %v1557_v27 = vor.u32 %v1556_v24, %v1553_v22  ;;  %v913_v24 = vsel %vm904_vm1, %v910_v0, %v912_v62 }
  0x59   : > { %v1564_v26 = vrot.slane %v1562_v17, 2  ;;  %2432 = vmatpush.bf16.msra.mxu2 %v4182_v38  ;;  %2047 = vmatpush.bf16.msra.mxu1 %v4157_v39  ;;  %v911_v2 = vsel %vm904_vm1, %v908_v46, %v910_v0  ;;  %v4123_v17 = vld [vmem:[%s4410_s29 + $0x38] sm:$0xff]  ;;  %v4124_v39 = vld [vmem:[%s4410_s29 + $0x40] sm:$0xff] }
  0x5b   : > { %v1565_v28 = vor.u32 %v1564_v26, %v1561_v33  ;;  %2825 = vmatpush.bf16.msra.mxu3 %v4190_v16  ;;  %v1301_v33 = vrot.slane %v4123_v17, 1 }
  0x5d   : > { %v1566_v36 = vsel %vm1549_vm2, %v1557_v27, %v1565_v28  ;;  %v1575_v57 = vsel %vm1549_vm2, %v1565_v28, %v1574_v47  ;;  %2433 = vmatpush.bf16.msra.mxu2 %v4181_v14  ;;  %v1595_v27 = vshrl.u32 %v4122_v35, 16  ;;  %v1598_v28 = vshll.u32 %v4122_v35, 16  ;;  %v4125_v35 = vld [vmem:[%s4410_s29 + $0x48] sm:$0xff] }
  0x5f   : > { %2826 = vmatpush.bf16.msra.mxu3 %v4189_v15  ;;  %v1600_v38 = vrot.slane %v1598_v28, 2  ;;  %v4155_v15 = vld [vmem:[%s4399_s22 + $0x160] sm:$0xff]  ;;  %v4126_v28 = vld [vmem:[%s4410_s29 + $0x50] sm:$0xff] }
  0x64   : > { %667 = vmatmul.bf16.gmra.mxu1 %v480_v51  ;;  %692 = vmatmul.bf16.gmra.mxu2 %v520_v55  ;;  %v4198_v55 = vld [vmem:[%s4399_s22 + $0x230] sm:$0xff] }
  0x65   : > { %3085 = vmatpush.bf16.msra.mxu0 %v4198_v55  ;;  %v1604_v55 = vshrl.u32 %v4123_v17, 16 }
  0x66   : > { %1401 = vmatmul.bf16.vlgmr.msrb.gmra.mxu3 %v1292_v61 }
  0x67   : > { %642 = vmatmul.bf16.gmra.mxu0 %v440_v59  ;;  %v1577_v59 = vshrl.u32 %v4120_v23, 16  ;;  %v4197_v23 = vld [vmem:[%s4399_s22 + $0x228] sm:$0xff] }
  0x69   : > { %v1579_v61 = vrot.slane %v1577_v59, 1  ;;  %3086 = vmatpush.bf16.msra.mxu0 %v4197_v23 }
  0x6b   : > { %v1583_v1 = vor.u32 %v1582_v63, %v1579_v61  ;;  %v1606_v61 = vrot.slane %v1604_v55, 1  ;;  %v1622_v55 = vshrl.u32 %v4125_v35, 16 }
  0x74   : > { %672 = vmatmul.bf16.gmra.mxu1 %v4542_v56  ;;  %697 = vmatmul.bf16.gmra.mxu2 %v528_v3  ;;  %v905_v56 = vrot.slane %v4206_v19, 1 }
  0x76   : > { %1406 = vmatmul.bf16.gmra.mxu3 %v1294_v9 }
  0x77   : > { %647 = vmatmul.bf16.gmra.mxu0 %v448_v25  ;;  %v906_v25 = vrot.slane %v4432_v13, 1 }
  0x79   : > { %v907_v29 = vsel %vm904_vm1, %v905_v56, %v906_v25  ;;  %v909_v48 = vsel %vm904_vm1, %v906_v25, %v908_v46  ;;  %v1302_v25 = vsel %vm904_vm1, %v1299_v21, %v1301_v33  ;;  %v1303_v46 = vrot.slane %v4124_v39, 1 }
  0x84   : > { %792 = vmatmul.bf16.vlgmr.msrb.gmra.mxu1 %v4420_v7  ;;  %1016 = vmatmul.bf16.vlgmr.msrb.gmra.mxu2 %v907_v29  ;;  %v4121_v7 = vld [vmem:[%s4410_s29 + $0x28] sm:$0xff] }
  0x85   : > { %v1297_v51 = vrot.slane %v4121_v7, 1  ;;  %v1586_v5 = vshrl.u32 %v4121_v7, 16  ;;  %v1589_v11 = vshll.u32 %v4121_v7, 16 }
  0x86   : > { %1411 = vmatmul.bf16.gmra.mxu3 %v1296_v37  ;;  %v1597_v37 = vrot.slane %v1595_v27, 1  ;;  %v918_v27 = vrot.slane %v4470_v49, 1 }
  0x87   : > { %1794 = vmatmul.bf16.vlgmr.msrb.gmra.mxu0 %v1566_v36  ;;  %v1298_v58 = vsel %vm904_vm1, %v1295_v32, %v1297_v51  ;;  %v1300_v3 = vsel %vm904_vm1, %v1297_v51, %v1299_v21  ;;  %v1588_v9 = vrot.slane %v1586_v5, 1  ;;  %v1591_v12 = vrot.slane %v1589_v11, 2  ;;  %v4180_v21 = vld [vmem:[%s4399_s22 + $0x1a0] sm:$0xff] }
  0x88   : > { %v1601_v42 = vor.u32 %v1600_v38, %v1597_v37  ;;  %v1304_v51 = vsel %vm904_vm1, %v1301_v33, %v1303_v46  ;;  %v1305_v5 = vrot.slane %v4125_v35, 1  ;;  %2434 = vmatpush.bf16.msra.mxu2 %v4180_v21  ;;  %v4188_v11 = vld [vmem:[%s4399_s22 + $0x1e0] sm:$0xff] }
  0x89   : > { %v1592_v19 = vor.u32 %v1591_v12, %v1588_v9  ;;  %2827 = vmatpush.bf16.msra.mxu3 %v4188_v11  ;;  %v4196_v33 = vld [vmem:[%s4399_s22 + $0x220] sm:$0xff]  ;;  %v4127_v11 = vld [vmem:[%s4410_s29 + $0x58] sm:$0xff] }
  0x8a   : > { %3087 = vmatpush.bf16.msra.mxu0 %v4196_v33 }
  0x8b   : > { %v1593_v56 = vsel %vm1549_vm2, %v1583_v1, %v1592_v19 }
  0x94   : > { %797 = vmatmul.bf16.gmra.mxu1 %v4432_v13  ;;  %1021 = vmatmul.bf16.gmra.mxu2 %v909_v48  ;;  %v1584_v13 = vsel %vm1549_vm2, %v1574_v47, %v1583_v1  ;;  %v1602_v47 = vsel %vm1549_vm2, %v1592_v19, %v1601_v42  ;;  %v1616_v19 = vshll.u32 %v4124_v39, 16 }
  0x96   : > { %1416 = vmatmul.bf16.gmra.mxu3 %v1298_v58  ;;  %v1618_v23 = vrot.slane %v1616_v19, 2 }
  0x97   : > { %1799 = vmatmul.bf16.gmra.mxu0 %v1575_v57  ;;  %v1607_v57 = vshll.u32 %v4123_v17, 16  ;;  %v1613_v17 = vshrl.u32 %v4124_v39, 16 }
  0x99   : > { %v1609_v63 = vrot.slane %v1607_v57, 2  ;;  %v1625_v57 = vshll.u32 %v4125_v35, 16 }
  0x9b   : > { %v1610_v1 = vor.u32 %v1609_v63, %v1606_v61  ;;  %v1627_v21 = vrot.slane %v1625_v57, 2 }
  0x9d   : > { %v1611_v12 = vsel %vm1549_vm2, %v1601_v42, %v1610_v1  ;;  %v1307_v42 = vrot.slane %v4126_v28, 1 }
  0xa4   : > { %802 = vmatmul.bf16.gmra.mxu1 %v4478_v53  ;;  %1026 = vmatmul.bf16.gmra.mxu2 %v911_v2  ;;  %v4156_v53 = vld [vmem:[%s4399_s22 + $0x168] sm:$0xff] }
  0xa5   : > { %2048 = vmatpush.bf16.msra.mxu1 %v4156_v53 }
  0xa6   : > { %1421 = vmatmul.bf16.gmra.mxu3 %v1300_v3 }
  0xa7   : > { %1804 = vmatmul.bf16.gmra.mxu0 %v1584_v13 }
  0xa9   : > { %2049 = vmatpush.bf16.msra.mxu1 %v4155_v15 }
  0xb1   : > { %v4623_v22 = vpop.f32.mrf.mxu1 }
  0xb4   : > { %v4626_v26 = vpop.f32.mrf.mxu0  ;;  %807 = vmatmul.bf16.gmra.mxu1 %v4524_v41  ;;  %1031 = vmatmul.bf16.gmra.mxu2 %v913_v24  ;;  %v914_v41 = vrot.slane %v4413_v4, 1 }
  0xb6   : > { %1426 = vmatmul.bf16.gmra.mxu3 %v1302_v25  ;;  %v915_v45 = vsel %vm904_vm1, %v912_v62, %v914_v41  ;;  %v1306_v62 = vsel %vm904_vm1, %v1303_v46, %v1305_v5  ;;  %v1615_v25 = vrot.slane %v1613_v17, 1 }
  0xb7   : > { %1809 = vmatmul.bf16.gmra.mxu0 %v1593_v56  ;;  %v4632_v29 = vpop.f32.mrf.mxu2 }
  0xb8   : > { %v1619_v37 = vor.u32 %v1618_v23, %v1615_v25  ;;  %v4179_v25 = vld [vmem:[%s4399_s22 + $0x198] sm:$0xff] }
  0xb9   : > { %v4634_v32 = vpop.f32.mrf.mxu1  ;;  %v4638_v16 = vpop.f32.mrf.mxu3  ;;  %2435 = vmatpush.bf16.msra.mxu2 %v4179_v25 }
  0xba   : > { %5473 = vst [vmem:[#allocation2_spill] sm:$0xff] %v4638_v16  ;;  %v1620_v46 = vsel %vm1549_vm2, %v1610_v1, %v1619_v37  ;;  %v1624_v1 = vrot.slane %v1622_v55, 1 }
  0xbc   : > { %v4636_v36 = vpop.f32.mrf.mxu0 }
  0xbf   : > { %v4642_v43 = vpop.f32.mrf.mxu2 }
  0xc1   : > { %v4644_v44 = vpop.f32.mrf.mxu1  ;;  %v4650_v48 = vpop.f32.mrf.mxu3 }
  0xc2   : > { %5474 = vst [vmem:[#allocation3_spill] sm:$0xff] %v4650_v48 }
  0xc4   : > { %v4647_v7 = vpop.f32.mrf.mxu0  ;;  %812 = vmatmul.bf16.gmra.mxu1 %v4535_v52  ;;  %1036 = vmatmul.bf16.gmra.mxu2 %v915_v45  ;;  %v916_v52 = vrot.slane %v4423_v8, 1 }
  0xc6   : > { %1431 = vmatmul.bf16.gmra.mxu3 %v1304_v51  ;;  %v917_v3 = vsel %vm904_vm1, %v914_v41, %v916_v52  ;;  %v919_v39 = vsel %vm904_vm1, %v916_v52, %v918_v27  ;;  %v1308_v51 = vsel %vm904_vm1, %v1305_v5, %v1307_v42 }
  0xc7   : > { %1814 = vmatmul.bf16.gmra.mxu0 %v1602_v47  ;;  %v4654_v58 = vpop.f32.mrf.mxu2 }
  0xc9   : > { %v4656_v59 = vpop.f32.mrf.mxu1  ;;  %v4660_v0 = vpop.f32.mrf.mxu3 }
  0xca   : > { %5475 = vst [vmem:[#allocation4_spill] sm:$0xff] %v4660_v0 }
  0xcc   : > { %v4658_v60 = vpop.f32.mrf.mxu0 }
  0xcf   : > { %v4664_v2 = vpop.f32.mrf.mxu2 }
  0xd1   : > { %v4667_v13 = vpop.f32.mrf.mxu1  ;;  %v4674_v14 = vpop.f32.mrf.mxu3 }
  0xd2   : > { %5476 = vst [vmem:[#allocation5_spill] sm:$0xff] %v4674_v14 }
  0xd4   : > { %v4671_v9 = vpop.f32.mrf.mxu0  ;;  %817 = vmatmul.bf16.gmra.mxu1 %v4413_v4  ;;  %1041 = vmatmul.bf16.gmra.mxu2 %v917_v3 }
  0xd6   : > { %1436 = vmatmul.bf16.gmra.mxu3 %v1306_v62  ;;  %v1309_v62 = vrot.slane %v4127_v11, 1 }
  0xd7   : > { %1819 = vmatmul.bf16.gmra.mxu0 %v1611_v12  ;;  %v4679_v53 = vpop.f32.mrf.mxu2  ;;  %v1628_v12 = vor.u32 %v1627_v21, %v1624_v1  ;;  %v4154_v1 = vld [vmem:[%s4399_s22 + $0x158] sm:$0xff] }
  0xd8   : > { %v1310_v23 = vsel %vm904_vm1, %v1307_v42, %v1309_v62  ;;  %v4195_v21 = vld [vmem:[%s4399_s22 + $0x218] sm:$0xff]  ;;  %2050 = vmatpush.bf16.msra.mxu1 %v4154_v1  ;;  %v922_v42 = vrot.slane %v4501_v18, 1  ;;  %v1643_v1 = vshll.u32 %v4127_v11, 16 }
  0xd9   : > { %v4681_v24 = vpop.f32.mrf.mxu1  ;;  %v4686_v4 = vpop.f32.mrf.mxu3  ;;  %v1629_v19 = vsel %vm1549_vm2, %v1619_v37, %v1628_v12  ;;  %3088 = vmatpush.bf16.msra.mxu0 %v4195_v21 }
  0xda   : > { %5477 = vst [vmem:[#allocation6_spill] sm:$0xff] %v4686_v4  ;;  %v1645_v16 = vrot.slane %v1643_v1, 2 }
  0xdc   : > { %v4684_v56 = vpop.f32.mrf.mxu0 }
  0xdf   : > { %v4690_v38 = vpop.f32.mrf.mxu2 }
  0xe1   : > { %v4692_v41 = vpop.f32.mrf.mxu1  ;;  %v4698_v47 = vpop.f32.mrf.mxu3 }
  0xe2   : > { %5478 = vst [vmem:[#allocation7_spill] sm:$0xff] %v4698_v47 }
  0xe4   : > { %v4695_v45 = vpop.f32.mrf.mxu0  ;;  %822 = vmatmul.bf16.gmra.mxu1 %v4423_v8  ;;  %1046 = vmatmul.bf16.gmra.mxu2 %v919_v39  ;;  %v920_v8 = vrot.slane %v4510_v30, 1  ;;  %v4187_v39 = vld [vmem:[%s4399_s22 + $0x1d8] sm:$0xff] }
  0xe5   : > { %2828 = vmatpush.bf16.msra.mxu3 %v4187_v39 }
  0xe6   : > { %1441 = vmatmul.bf16.gmra.mxu3 %v1308_v51  ;;  %v921_v35 = vsel %vm904_vm1, %v918_v27, %v920_v8  ;;  %v1634_v51 = vshll.u32 %v4126_v28, 16 }
  0xe7   : > { %1824 = vmatmul.bf16.gmra.mxu0 %v1620_v46  ;;  %v4702_v61 = vpop.f32.mrf.mxu2  ;;  %v1631_v46 = vshrl.u32 %v4126_v28, 16 }
  0xe8   : > { %v1636_v57 = vrot.slane %v1634_v51, 2 }
  0xe9   : > { %v4704_v63 = vpop.f32.mrf.mxu1  ;;  %v1402_v3 = vpop.f32.mrf.mxu3 }
  0xec   : > { %v4706_v52 = vpop.f32.mrf.mxu0 }
  0xef   : > { %v4710_v15 = vpop.f32.mrf.mxu2 }
  0xf1   : > { %v4712_v5 = vpop.f32.mrf.mxu1  ;;  %v1404_v33 = vpop.f32.mrf.mxu3 }
  0xf4   : > { %v4715_v17 = vpop.f32.mrf.mxu0  ;;  %827 = vmatmul.bf16.gmra.mxu1 %v4470_v49  ;;  %1051 = vmatmul.bf16.gmra.mxu2 %v921_v35  ;;  %v1633_v49 = vrot.slane %v1631_v46, 1 }
  0xf6   : > { %1446 = vmatmul.bf16.gmra.mxu3 %v1310_v23  ;;  %v1637_v28 = vor.u32 %v1636_v57, %v1633_v49  ;;  %v923_v23 = vsel %vm904_vm1, %v920_v8, %v922_v42  ;;  %v1640_v57 = vshrl.u32 %v4127_v11, 16 }
  0xf7   : > { %1829 = vmatmul.bf16.gmra.mxu0 %v1629_v19  ;;  %v4722_v27 = vpop.f32.mrf.mxu2  ;;  %v4128_v19 = vld [vmem:[%s4410_s29 + $0x60] sm:$0xff] }
  0xf8   : > { %v1311_v39 = vrot.slane %v4128_v19, 1  ;;  %v1638_v4 = vsel %vm1549_vm2, %v1628_v12, %v1637_v28  ;;  %v1642_v12 = vrot.slane %v1640_v57, 1 }
  0xf9   : > { %v4724_v37 = vpop.f32.mrf.mxu1  ;;  %v1407_v35 = vpop.f32.mrf.mxu3 }
  0xfa   : > { %v1312_v51 = vsel %vm904_vm1, %v1309_v62, %v1311_v39 }
  0xfc   : > { %v4726_v55 = vpop.f32.mrf.mxu0 }
  0xff   : > { %v4732_v25 = vpop.f32.mrf.mxu2 }
 0x100   : > { %5479 = vst [vmem:[#allocation8_spill] sm:$0xff] %v4732_v25 }
 0x101   : > { %v793_v40 = vpop.f32.mrf.mxu1  ;;  %v4736_v46 = vpop.f32.mrf.mxu3 }
 0x102   : > { %v794_v49 = vadd.f32 %v793_v40, %v4626_v26  ;;  %v1646_v26 = vor.u32 %v1645_v16, %v1642_v12 }
 0x104   : > { %v1795_v47 = vpop.f32.mrf.mxu0  ;;  %832 = vmatmul.bf16.gmra.mxu1 %v4510_v30  ;;  %1056 = vmatmul.bf16.gmra.mxu2 %v923_v23  ;;  %v4747_v23 = vld [vmem:[%s4410_s29 + $0x68] sm:$0xff]  ;;  %v1647_v1 = vsel %vm1549_vm2, %v1637_v28, %v1646_v26 }
 0x106   : > { %1451 = vmatmul.bf16.gmra.mxu3 %v1312_v51 }
 0x107   : > { %1834 = vmatmul.bf16.gmra.mxu0 %v1638_v4  ;;  %v1017_v21 = vpop.f32.mrf.mxu2  ;;  %v924_v4 = vrot.slane %v4417_v6, 1 }
 0x108   : > { %v1107_v14 = vadd.f32 %v1017_v21, %v794_v49 }
 0x109   : > { %v795_v8 = vpop.f32.mrf.mxu1  ;;  %v4741_v25 = vpop.f32.mrf.mxu3  ;;  %v925_v51 = vsel %vm904_vm1, %v922_v42, %v924_v4 }
 0x10a   : > { %v1492_v0 = vadd.f32 %v1402_v3, %v1107_v14  ;;  %v796_v40 = vadd.f32 %v795_v8, %v4636_v36  ;;  %v1313_v14 = vrot.slane %v4747_v23, 1 }
 0x10c   : > { %v1797_v48 = vpop.f32.mrf.mxu0  ;;  %v4743_v30 = vadd.f32 %v1795_v47, %v1492_v0  ;;  %v1314_v36 = vsel %vm904_vm1, %v1311_v39, %v1313_v14  ;;  %v1649_v47 = vshrl.u32 %v4128_v19, 16  ;;  %v4130_v39 = vld [vmem:[%s4410_s29 + $0x70] sm:$0xff] }
 0x10e   : > { %v1651_v12 = vrot.slane %v1649_v47, 1  ;;  %v1315_v47 = vrot.slane %v4130_v39, 1 }
 0x10f   : > { %v1019_v11 = vpop.f32.mrf.mxu2 }
 0x110   : > { %v1108_v62 = vadd.f32 %v1019_v11, %v796_v40  ;;  %v4178_v11 = vld [vmem:[%s4399_s22 + $0x190] sm:$0xff] }
 0x111   : > { %v798_v49 = vpop.f32.mrf.mxu1  ;;  %v4753_v0 = vpop.f32.mrf.mxu3  ;;  %2436 = vmatpush.bf16.msra.mxu2 %v4178_v11 }
 0x112   : > { %v1493_v3 = vadd.f32 %v1404_v33, %v1108_v62  ;;  %v799_v16 = vadd.f32 %v798_v49, %v4647_v7  ;;  %v1652_v33 = vshll.u32 %v4128_v19, 16  ;;  %v4153_v62 = vld [vmem:[%s4399_s22 + $0x150] sm:$0xff]  ;;  %v926_v19 = vrot.slane %v4427_v10, 1 }
 0x113   : > { %2051 = vmatpush.bf16.msra.mxu1 %v4153_v62  ;;  %v4277_v10 = vld [vmem:[%s4410_s29 + $0x50] sm:$0xff] }
 0x114   : > { %v1800_v57 = vpop.f32.mrf.mxu0  ;;  %837 = vmatmul.bf16.gmra.mxu1 %v4501_v18  ;;  %1061 = vmatmul.bf16.gmra.mxu2 %v925_v51  ;;  %v4756_v6 = vadd.f32 %v1797_v48, %v1493_v3  ;;  %v1654_v40 = vrot.slane %v1652_v33, 2  ;;  %v4186_v48 = vld [vmem:[%s4399_s22 + $0x1d0] sm:$0xff] }
 0x115   : > { %2829 = vmatpush.bf16.msra.mxu3 %v4186_v48 }
 0x116   : > { %1456 = vmatmul.bf16.gmra.mxu3 %v1314_v36  ;;  %v1655_v49 = vor.u32 %v1654_v40, %v1651_v12 }
 0x117   : > { %1839 = vmatmul.bf16.gmra.mxu0 %v1647_v1  ;;  %v1022_v42 = vpop.f32.mrf.mxu2 }
 0x118   : > { %v1109_v21 = vadd.f32 %v1022_v42, %v799_v16  ;;  %v927_v16 = vsel %vm904_vm1, %v924_v4, %v926_v19 }
 0x119   : > { %v800_v28 = vpop.f32.mrf.mxu1  ;;  %v4763_v51 = vpop.f32.mrf.mxu3 }
 0x11a   : > { %v1494_v8 = vadd.f32 %v1407_v35, %v1109_v21  ;;  %v801_v35 = vadd.f32 %v800_v28, %v4658_v60  ;;  %v4194_v21 = vld [vmem:[%s4399_s22 + $0x210] sm:$0xff]  ;;  %v1316_v60 = vsel %vm904_vm1, %v1313_v14, %v1315_v47  ;;  %v1658_v28 = vshrl.u32 %v4747_v23, 16 }
 0x11b   : > { %3089 = vmatpush.bf16.msra.mxu0 %v4194_v21 }
 0x11c   : > { %v1802_v18 = vpop.f32.mrf.mxu0  ;;  %v4765_v7 = vadd.f32 %v1800_v57, %v1494_v8  ;;  %v1656_v57 = vsel %vm1549_vm2, %v1646_v26, %v1655_v49 }
 0x11f   : > { %v1024_v3 = vpop.f32.mrf.mxu2 }
 0x120   : > { %v1110_v1 = vadd.f32 %v1024_v3, %v801_v35 }
 0x121   : > { %v803_v36 = vpop.f32.mrf.mxu1  ;;  %v4774_v8 = vpop.f32.mrf.mxu3 }
 0x122   : > { %v1495_v33 = vadd.f32 %v4736_v46, %v1110_v1  ;;  %v804_v4 = vadd.f32 %v803_v36, %v4671_v9  ;;  %v1661_v46 = vshll.u32 %v4747_v23, 16  ;;  %v928_v9 = vrot.slane %v4473_v50, 1  ;;  %v4790_v1 = vld [vmem:[%s4410_s29 + $0x78] sm:$0xff] }
 0x123   : > { %v1317_v21 = vrot.slane %v4790_v1, 1  ;;  %v4278_v50 = vld [vmem:[%s4410_s29 + $0x58] sm:$0xff] }
 0x124   : > { %v1805_v42 = vpop.f32.mrf.mxu0  ;;  %842 = vmatmul.bf16.gmra.mxu1 %v4277_v10  ;;  %1066 = vmatmul.bf16.gmra.mxu2 %v927_v16  ;;  %v4777_v11 = vadd.f32 %v1802_v18, %v1495_v33  ;;  %v1660_v18 = vrot.slane %v1658_v28, 1  ;;  %v1663_v35 = vrot.slane %v1661_v46, 2  ;;  %v1667_v46 = vshrl.u32 %v4130_v39, 16 }
 0x125   : > { %v1318_v28 = vsel %vm904_vm1, %v1315_v47, %v1317_v21  ;;  %v4813_v47 = vld [vmem:[%s4410_s29 + $0x80] sm:$0xff] }
 0x126   : > { %1461 = vmatmul.bf16.gmra.mxu3 %v1316_v60  ;;  %v1664_v36 = vor.u32 %v1663_v35, %v1660_v18  ;;  %v1669_v18 = vrot.slane %v1667_v46, 1  ;;  %v4152_v46 = vld [vmem:[%s4399_s22 + $0x148] sm:$0xff] }
 0x127   : > { %1844 = vmatmul.bf16.gmra.mxu0 %v1656_v57  ;;  %v1027_v26 = vpop.f32.mrf.mxu2  ;;  %2052 = vmatpush.bf16.msra.mxu1 %v4152_v46 }
 0x128   : > { %v1111_v12 = vadd.f32 %v1027_v26, %v804_v4  ;;  %v1670_v26 = vshll.u32 %v4130_v39, 16  ;;  %v930_v39 = vrot.slane %v4513_v31, 1 }
 0x129   : > { %v805_v40 = vpop.f32.mrf.mxu1  ;;  %v4784_v3 = vpop.f32.mrf.mxu3 }
 0x12a   : > { %v1496_v48 = vadd.f32 %v4741_v25, %v1111_v12  ;;  %v806_v23 = vadd.f32 %v805_v40, %v4684_v56  ;;  %v929_v25 = vsel %vm904_vm1, %v926_v19, %v928_v9  ;;  %v1672_v35 = vrot.slane %v1670_v26, 2 }
 0x12c   : > { %v1807_v62 = vpop.f32.mrf.mxu0  ;;  %v4786_v14 = vadd.f32 %v1805_v42, %v1496_v48  ;;  %v1665_v42 = vsel %vm1549_vm2, %v1655_v49, %v1664_v36 }
 0x12f   : > { %v1029_v16 = vpop.f32.mrf.mxu2 }
 0x130   : > { %v1112_v33 = vadd.f32 %v1029_v16, %v806_v23  ;;  %v4177_v23 = vld [vmem:[%s4399_s22 + $0x188] sm:$0xff] }
 0x131   : > { %v808_v57 = vpop.f32.mrf.mxu1  ;;  %v4797_v4 = vpop.f32.mrf.mxu3  ;;  %2437 = vmatpush.bf16.msra.mxu2 %v4177_v23 }
 0x132   : > { %v1497_v10 = vadd.f32 %v4753_v0, %v1112_v33  ;;  %v809_v19 = vadd.f32 %v808_v57, %v4695_v45 }
 0x134   : > { %v1810_v60 = vpop.f32.mrf.mxu0  ;;  %847 = vmatmul.bf16.gmra.mxu1 %v4278_v50  ;;  %1071 = vmatmul.bf16.gmra.mxu2 %v929_v25  ;;  %v4800_v56 = vadd.f32 %v1807_v62, %v1497_v10  ;;  %v4185_v62 = vld [vmem:[%s4399_s22 + $0x1c8] sm:$0xff]  ;;  %v1319_v50 = vrot.slane %v4813_v47, 1 }
 0x135   : > { %2830 = vmatpush.bf16.msra.mxu3 %v4185_v62 }
 0x136   : > { %1466 = vmatmul.bf16.gmra.mxu3 %v1318_v28 }
 0x137   : > { %1849 = vmatmul.bf16.gmra.mxu0 %v1665_v42  ;;  %v1032_v0 = vpop.f32.mrf.mxu2  ;;  %v931_v42 = vsel %vm904_vm1, %v928_v9, %v930_v39  ;;  %v4193_v9 = vld [vmem:[%s4399_s22 + $0x208] sm:$0xff] }
 0x138   : > { %v1113_v12 = vadd.f32 %v1032_v0, %v809_v19  ;;  %v4279_v0 = vld [vmem:[%s4410_s29 + $0x60] sm:$0xff]  ;;  %3090 = vmatpush.bf16.msra.mxu0 %v4193_v9 }
 0x139   : > { %v810_v49 = vpop.f32.mrf.mxu1  ;;  %v4807_v16 = vpop.f32.mrf.mxu3 }
 0x13a   : > { %v1498_v40 = vadd.f32 %v4763_v51, %v1113_v12  ;;  %v811_v33 = vadd.f32 %v810_v49, %v4706_v52  ;;  %v1673_v51 = vor.u32 %v1672_v35, %v1669_v18  ;;  %v1320_v12 = vsel %vm904_vm1, %v1317_v21, %v1319_v50 }
 0x13c   : > { %v1812_v48 = vpop.f32.mrf.mxu0  ;;  %v4809_v45 = vadd.f32 %v1810_v60, %v1498_v40  ;;  %v1674_v60 = vsel %vm1549_vm2, %v1664_v36, %v1673_v51  ;;  %v1679_v36 = vshll.u32 %v4790_v1, 16 }
 0x13f   : > { %v1034_v57 = vpop.f32.mrf.mxu2 }
 0x140   : > { %v1114_v25 = vadd.f32 %v1034_v57, %v811_v33  ;;  %v1681_v33 = vrot.slane %v1679_v36, 2 }
 0x141   : > { %v813_v10 = vpop.f32.mrf.mxu1  ;;  %v4821_v26 = vpop.f32.mrf.mxu3 }
 0x142   : > { %v1499_v28 = vadd.f32 %v4774_v8, %v1114_v25  ;;  %v814_v49 = vadd.f32 %v813_v10, %v4715_v17  ;;  %v1676_v8 = vshrl.u32 %v4790_v1, 16  ;;  %v932_v17 = vrot.slane %v4555_v20, 1  ;;  %v4838_v25 = vld [vmem:[%s4410_s29 + $0x88] sm:$0xff] }
 0x144   : > { %v1815_v19 = vpop.f32.mrf.mxu0  ;;  %852 = vmatmul.bf16.gmra.mxu1 %v4279_v0  ;;  %1076 = vmatmul.bf16.gmra.mxu2 %v931_v42  ;;  %v4824_v52 = vadd.f32 %v1812_v48, %v1499_v28  ;;  %v1678_v62 = vrot.slane %v1676_v8, 1  ;;  %v933_v46 = vsel %vm904_vm1, %v930_v39, %v932_v17  ;;  %v1685_v8 = vshrl.u32 %v4813_v47, 16 }
 0x146   : > { %1471 = vmatmul.bf16.gmra.mxu3 %v1320_v12  ;;  %v1682_v10 = vor.u32 %v1681_v33, %v1678_v62  ;;  %v4861_v33 = vld [vmem:[%s4410_s29 + $0x90] sm:$0xff] }
 0x147   : > { %1854 = vmatmul.bf16.gmra.mxu0 %v1674_v60  ;;  %v1037_v40 = vpop.f32.mrf.mxu2 }
 0x148   : > { %v1115_v18 = vadd.f32 %v1037_v40, %v814_v49 }
 0x149   : > { %v815_v35 = vpop.f32.mrf.mxu1  ;;  %v4832_v21 = vpop.f32.mrf.mxu3 }
 0x14a   : > { %v1500_v48 = vadd.f32 %v4784_v3, %v1115_v18  ;;  %v816_v1 = vadd.f32 %v815_v35, %v4726_v55  ;;  %v1321_v3 = vrot.slane %v4838_v25, 1  ;;  %v1687_v35 = vrot.slane %v1685_v8, 1 }
 0x14c   : > { %v1817_v23 = vpop.f32.mrf.mxu0  ;;  %v4834_v57 = vadd.f32 %v1815_v19, %v1500_v48  ;;  %v1683_v19 = vsel %vm1549_vm2, %v1673_v51, %v1682_v10  ;;  %v1322_v55 = vsel %vm904_vm1, %v1319_v50, %v1321_v3 }
 0x14f   : > { %v1039_v42 = vpop.f32.mrf.mxu2 }
 0x150   : > { %v1116_v28 = vadd.f32 %v1039_v42, %v816_v1 }
 0x151   : > { %v818_v60 = vpop.f32.mrf.mxu1  ;;  %v4845_v9 = vpop.f32.mrf.mxu3 }
 0x152   : > { %v1501_v0 = vadd.f32 %v4797_v4, %v1116_v28  ;;  %v819_v39 = vadd.f32 %v818_v60, %v4623_v22  ;;  %v1688_v4 = vshll.u32 %v4813_v47, 16  ;;  %v4280_v22 = vld [vmem:[%s4410_s29 + $0x78] sm:$0xff] }
 0x153   : > { %v934_v62 = vrot.slane %v4280_v22, 1 }
 0x154   : > { %v1820_v12 = vpop.f32.mrf.mxu0  ;;  %857 = vmatmul.bf16.gmra.mxu1 %v4513_v31  ;;  %1081 = vmatmul.bf16.gmra.mxu2 %v933_v46  ;;  %v4848_v49 = vadd.f32 %v1817_v23, %v1501_v0  ;;  %v1690_v48 = vrot.slane %v1688_v4, 2  ;;  %v1323_v46 = vrot.slane %v4861_v33, 1 }
 0x155   : > { %v935_v60 = vsel %vm904_vm1, %v932_v17, %v934_v62 }
 0x156   : > { %1476 = vmatmul.bf16.gmra.mxu3 %v1322_v55  ;;  %v1691_v1 = vor.u32 %v1690_v48, %v1687_v35  ;;  %v4176_v55 = vld [vmem:[%s4399_s22 + $0x180] sm:$0xff]  ;;  %v1324_v17 = vsel %vm904_vm1, %v1321_v3, %v1323_v46 }
 0x157   : > { %1859 = vmatmul.bf16.gmra.mxu0 %v1683_v19  ;;  %v1042_v36 = vpop.f32.mrf.mxu2  ;;  %2438 = vmatpush.bf16.msra.mxu2 %v4176_v55 }
 0x158   : > { %v1117_v51 = vadd.f32 %v1042_v36, %v819_v39  ;;  %v4184_v39 = vld [vmem:[%s4399_s22 + $0x1c0] sm:$0xff]  ;;  %v1697_v36 = vshll.u32 %v4838_v25, 16 }
 0x159   : > { %v820_v40 = vpop.f32.mrf.mxu1  ;;  %v4855_v23 = vpop.f32.mrf.mxu3  ;;  %2831 = vmatpush.bf16.msra.mxu3 %v4184_v39 }
 0x15a   : > { %v1502_v31 = vadd.f32 %v4807_v16, %v1117_v51  ;;  %v821_v47 = vadd.f32 %v820_v40, %v4634_v32  ;;  %v4151_v32 = vld [vmem:[%s4399_s22 + $0x140] sm:$0xff]  ;;  %v1179_v51 = vld [vmem:[%s4410_s29 + $0x98] sm:$0x1] }
 0x15b   : > { %2053 = vmatpush.bf16.msra.mxu1 %v4151_v32 }
 0x15c   : > { %v1822_v18 = vpop.f32.mrf.mxu0  ;;  %v4857_v50 = vadd.f32 %v1820_v12, %v1502_v31  ;;  %v1692_v12 = vsel %vm1549_vm2, %v1682_v10, %v1691_v1  ;;  %v1694_v10 = vshrl.u32 %v4838_v25, 16 }
 0x15e   : > { %5480 = vst [vmem:[#allocation9_spill] sm:$0xff] %v4857_v50  ;;  %v1696_v48 = vrot.slane %v1694_v10, 1 }
 0x15f   : > { %v1044_v42 = vpop.f32.mrf.mxu2 }
 0x160   : > { %v1118_v28 = vadd.f32 %v1044_v42, %v821_v47  ;;  %v1699_v47 = vrot.slane %v1697_v36, 2  ;;  %v4192_v42 = vld [vmem:[%s4399_s22 + $0x200] sm:$0xff]  ;;  %v2181_v36 = vld [vmem:[%s4410_s29 + $0x10] sm:$0xc] }
 0x161   : > { %v823_v16 = vpop.f32.mrf.mxu1  ;;  %v4870_v8 = vpop.f32.mrf.mxu3  ;;  %3091 = vmatpush.bf16.msra.mxu0 %v4192_v42 }
 0x162   : > { %v1503_v0 = vadd.f32 %v4821_v26, %v1118_v28  ;;  %v824_v26 = vadd.f32 %v823_v16, %v4644_v44  ;;  %v4888_v28 = vld [vmem:[%s4410_s29 + $0x80] sm:$0xff] }
 0x163   : > { %v936_v16 = vrot.slane %v4888_v28, 1 }
 0x164   : > { %v1825_v19 = vpop.f32.mrf.mxu0  ;;  %862 = vmatmul.bf16.gmra.mxu1 %v4555_v20  ;;  %1086 = vmatmul.bf16.gmra.mxu2 %v935_v60  ;;  %v4874_v4 = vadd.f32 %v1822_v18, %v1503_v0  ;;  %v1270_v18 = vunpack.c.l.b16 %v1179_v51  ;;  %v4897_v51 = vld [vmem:[%s4410_s29 + $0x14] sm:$0xf] }
 0x165   : > { %v937_v32 = vsel %vm904_vm1, %v934_v62, %v936_v16 }
 0x166   : > { %5481 = vst [vmem:[#allocation10_spill] sm:$0xff] %v4874_v4  ;;  %1481 = vmatmul.bf16.gmra.mxu3 %v1324_v17  ;;  %v1289_v60 = vpack.c.b16 %v1270_v18, %v1270_v18  ;;  %v4906_v18 = vld [vmem:[%s4410_s29 + $0x18] sm:$0xff] }
 0x167   : > { %1864 = vmatmul.bf16.gmra.mxu0 %v1692_v12  ;;  %v1047_v20 = vpop.f32.mrf.mxu2  ;;  %v1700_v12 = vor.u32 %v1699_v47, %v1696_v48 }
 0x168   : > { %v1119_v40 = vadd.f32 %v1047_v20, %v824_v26  ;;  %v1325_v17 = vrot.slane %v1289_v60, 1  ;;  %v2597_v60 = vshrl.u32 %v4906_v18, 16 }
 0x169   : > { %v825_v31 = vpop.f32.mrf.mxu1  ;;  %v4883_v44 = vpop.f32.mrf.mxu3 }
 0x16a   : > { %v1504_v35 = vadd.f32 %v4832_v21, %v1119_v40  ;;  %v826_v0 = vadd.f32 %v825_v31, %v4656_v59  ;;  %v2272_v40 = vunpack.c.l.b16 %v2181_v36  ;;  %v5472_v59 = vunpack.c.l.b16 %v4897_v51 }
 0x16b   : > { %v1326_v62 = vsel %vm904_vm1, %v1323_v46, %v1325_v17  ;;  %v4282_v17 = vld [vmem:[%s4410_s29 + $0x88] sm:$0xff] }
 0x16c   : > { %v1827_v3 = vpop.f32.mrf.mxu0  ;;  %v4885_v25 = vadd.f32 %v1825_v19, %v1504_v35  ;;  %v1701_v19 = vsel %vm1549_vm2, %v1691_v1, %v1700_v12  ;;  %v1703_v35 = vshrl.u32 %v4861_v33, 16 }
 0x16e   : > { %5482 = vst [vmem:[#allocation11_spill] sm:$0xff] %v4885_v25 }
 0x16f   : > { %v1049_v21 = vpop.f32.mrf.mxu2 }
 0x170   : > { %v1120_v55 = vadd.f32 %v1049_v21, %v826_v0  ;;  %v2600_v0 = vshll.u32 %v4906_v18, 16 }
 0x171   : > { %v828_v39 = vpop.f32.mrf.mxu1  ;;  %v4899_v20 = vpop.f32.mrf.mxu3 }
 0x172   : > { %v1505_v26 = vadd.f32 %v4845_v9, %v1120_v55  ;;  %v4910_v9 = vpack.c.b16 %v5472_v59, %v2272_v40  ;;  %v829_v1 = vadd.f32 %v828_v39, %v4667_v13  ;;  %v1705_v55 = vrot.slane %v1703_v35, 1 }
 0x174   : > { %v1830_v10 = vpop.f32.mrf.mxu0  ;;  %867 = vmatmul.bf16.gmra.mxu1 %v4280_v22  ;;  %1091 = vmatmul.bf16.gmra.mxu2 %v937_v32  ;;  %v4902_v31 = vadd.f32 %v1827_v3, %v1505_v26  ;;  %v1706_v22 = vshll.u32 %v4861_v33, 16  ;;  %v2589_v46 = vshrl.u32 %v4910_v9, 16  ;;  %v2592_v42 = vshll.u32 %v4910_v9, 16  ;;  %v1528_v33 = vld [vmem:[%s4410_s29 + $0x98] sm:$0x3] }
 0x175   : > { %v938_v26 = vrot.slane %v4282_v17, 1 }
 0x176   : > { %5483 = vst [vmem:[#allocation12_spill] sm:$0xff] %v4902_v31  ;;  %1486 = vmatmul.bf16.gmra.mxu3 %v1326_v62  ;;  %v1708_v39 = vrot.slane %v1706_v22, 2  ;;  %v2591_v36 = vrot.slane %v2589_v46, 2  ;;  %v2594_v40 = vrot.slane %v2592_v42, 3  ;;  %v2599_v62 = vrot.slane %v2597_v60, 2 }
 0x177   : > { %1869 = vmatmul.bf16.gmra.mxu0 %v1701_v19  ;;  %v1052_v48 = vpop.f32.mrf.mxu2  ;;  %v1547_v31 = vunpack.c.l.b16 %v1528_v33  ;;  %v939_v22 = vsel %vm904_vm1, %v936_v16, %v938_v26  ;;  %v4939_v16 = vld [vmem:[%s4410_s29 + $0x20] sm:$0xff] }
 0x178   : > { %v1121_v3 = vadd.f32 %v1052_v48, %v829_v1  ;;  %v2602_v1 = vrot.slane %v2600_v0, 3  ;;  %v1709_v59 = vor.u32 %v1708_v39, %v1705_v55 }
 0x179   : > { %v830_v47 = vpop.f32.mrf.mxu1  ;;  %v4920_v32 = vpop.f32.mrf.mxu3  ;;  %v4930_v42 = vpack.c.b16 %v1547_v31, %v1547_v31 }
 0x17a   : > { %v1506_v13 = vadd.f32 %v4855_v23, %v1121_v3  ;;  %v831_v48 = vadd.f32 %v830_v47, %v4681_v24  ;;  %v2595_v3 = vor.u32 %v2594_v40, %v2591_v36  ;;  %v2603_v4 = vor.u32 %v2602_v1, %v2599_v62 }
 0x17b   : > { %v1710_v46 = vsel %vm1549_vm2, %v1700_v12, %v1709_v59  ;;  %v1712_v47 = vshrl.u32 %v4930_v42, 16  ;;  %v1715_v12 = vshll.u32 %v4930_v42, 16  ;;  %v940_v40 = vrot.slane %v4537_v54, 1 }
 0x17c   : > { %v1832_v21 = vpop.f32.mrf.mxu0  ;;  %v4924_v19 = vadd.f32 %v1830_v10, %v1506_v13 }
 0x17d   : > { %v1714_v39 = vrot.slane %v1712_v47, 1  ;;  %v1717_v33 = vrot.slane %v1715_v12, 2  ;;  %v2959_v12 = vld [vmem:[%s4410_s29 + $0x10] sm:$0x8] }
 0x17f   : > { %v1054_v25 = vpop.f32.mrf.mxu2 }
 0x180   : > { %v1122_v23 = vadd.f32 %v1054_v25, %v831_v48  ;;  %v2604_v25 = vsel %vm2587_vm3, %v2595_v3, %v2603_v4 }
 0x181   : > { %v833_v35 = vpop.f32.mrf.mxu1  ;;  %v4932_v60 = vpop.f32.mrf.mxu3 }
 0x182   : > { %v1507_v50 = vadd.f32 %v4870_v8, %v1122_v23  ;;  %v834_v8 = vadd.f32 %v833_v35, %v4692_v41  ;;  %v1718_v23 = vor.u32 %v1717_v33, %v1714_v39 }
 0x184   : > { %v1835_v10 = vpop.f32.mrf.mxu0  ;;  %872 = vmatmul.bf16.gmra.mxu1 %v4888_v28  ;;  %1096 = vmatmul.bf16.gmra.mxu2 %v939_v22  ;;  %v4935_v24 = vadd.f32 %v1832_v21, %v1507_v50  ;;  %v2606_v28 = vshrl.u32 %v4939_v16, 16  ;;  %v2609_v50 = vshll.u32 %v4939_v16, 16 }
 0x186   : > { %2832 = vmatmul.bf16.vlgmr.msra.gmra.mxu3 %v2604_v25  ;;  %v2608_v62 = vrot.slane %v2606_v28, 2  ;;  %v2611_v1 = vrot.slane %v2609_v50, 3 }
 0x187   : > { %1874 = vmatmul.bf16.gmra.mxu0 %v1710_v46  ;;  %v1057_v31 = vpop.f32.mrf.mxu2  ;;  %v1921_v46 = vld [vmem:[%s4410_s29 + $0x8] sm:$0xc] }
 0x188   : > { %v1123_v0 = vadd.f32 %v1057_v31, %v834_v8  ;;  %v2612_v25 = vor.u32 %v2611_v1, %v2608_v62 }
 0x189   : > { %v835_v13 = vpop.f32.mrf.mxu1  ;;  %v4947_v36 = vpop.f32.mrf.mxu3 }
 0x18a   : > { %v1508_v21 = vadd.f32 %v4883_v44, %v1123_v0  ;;  %v836_v48 = vadd.f32 %v835_v13, %v4704_v63  ;;  %v941_v44 = vsel %vm904_vm1, %v938_v26, %v940_v40  ;;  %v1940_v63 = vunpack.c.l.b16 %v1921_v46  ;;  %v4964_v26 = vld [vmem:[%s4410_s29 + $0x28] sm:$0xff] }
 0x18b   : > { %v2613_v0 = vsel %vm2587_vm3, %v2603_v4, %v2612_v25  ;;  %v2615_v39 = vshrl.u32 %v4964_v26, 16  ;;  %v5485_v40 = vunpack.c.l.b16 %v4897_v51  ;;  %v2982_v51 = vrot.slane %v4906_v18, 3 }
 0x18c   : > { %v1837_v55 = vpop.f32.mrf.mxu0  ;;  %v4949_v41 = vadd.f32 %v1835_v10, %v1508_v21  ;;  %v1719_v10 = vsel %vm1549_vm2, %v1709_v59, %v1718_v23  ;;  %v5484_v59 = vunpack.c.l.b16 %v4568_v34  ;;  %v2328_v34 = vrot.slane %v4910_v9, 2 }
 0x18e   : > { %v1941_v21 = vpack.c.b16 %v5484_v59, %v1940_v63 }
 0x18f   : > { %v1059_v35 = vpop.f32.mrf.mxu2 }
 0x190   : > { %v1124_v22 = vadd.f32 %v1059_v35, %v836_v48  ;;  %v4283_v48 = vld [vmem:[%s4410_s29 + $0x10] sm:$0xff] }
 0x191   : > { %v838_v3 = vpop.f32.mrf.mxu1  ;;  %v4958_v54 = vpop.f32.mrf.mxu3  ;;  %v1944_v23 = vrot.slane %v4283_v48, 2  ;;  %v2331_v48 = vrot.slane %v4939_v16, 2 }
 0x192   : > { %v1509_v8 = vadd.f32 %v4899_v20, %v1124_v22  ;;  %v839_v13 = vadd.f32 %v838_v3, %v4712_v5  ;;  %v2978_v20 = vunpack.c.l.b16 %v2959_v12  ;;  %v1943_v5 = vrot.slane %v1941_v21, 2 }
 0x193   : > { %v2329_v22 = vrot.slane %v4906_v18, 2  ;;  %v2617_v3 = vrot.slane %v2615_v39, 2 }
 0x194   : > { %v1840_v47 = vpop.f32.mrf.mxu0  ;;  %877 = vmatmul.bf16.gmra.mxu1 %v4282_v17  ;;  %1101 = vmatmul.bf16.gmra.mxu2 %v941_v44  ;;  %v4960_v31 = vadd.f32 %v1837_v55, %v1509_v8  ;;  %v2618_v55 = vshll.u32 %v4964_v26, 16  ;;  %v2979_v62 = vpack.c.b16 %v5485_v40, %v2978_v20 }
 0x195   : > { %v2330_v9 = vsel %vm1942_vm4, %v2328_v34, %v2329_v22 }
 0x196   : > { %2837 = vmatmul.bf16.gmra.mxu3 %v2613_v0  ;;  %v2620_v44 = vrot.slane %v2618_v55, 3 }
 0x197   : > { %1879 = vmatmul.bf16.gmra.mxu0 %v1719_v10  ;;  %v1062_v28 = vpop.f32.mrf.mxu2 }
 0x198   : > { %v1125_v50 = vadd.f32 %v1062_v28, %v839_v13  ;;  %v2621_v63 = vor.u32 %v2620_v44, %v2617_v3  ;;  %v2984_v44 = vrot.slane %v4939_v16, 3 }
 0x199   : > { %v840_v17 = vpop.f32.mrf.mxu1  ;;  %v4974_v1 = vpop.f32.mrf.mxu3 }
 0x19a   : > { %v1510_v33 = vadd.f32 %v4920_v32, %v1125_v50  ;;  %v841_v46 = vadd.f32 %v840_v17, %v4724_v37  ;;  %v2981_v32 = vrot.slane %v2979_v62, 3  ;;  %v2622_v28 = vsel %vm2587_vm3, %v2612_v25, %v2621_v63  ;;  %v4993_v50 = vld [vmem:[%s4410_s29 + $0x30] sm:$0xff]  ;;  %v4284_v62 = vld [vmem:[%s4410_s29 + $0x18] sm:$0xff] }
 0x19b   : > { %v2624_v39 = vshrl.u32 %v4993_v50, 16  ;;  %v2627_v55 = vshll.u32 %v4993_v50, 16 }
 0x19c   : > { %v1842_v4 = vpop.f32.mrf.mxu0  ;;  %v4977_v35 = vadd.f32 %v1840_v47, %v1510_v33  ;;  %v1945_v47 = vsel %vm1942_vm4, %v1943_v5, %v1944_v23  ;;  %v2983_v37 = vsel %vm2980_vm5, %v2981_v32, %v2982_v51  ;;  %v1946_v5 = vrot.slane %v4284_v62, 2 }
 0x19d   : > { %v2629_v34 = vrot.slane %v2627_v55, 3 }
 0x19f   : > { %v1064_v8 = vpop.f32.mrf.mxu2 }
 0x1a0   : > { %v1126_v10 = vadd.f32 %v1064_v8, %v841_v46 }
 0x1a1   : > { %v843_v12 = vpop.f32.mrf.mxu1  ;;  %v4987_v20 = vpop.f32.mrf.mxu3 }
 0x1a2   : > { %v1511_v0 = vadd.f32 %v4932_v60, %v1126_v10  ;;  %v844_v60 = vadd.f32 %v843_v12, %v4632_v29  ;;  %v2626_v29 = vrot.slane %v2624_v39, 2  ;;  %v2332_v10 = vsel %vm1942_vm4, %v2329_v22, %v2331_v48 }
 0x1a4   : > { %v1845_v13 = vpop.f32.mrf.mxu0  ;;  %2054 = vmatmul.bf16.vlgmr.msra.gmra.mxu1 %v1945_v47  ;;  %2439 = vmatmul.bf16.vlgmr.msra.gmra.mxu2 %v2330_v9  ;;  %v4989_v18 = vadd.f32 %v1842_v4, %v1511_v0  ;;  %v2630_v12 = vor.u32 %v2629_v34, %v2626_v29  ;;  %v2985_v0 = vsel %vm2980_vm5, %v2982_v51, %v2984_v44  ;;  %v2986_v29 = vrot.slane %v4964_v26, 3 }
 0x1a6   : > { %2842 = vmatmul.bf16.gmra.mxu3 %v2622_v28  ;;  %v2631_v16 = vsel %vm2587_vm3, %v2621_v63, %v2630_v12  ;;  %v4285_v63 = vld [vmem:[%s4410_s29 + $0x20] sm:$0xff] }
 0x1a7   : > { %3092 = vmatmul.bf16.vlgmr.msra.gmra.mxu0 %v2983_v37  ;;  %v1067_v59 = vpop.f32.mrf.mxu2  ;;  %v5023_v37 = vld [vmem:[%s4410_s29 + $0x38] sm:$0xff]  ;;  %v1948_v55 = vrot.slane %v4285_v63, 2 }
 0x1a8   : > { %v1127_v21 = vadd.f32 %v1067_v59, %v844_v60  ;;  %v2633_v51 = vshrl.u32 %v5023_v37, 16  ;;  %v2636_v60 = vshll.u32 %v5023_v37, 16 }
 0x1a9   : > { %v845_v17 = vpop.f32.mrf.mxu1  ;;  %v5005_v4 = vpop.f32.mrf.mxu3 }
 0x1aa   : > { %v1512_v33 = vadd.f32 %v4947_v36, %v1127_v21  ;;  %v846_v3 = vadd.f32 %v845_v17, %v4642_v43  ;;  %v1947_v36 = vsel %vm1942_vm4, %v1944_v23, %v1946_v5 }
 0x1ac   : > { %v1847_v25 = vpop.f32.mrf.mxu0  ;;  %v5007_v40 = vadd.f32 %v1845_v13, %v1512_v33  ;;  %v2333_v33 = vrot.slane %v4964_v26, 2 }
 0x1af   : > { %v1069_v46 = vpop.f32.mrf.mxu2 }
 0x1b0   : > { %v1128_v32 = vadd.f32 %v1069_v46, %v846_v3 }
 0x1b1   : > { %v848_v8 = vpop.f32.mrf.mxu1  ;;  %v5017_v13 = vpop.f32.mrf.mxu3 }
 0x1b2   : > { %v1513_v47 = vadd.f32 %v4958_v54, %v1128_v32  ;;  %v849_v23 = vadd.f32 %v848_v8, %v4654_v58  ;;  %v2635_v58 = vrot.slane %v2633_v51, 2  ;;  %v2334_v32 = vsel %vm1942_vm4, %v2331_v48, %v2333_v33 }
 0x1b4   : > { %v1850_v9 = vpop.f32.mrf.mxu0  ;;  %2059 = vmatmul.bf16.gmra.mxu1 %v1947_v36  ;;  %2444 = vmatmul.bf16.gmra.mxu2 %v2332_v10  ;;  %v5019_v43 = vadd.f32 %v1847_v25, %v1513_v47  ;;  %v2638_v25 = vrot.slane %v2636_v60, 3  ;;  %v2987_v47 = vsel %vm2980_vm5, %v2984_v44, %v2986_v29 }
 0x1b6   : > { %2847 = vmatmul.bf16.gmra.mxu3 %v2631_v16  ;;  %v2639_v8 = vor.u32 %v2638_v25, %v2635_v58  ;;  %v2988_v58 = vrot.slane %v4993_v50, 3 }
 0x1b7   : > { %3097 = vmatmul.bf16.gmra.mxu0 %v2985_v0  ;;  %v1072_v22 = vpop.f32.mrf.mxu2  ;;  %v5047_v0 = vld [vmem:[%s4410_s29 + $0x40] sm:$0xff] }
 0x1b8   : > { %v1129_v28 = vadd.f32 %v1072_v22, %v849_v23  ;;  %v2640_v26 = vsel %vm2587_vm3, %v2630_v12, %v2639_v8  ;;  %v2642_v44 = vshrl.u32 %v5047_v0, 16  ;;  %v2645_v23 = vshll.u32 %v5047_v0, 16  ;;  %v4286_v12 = vld [vmem:[%s4410_s29 + $0x28] sm:$0xff] }
 0x1b9   : > { %v850_v54 = vpop.f32.mrf.mxu1  ;;  %v5029_v17 = vpop.f32.mrf.mxu3  ;;  %v1950_v60 = vrot.slane %v4286_v12, 2 }
 0x1ba   : > { %v1514_v59 = vadd.f32 %v4974_v1, %v1129_v28  ;;  %v851_v62 = vadd.f32 %v850_v54, %v4664_v2  ;;  %v1949_v1 = vsel %vm1942_vm4, %v1946_v5, %v1948_v55 }
 0x1bc   : > { %v1852_v21 = vpop.f32.mrf.mxu0  ;;  %v5031_v39 = vadd.f32 %v1850_v9, %v1514_v59  ;;  %v2335_v59 = vrot.slane %v4993_v50, 2 }
 0x1bf   : > { %v1074_v34 = vpop.f32.mrf.mxu2 }
 0x1c0   : > { %v1130_v3 = vadd.f32 %v1074_v34, %v851_v62 }
 0x1c1   : > { %v853_v46 = vpop.f32.mrf.mxu1  ;;  %v5041_v9 = vpop.f32.mrf.mxu3 }
 0x1c2   : > { %v1515_v36 = vadd.f32 %v4987_v20, %v1130_v3  ;;  %v854_v5 = vadd.f32 %v853_v46, %v4679_v53  ;;  %v2644_v53 = vrot.slane %v2642_v44, 2  ;;  %v2336_v3 = vsel %vm1942_vm4, %v2333_v33, %v2335_v59 }
 0x1c4   : > { %v1855_v10 = vpop.f32.mrf.mxu0  ;;  %2064 = vmatmul.bf16.gmra.mxu1 %v1949_v1  ;;  %2449 = vmatmul.bf16.gmra.mxu2 %v2334_v32  ;;  %v5043_v2 = vadd.f32 %v1852_v21, %v1515_v36  ;;  %v2647_v21 = vrot.slane %v2645_v23, 3  ;;  %v2989_v36 = vsel %vm2980_vm5, %v2986_v29, %v2988_v58 }
 0x1c6   : > { %2852 = vmatmul.bf16.gmra.mxu3 %v2640_v26  ;;  %v2648_v46 = vor.u32 %v2647_v21, %v2644_v53  ;;  %v2990_v53 = vrot.slane %v5023_v37, 3 }
 0x1c7   : > { %3102 = vmatmul.bf16.gmra.mxu0 %v2987_v47  ;;  %v1077_v48 = vpop.f32.mrf.mxu2  ;;  %v5071_v47 = vld [vmem:[%s4410_s29 + $0x48] sm:$0xff] }
 0x1c8   : > { %v1131_v16 = vadd.f32 %v1077_v48, %v854_v5  ;;  %v2649_v50 = vsel %vm2587_vm3, %v2639_v8, %v2648_v46  ;;  %v2651_v29 = vshrl.u32 %v5071_v47, 16  ;;  %v2654_v5 = vshll.u32 %v5071_v47, 16  ;;  %v4287_v8 = vld [vmem:[%s4410_s29 + $0x30] sm:$0xff] }
 0x1c9   : > { %v855_v20 = vpop.f32.mrf.mxu1  ;;  %v5053_v54 = vpop.f32.mrf.mxu3  ;;  %v1952_v23 = vrot.slane %v4287_v8, 2  ;;  %v5486_v8 = vld [vmem:[#allocation8_spill] sm:$0xff] }
 0x1ca   : > { %v1516_v22 = vadd.f32 %v5005_v4, %v1131_v16  ;;  %v856_v63 = vadd.f32 %v855_v20, %v4690_v38  ;;  %v1951_v4 = vsel %vm1942_vm4, %v1948_v55, %v1950_v60 }
 0x1cc   : > { %v1857_v28 = vpop.f32.mrf.mxu0  ;;  %v5055_v51 = vadd.f32 %v1855_v10, %v1516_v22  ;;  %v2337_v22 = vrot.slane %v5023_v37, 2 }
 0x1cf   : > { %v1079_v25 = vpop.f32.mrf.mxu2 }
 0x1d0   : > { %v1132_v62 = vadd.f32 %v1079_v25, %v856_v63 }
 0x1d1   : > { %v858_v34 = vpop.f32.mrf.mxu1  ;;  %v5065_v10 = vpop.f32.mrf.mxu3 }
 0x1d2   : > { %v1517_v1 = vadd.f32 %v5017_v13, %v1132_v62  ;;  %v859_v55 = vadd.f32 %v858_v34, %v4702_v61  ;;  %v2653_v61 = vrot.slane %v2651_v29, 2  ;;  %v2338_v62 = vsel %vm1942_vm4, %v2335_v59, %v2337_v22 }
 0x1d4   : > { %v1860_v32 = vpop.f32.mrf.mxu0  ;;  %2069 = vmatmul.bf16.gmra.mxu1 %v1951_v4  ;;  %2454 = vmatmul.bf16.gmra.mxu2 %v2336_v3  ;;  %v5067_v38 = vadd.f32 %v1857_v28, %v1517_v1  ;;  %v2656_v28 = vrot.slane %v2654_v5, 3  ;;  %v2991_v1 = vsel %vm2980_vm5, %v2988_v58, %v2990_v53 }
 0x1d6   : > { %2857 = vmatmul.bf16.gmra.mxu3 %v2649_v50  ;;  %v2657_v34 = vor.u32 %v2656_v28, %v2653_v61  ;;  %v2992_v28 = vrot.slane %v5047_v0, 3 }
 0x1d7   : > { %3107 = vmatmul.bf16.gmra.mxu0 %v2989_v36  ;;  %v1082_v33 = vpop.f32.mrf.mxu2  ;;  %v5095_v36 = vld [vmem:[%s4410_s29 + $0x50] sm:$0xff] }
 0x1d8   : > { %v1133_v26 = vadd.f32 %v1082_v33, %v859_v55  ;;  %v2658_v37 = vsel %vm2587_vm3, %v2648_v46, %v2657_v34  ;;  %v2660_v58 = vshrl.u32 %v5095_v36, 16  ;;  %v2663_v55 = vshll.u32 %v5095_v36, 16  ;;  %v4288_v46 = vld [vmem:[%s4410_s29 + $0x38] sm:$0xff] }
 0x1d9   : > { %v860_v13 = vpop.f32.mrf.mxu1  ;;  %v5077_v20 = vpop.f32.mrf.mxu3  ;;  %v1954_v5 = vrot.slane %v4288_v46, 2 }
 0x1da   : > { %v1518_v48 = vadd.f32 %v5029_v17, %v1133_v26  ;;  %v861_v12 = vadd.f32 %v860_v13, %v4710_v15  ;;  %v1953_v17 = vsel %vm1942_vm4, %v1950_v60, %v1952_v23 }
 0x1dc   : > { %v1862_v16 = vpop.f32.mrf.mxu0  ;;  %v5079_v44 = vadd.f32 %v1860_v32, %v1518_v48  ;;  %v2339_v48 = vrot.slane %v5047_v0, 2 }
 0x1df   : > { %v1084_v21 = vpop.f32.mrf.mxu2 }
 0x1e0   : > { %v1134_v63 = vadd.f32 %v1084_v21, %v861_v12 }
 0x1e1   : > { %v863_v25 = vpop.f32.mrf.mxu1  ;;  %v5089_v32 = vpop.f32.mrf.mxu3 }
 0x1e2   : > { %v1519_v4 = vadd.f32 %v5041_v9, %v1134_v63  ;;  %v864_v60 = vadd.f32 %v863_v25, %v4722_v27  ;;  %v2662_v27 = vrot.slane %v2660_v58, 2  ;;  %v2340_v25 = vsel %vm1942_vm4, %v2337_v22, %v2339_v48 }
 0x1e4   : > { %v1865_v3 = vpop.f32.mrf.mxu0  ;;  %2074 = vmatmul.bf16.gmra.mxu1 %v1953_v17  ;;  %2459 = vmatmul.bf16.gmra.mxu2 %v2338_v62  ;;  %v5091_v15 = vadd.f32 %v1862_v16, %v1519_v4  ;;  %v2665_v16 = vrot.slane %v2663_v55, 3 }
 0x1e6   : > { %2862 = vmatmul.bf16.gmra.mxu3 %v2658_v37  ;;  %v2666_v17 = vor.u32 %v2665_v16, %v2662_v27  ;;  %v2341_v27 = vrot.slane %v5071_v47, 2 }
 0x1e7   : > { %3112 = vmatmul.bf16.gmra.mxu0 %v2991_v1  ;;  %v1087_v59 = vpop.f32.mrf.mxu2 }
 0x1e8   : > { %v1135_v50 = vadd.f32 %v1087_v59, %v864_v60  ;;  %v2667_v37 = vsel %vm2587_vm3, %v2657_v34, %v2666_v17  ;;  %v5119_v60 = vld [vmem:[%s4410_s29 + $0x58] sm:$0xff]  ;;  %v4289_v34 = vld [vmem:[%s4410_s29 + $0x40] sm:$0xff] }
 0x1e9   : > { %v865_v9 = vpop.f32.mrf.mxu1  ;;  %v5101_v13 = vpop.f32.mrf.mxu3  ;;  %v1956_v46 = vrot.slane %v4289_v34, 2 }
 0x1ea   : > { %v1520_v33 = vadd.f32 %v5053_v54, %v1135_v50  ;;  %v866_v61 = vadd.f32 %v865_v9, %v5486_v8  ;;  %v1955_v54 = vsel %vm1942_vm4, %v1952_v23, %v1954_v5  ;;  %v5487_v23 = vld [vmem:[#allocation2_spill] sm:$0xff]  ;;  %v2672_v9 = vshll.u32 %v5119_v60, 16 }
 0x1ec   : > { %v1867_v26 = vpop.f32.mrf.mxu0  ;;  %v5103_v29 = vadd.f32 %v1865_v3, %v1520_v33  ;;  %v2993_v3 = vsel %vm2980_vm5, %v2990_v53, %v2992_v28  ;;  %v2669_v53 = vshrl.u32 %v5119_v60, 16  ;;  %v2674_v8 = vrot.slane %v2672_v9, 3 }
 0x1ee   : > { %v2671_v16 = vrot.slane %v2669_v53, 2 }
 0x1ef   : > { %v1089_v12 = vpop.f32.mrf.mxu2 }
 0x1f0   : > { %v1136_v21 = vadd.f32 %v1089_v12, %v866_v61  ;;  %v5488_v61 = vld [vmem:[#allocation3_spill] sm:$0xff] }
 0x1f1   : > { %v868_v63 = vpop.f32.mrf.mxu1  ;;  %v5113_v1 = vpop.f32.mrf.mxu3 }
 0x1f2   : > { %v1521_v62 = vadd.f32 %v5065_v10, %v1136_v21  ;;  %v869_v22 = vadd.f32 %v868_v63, %v5487_v23  ;;  %v2994_v21 = vrot.slane %v5071_v47, 3 }
 0x1f4   : > { %v1870_v4 = vpop.f32.mrf.mxu0  ;;  %2079 = vmatmul.bf16.gmra.mxu1 %v1955_v54  ;;  %2464 = vmatmul.bf16.gmra.mxu2 %v2340_v25  ;;  %v5115_v0 = vadd.f32 %v1867_v26, %v1521_v62  ;;  %v2342_v62 = vsel %vm1942_vm4, %v2339_v48, %v2341_v27  ;;  %v2995_v23 = vsel %vm2980_vm5, %v2992_v28, %v2994_v21 }
 0x1f6   : > { %2867 = vmatmul.bf16.gmra.mxu3 %v2667_v37 }
 0x1f7   : > { %3117 = vmatmul.bf16.gmra.mxu0 %v2993_v3  ;;  %v1092_v59 = vpop.f32.mrf.mxu2 }
 0x1f8   : > { %v1137_v50 = vadd.f32 %v1092_v59, %v869_v22 }
 0x1f9   : > { %v870_v10 = vpop.f32.mrf.mxu1  ;;  %v5125_v33 = vpop.f32.mrf.mxu3 }
 0x1fa   : > { %v1522_v58 = vadd.f32 %v5077_v20, %v1137_v50  ;;  %v871_v12 = vadd.f32 %v870_v10, %v5488_v61  ;;  %v1957_v20 = vsel %vm1942_vm4, %v1954_v5, %v1956_v46  ;;  %v5143_v50 = vld [vmem:[%s4410_s29 + $0x60] sm:$0xff]  ;;  %v5489_v5 = vld [vmem:[#allocation4_spill] sm:$0xff]  ;;  %v2343_v61 = vrot.slane %v5095_v36, 2 }
 0x1fb   : > { %v2678_v28 = vshrl.u32 %v5143_v50, 16  ;;  %v2681_v9 = vshll.u32 %v5143_v50, 16 }
 0x1fc   : > { %v1872_v55 = vpop.f32.mrf.mxu0  ;;  %v5127_v26 = vadd.f32 %v1870_v4, %v1522_v58  ;;  %v2675_v4 = vor.u32 %v2674_v8, %v2671_v16 }
 0x1fe   : > { %v2676_v59 = vsel %vm2587_vm3, %v2666_v17, %v2675_v4  ;;  %v4290_v17 = vld [vmem:[%s4410_s29 + $0x48] sm:$0xff] }
 0x1ff   : > { %v1094_v63 = vpop.f32.mrf.mxu2  ;;  %v1958_v8 = vrot.slane %v4290_v17, 2 }
 0x200   : > { %v1138_v54 = vadd.f32 %v1094_v63, %v871_v12  ;;  %v2680_v12 = vrot.slane %v2678_v28, 2  ;;  %v2683_v63 = vrot.slane %v2681_v9, 3  ;;  %v5167_v28 = vld [vmem:[%s4410_s29 + $0x68] sm:$0xff] }
 0x201   : > { %v873_v25 = vpop.f32.mrf.mxu1  ;;  %v5137_v22 = vpop.f32.mrf.mxu3  ;;  %v2690_v17 = vshll.u32 %v5167_v28, 16 }
 0x202   : > { %v1523_v3 = vadd.f32 %v5089_v32, %v1138_v54  ;;  %v874_v48 = vadd.f32 %v873_v25, %v5489_v5  ;;  %v5490_v54 = vld [vmem:[#allocation5_spill] sm:$0xff] }
 0x204   : > { %v1875_v37 = vpop.f32.mrf.mxu0  ;;  %2084 = vmatmul.bf16.gmra.mxu1 %v1957_v20  ;;  %2469 = vmatmul.bf16.gmra.mxu2 %v2342_v62  ;;  %v5139_v47 = vadd.f32 %v1872_v55, %v1523_v3  ;;  %v2996_v20 = vrot.slane %v5095_v36, 3 }
 0x206   : > { %2872 = vmatmul.bf16.gmra.mxu3 %v2676_v59  ;;  %v2344_v59 = vsel %vm1942_vm4, %v2341_v27, %v2343_v61 }
 0x207   : > { %3122 = vmatmul.bf16.gmra.mxu0 %v2995_v23  ;;  %v1097_v10 = vpop.f32.mrf.mxu2 }
 0x208   : > { %v1139_v53 = vadd.f32 %v1097_v10, %v874_v48  ;;  %v2997_v10 = vsel %vm2980_vm5, %v2994_v21, %v2996_v20  ;;  %v2687_v21 = vshrl.u32 %v5167_v28, 16 }
 0x209   : > { %v875_v32 = vpop.f32.mrf.mxu1  ;;  %v5149_v55 = vpop.f32.mrf.mxu3 }
 0x20a   : > { %v1524_v58 = vadd.f32 %v5101_v13, %v1139_v53  ;;  %v876_v25 = vadd.f32 %v875_v32, %v5490_v54  ;;  %v1959_v13 = vsel %vm1942_vm4, %v1956_v46, %v1958_v8  ;;  %v5491_v46 = vld [vmem:[#allocation6_spill] sm:$0xff] }
 0x20c   : > { %v1877_v34 = vpop.f32.mrf.mxu0  ;;  %v5151_v16 = vadd.f32 %v1875_v37, %v1524_v58  ;;  %v2684_v37 = vor.u32 %v2683_v63, %v2680_v12 }
 0x20e   : > { %v2685_v32 = vsel %vm2587_vm3, %v2675_v4, %v2684_v37  ;;  %v4291_v4 = vld [vmem:[%s4410_s29 + $0x50] sm:$0xff] }
 0x20f   : > { %v1099_v62 = vpop.f32.mrf.mxu2 }
 0x210   : > { %v1140_v3 = vadd.f32 %v1099_v62, %v876_v25  ;;  %v1960_v25 = vrot.slane %v4291_v4, 2  ;;  %v2345_v62 = vrot.slane %v5119_v60, 2 }
 0x211   : > { %v878_v23 = vpop.f32.mrf.mxu1  ;;  %v5161_v53 = vpop.f32.mrf.mxu3 }
 0x212   : > { %v1525_v5 = vadd.f32 %v5113_v1, %v1140_v3  ;;  %v879_v27 = vadd.f32 %v878_v23, %v5491_v46  ;;  %v2689_v3 = vrot.slane %v2687_v21, 2  ;;  %v2692_v23 = vrot.slane %v2690_v17, 3 }
 0x213   : > { %v1961_v46 = vsel %vm1942_vm4, %v1958_v8, %v1960_v25 }
 0x214   : > { %v1880_v48 = vpop.f32.mrf.mxu0  ;;  %2089 = vmatmul.bf16.gmra.mxu1 %v1959_v13  ;;  %2474 = vmatmul.bf16.gmra.mxu2 %v2344_v59  ;;  %v5163_v36 = vadd.f32 %v1877_v34, %v1525_v5  ;;  %v5492_v13 = vld [vmem:[#allocation7_spill] sm:$0xff]  ;;  %v2998_v5 = vrot.slane %v5119_v60, 3 }
 0x216   : > { %2877 = vmatmul.bf16.gmra.mxu3 %v2685_v32  ;;  %v2999_v21 = vsel %vm2980_vm5, %v2996_v20, %v2998_v5 }
 0x217   : > { %3127 = vmatmul.bf16.gmra.mxu0 %v2997_v10  ;;  %v1102_v9 = vpop.f32.mrf.mxu2 }
 0x218   : > { %v1141_v58 = vadd.f32 %v1102_v9, %v879_v27  ;;  %v2693_v27 = vor.u32 %v2692_v23, %v2689_v3  ;;  %v5200_v23 = vld [vmem:[%s4999_s5] ss:$0 sm:$0xff] }
 0x219   : > { %v880_v1 = vpop.f32.mrf.mxu1  ;;  %v5173_v34 = vpop.f32.mrf.mxu3 }
 0x21a   : > { %v1526_v12 = vadd.f32 %v5125_v33, %v1141_v58  ;;  %v881_v59 = vadd.f32 %v880_v1, %v5492_v13  ;;  %v2694_v8 = vsel %vm2587_vm3, %v2684_v37, %v2693_v27 }
 0x21c   : > { %v1882_v63 = vpop.f32.mrf.mxu0  ;;  %v5175_v54 = vadd.f32 %v1880_v48, %v1526_v12  ;;  %v2346_v48 = vsel %vm1942_vm4, %v2343_v61, %v2345_v62  ;;  %v5193_v61 = vld [vmem:[%s4410_s29 + $0x70] sm:$0xff] }
 0x21d   : > { %v2696_v4 = vshrl.u32 %v5193_v61, 16  ;;  %v2699_v3 = vshll.u32 %v5193_v61, 16 }
 0x21f   : > { %v1104_v10 = vpop.f32.mrf.mxu2 }
 0x220   : > { %v1142_v32 = vadd.f32 %v1104_v10, %v881_v59  ;;  %v4292_v10 = vld [vmem:[%s4410_s29 + $0x58] sm:$0xff] }
 0x221   : > { %v2055_v33 = vpop.f32.mrf.mxu1  ;;  %v5185_v17 = vpop.f32.mrf.mxu3 }
 0x222   : > { %v1527_v9 = vadd.f32 %v5137_v22, %v1142_v32  ;;  %v2145_v22 = vadd.f32 %v2055_v33, %v4743_v30  ;;  %v1962_v30 = vrot.slane %v4292_v10, 2  ;;  %v2347_v32 = vrot.slane %v5143_v50, 2 }
 0x223   : > { %v2698_v33 = vrot.slane %v2696_v4, 2 }
 0x224   : > { %v3093_v58 = vpop.f32.mrf.mxu0  ;;  %2094 = vmatmul.bf16.gmra.mxu1 %v1961_v46  ;;  %2479 = vmatmul.bf16.gmra.mxu2 %v2346_v48  ;;  %v5188_v60 = vadd.f32 %v1882_v63, %v1527_v9  ;;  %v2701_v46 = vrot.slane %v2699_v3, 3 }
 0x226   : > { %2882 = vmatmul.bf16.gmra.mxu3 %v2694_v8  ;;  %v2702_v4 = vor.u32 %v2701_v46, %v2698_v33 }
 0x227   : > { %3132 = vmatmul.bf16.gmra.mxu0 %v2999_v21  ;;  %v2440_v1 = vpop.f32.mrf.mxu2  ;;  %v3000_v21 = vrot.slane %v5143_v50, 3 }
 0x228   : > { %v2530_v12 = vadd.f32 %v2440_v1, %v2145_v22  ;;  %v1963_v1 = vsel %vm1942_vm4, %v1960_v25, %v1962_v30  ;;  %v5223_v25 = vld [vmem:[%s4410_s29 + $0x78] sm:$0xff] }
 0x229   : > { %v2057_v20 = vpop.f32.mrf.mxu1  ;;  %v5202_v37 = vpop.f32.mrf.mxu3 }
 0x22a   : > { %v2923_v63 = vadd.f32 %v5149_v55, %v2530_v12  ;;  %v2146_v9 = vadd.f32 %v2057_v20, %v4756_v6  ;;  %v2348_v12 = vsel %vm1942_vm4, %v2345_v62, %v2347_v32  ;;  %v3001_v20 = vsel %vm2980_vm5, %v2998_v5, %v3000_v21 }
 0x22c   : > { %v3095_v13 = vpop.f32.mrf.mxu0  ;;  %v3183_v59 = vadd.f32 %v3093_v58, %v2923_v63 }
 0x22e   : > { %v3223_v48 = vadd.f32 %v5200_v23, %v3183_v59  ;;  %v2703_v59 = vsel %vm2587_vm3, %v2693_v27, %v2702_v4 }
 0x22f   : > { %v2442_v55 = vpop.f32.mrf.mxu2 }
 0x230   : > { %v3259_v58 = vmax.f32 %v3223_v48, 0.0  ;;  %v2531_v8 = vadd.f32 %v2442_v55, %v2146_v9  ;;  %v2705_v48 = vshrl.u32 %v5223_v25, 16 }
 0x231   : > { %v2060_v22 = vpop.f32.mrf.mxu1  ;;  %v5219_v3 = vpop.f32.mrf.mxu3 }
 0x232   : > { %3295 = vst [vmem:[%s5212_s12] sm:$0xff] %v3259_v58  ;;  %v2924_v6 = vadd.f32 %v5161_v53, %v2531_v8  ;;  %v2147_v10 = vadd.f32 %v2060_v22, %v4765_v7  ;;  %v4293_v8 = vld [vmem:[%s4410_s29 + $0x60] sm:$0xff]  ;;  %v2349_v7 = vrot.slane %v5167_v28, 2  ;;  %v2707_v22 = vrot.slane %v2705_v48, 2 }
 0x234   : > { %v3098_v50 = vpop.f32.mrf.mxu0  ;;  %v3184_v63 = vadd.f32 %v3095_v13, %v2924_v6  ;;  %2099 = vmatmul.bf16.gmra.mxu1 %v1963_v1  ;;  %2484 = vmatmul.bf16.gmra.mxu2 %v2348_v12  ;;  %v2708_v13 = vshll.u32 %v5223_v25, 16  ;;  %v1964_v1 = vrot.slane %v4293_v8, 2 }
 0x236   : > { %v3224_v62 = vadd.f32 %v5200_v23, %v3184_v63  ;;  %2887 = vmatmul.bf16.gmra.mxu3 %v2703_v59  ;;  %v2710_v12 = vrot.slane %v2708_v13, 3  ;;  %v3002_v63 = vrot.slane %v5167_v28, 3 }
 0x237   : > { %3137 = vmatmul.bf16.gmra.mxu0 %v3001_v20  ;;  %v2445_v53 = vpop.f32.mrf.mxu2 }
 0x238   : > { %v3260_v33 = vmax.f32 %v3224_v62, 0.0  ;;  %v2532_v46 = vadd.f32 %v2445_v53, %v2147_v10  ;;  %v2350_v53 = vsel %vm1942_vm4, %v2347_v32, %v2349_v7  ;;  %v3003_v13 = vsel %vm2980_vm5, %v3000_v21, %v3002_v63 }
 0x239   : > { %v2062_v5 = vpop.f32.mrf.mxu1  ;;  %v5231_v55 = vpop.f32.mrf.mxu3 }
 0x23a   : > { %3296 = vst [vmem:[%s5212_s12 + $0x8] sm:$0xff] %v3260_v33  ;;  %v2925_v9 = vadd.f32 %v5173_v34, %v2532_v46  ;;  %v2148_v20 = vadd.f32 %v2062_v5, %v4777_v11  ;;  %v2711_v33 = vor.u32 %v2710_v12, %v2707_v22 }
 0x23c   : > { %v3100_v27 = vpop.f32.mrf.mxu0  ;;  %v3185_v58 = vadd.f32 %v3098_v50, %v2925_v9  ;;  %v1965_v50 = vsel %vm1942_vm4, %v1962_v30, %v1964_v1  ;;  %v2712_v28 = vsel %vm2587_vm3, %v2702_v4, %v2711_v33  ;;  %v5247_v30 = vld [vmem:[%s4410_s29 + $0x80] sm:$0xff] }
 0x23d   : > { %v2714_v22 = vshrl.u32 %v5247_v30, 16 }
 0x23e   : > { %v3225_v6 = vadd.f32 %v5200_v23, %v3185_v58 }
 0x23f   : > { %v2447_v59 = vpop.f32.mrf.mxu2 }
 0x240   : > { %v3261_v62 = vmax.f32 %v3225_v6, 0.0  ;;  %v2533_v34 = vadd.f32 %v2447_v59, %v2148_v20  ;;  %v4294_v59 = vld [vmem:[%s4410_s29 + $0x68] sm:$0xff] }
 0x241   : > { %v2065_v10 = vpop.f32.mrf.mxu1  ;;  %v5243_v9 = vpop.f32.mrf.mxu3 }
 0x242   : > { %3297 = vst [vmem:[%s5212_s12 + $0x10] sm:$0xff] %v3261_v62  ;;  %v2926_v46 = vadd.f32 %v5185_v17, %v2533_v34  ;;  %v2149_v5 = vadd.f32 %v2065_v10, %v4786_v14  ;;  %v1966_v62 = vrot.slane %v4294_v59, 2  ;;  %v2351_v14 = vrot.slane %v5193_v61, 2 }
 0x243   : > { %v2716_v34 = vrot.slane %v2714_v22, 2 }
 0x244   : > { %v3103_v48 = vpop.f32.mrf.mxu0  ;;  %v3186_v11 = vadd.f32 %v3100_v27, %v2926_v46  ;;  %2104 = vmatmul.bf16.gmra.mxu1 %v1965_v50  ;;  %2489 = vmatmul.bf16.gmra.mxu2 %v2350_v53  ;;  %v2717_v27 = vshll.u32 %v5247_v30, 16  ;;  %v3004_v46 = vrot.slane %v5193_v61, 3 }
 0x246   : > { %v3226_v32 = vadd.f32 %v5200_v23, %v3186_v11  ;;  %2892 = vmatmul.bf16.gmra.mxu3 %v2712_v28  ;;  %v2719_v10 = vrot.slane %v2717_v27, 3 }
 0x247   : > { %3142 = vmatmul.bf16.gmra.mxu0 %v3003_v13  ;;  %v2450_v17 = vpop.f32.mrf.mxu2 }
 0x248   : > { %v3262_v58 = vmax.f32 %v3226_v32, 0.0  ;;  %v2534_v8 = vadd.f32 %v2450_v17, %v2149_v5  ;;  %v2352_v32 = vsel %vm1942_vm4, %v2349_v7, %v2351_v14  ;;  %v2720_v5 = vor.u32 %v2719_v10, %v2716_v34 }
 0x249   : > { %v2067_v21 = vpop.f32.mrf.mxu1  ;;  %v5255_v6 = vpop.f32.mrf.mxu3 }
 0x24a   : > { %3298 = vst [vmem:[%s5212_s12 + $0x18] sm:$0xff] %v3262_v58  ;;  %v2927_v12 = vadd.f32 %v5202_v37, %v2534_v8  ;;  %v2150_v53 = vadd.f32 %v2067_v21, %v4800_v56  ;;  %v3005_v8 = vsel %vm2980_vm5, %v3002_v63, %v3004_v46  ;;  %v2721_v61 = vsel %vm2587_vm3, %v2711_v33, %v2720_v5 }
 0x24c   : > { %v3105_v4 = vpop.f32.mrf.mxu0  ;;  %v3187_v20 = vadd.f32 %v3103_v48, %v2927_v12  ;;  %v1967_v48 = vsel %vm1942_vm4, %v1964_v1, %v1966_v62  ;;  %v5271_v1 = vld [vmem:[%s4410_s29 + $0x88] sm:$0xff] }
 0x24e   : > { %v3227_v50 = vadd.f32 %v5200_v23, %v3187_v20  ;;  %v2723_v20 = vshrl.u32 %v5271_v1, 16 }
 0x24f   : > { %v2452_v13 = vpop.f32.mrf.mxu2 }
 0x250   : > { %v3263_v11 = vmax.f32 %v3227_v50, 0.0  ;;  %v2535_v37 = vadd.f32 %v2452_v13, %v2150_v53  ;;  %v4295_v50 = vld [vmem:[%s4410_s29 + $0x70] sm:$0xff]  ;;  %v2725_v13 = vrot.slane %v2723_v20, 2 }
 0x251   : > { %v2070_v28 = vpop.f32.mrf.mxu1  ;;  %v5267_v22 = vpop.f32.mrf.mxu3  ;;  %v1968_v53 = vrot.slane %v4295_v50, 2 }
 0x252   : > { %3299 = vst [vmem:[%s5212_s12 + $0x20] sm:$0xff] %v3263_v11  ;;  %v2928_v17 = vadd.f32 %v5219_v3, %v2535_v37  ;;  %v2151_v21 = vadd.f32 %v2070_v28, %v4809_v45  ;;  %v2353_v45 = vrot.slane %v5223_v25, 2 }
 0x254   : > { %v3108_v58 = vpop.f32.mrf.mxu0  ;;  %v3188_v56 = vadd.f32 %v3105_v4, %v2928_v17  ;;  %2109 = vmatmul.bf16.gmra.mxu1 %v1967_v48  ;;  %2494 = vmatmul.bf16.gmra.mxu2 %v2352_v32  ;;  %v2726_v4 = vshll.u32 %v5271_v1, 16  ;;  %v3006_v48 = vrot.slane %v5223_v25, 3 }
 0x256   : > { %v3228_v7 = vadd.f32 %v5200_v23, %v3188_v56  ;;  %2897 = vmatmul.bf16.gmra.mxu3 %v2721_v61  ;;  %v2728_v11 = vrot.slane %v2726_v4, 3  ;;  %v2354_v56 = vsel %vm1942_vm4, %v2351_v14, %v2353_v45 }
 0x257   : > { %3147 = vmatmul.bf16.gmra.mxu0 %v3005_v8  ;;  %v2455_v3 = vpop.f32.mrf.mxu2 }
 0x258   : > { %v3264_v27 = vmax.f32 %v3228_v7, 0.0  ;;  %v2536_v12 = vadd.f32 %v2455_v3, %v2151_v21  ;;  %v2729_v61 = vor.u32 %v2728_v11, %v2725_v13  ;;  %v3007_v3 = vsel %vm2980_vm5, %v3004_v46, %v3006_v48  ;;  %v4296_v13 = vld [vmem:[%s4410_s29 + $0x78] sm:$0xff] }
 0x259   : > { %v2072_v63 = vpop.f32.mrf.mxu1  ;;  %v5279_v34 = vpop.f32.mrf.mxu3  ;;  %v1970_v11 = vrot.slane %v4296_v13, 2  ;;  %v4297_v13 = vld [vmem:[%s4410_s29 + $0x80] sm:$0xff] }
 0x25a   : > { %3300 = vst [vmem:[%s5212_s12 + $0x28] sm:$0xff] %v3264_v27  ;;  %v2929_v59 = vadd.f32 %v5231_v55, %v2536_v12  ;;  %v2152_v28 = vadd.f32 %v2072_v63, %v4824_v52  ;;  %v2730_v25 = vsel %vm2587_vm3, %v2720_v5, %v2729_v61 }
 0x25c   : > { %v3110_v33 = vpop.f32.mrf.mxu0  ;;  %v3189_v10 = vadd.f32 %v3108_v58, %v2929_v59  ;;  %v1969_v58 = vsel %vm1942_vm4, %v1966_v62, %v1968_v53  ;;  %v5295_v62 = vld [vmem:[%s4410_s29 + $0x90] sm:$0xff] }
 0x25d   : > { %v2732_v4 = vshrl.u32 %v5295_v62, 16  ;;  %v2735_v59 = vshll.u32 %v5295_v62, 16 }
 0x25e   : > { %v3229_v37 = vadd.f32 %v5200_v23, %v3189_v10 }
 0x25f   : > { %v2457_v32 = vpop.f32.mrf.mxu2 }
 0x260   : > { %v3265_v17 = vmax.f32 %v3229_v37, 0.0  ;;  %v2537_v55 = vadd.f32 %v2457_v32, %v2152_v28  ;;  %v2734_v37 = vrot.slane %v2732_v4, 2  ;;  %v2737_v28 = vrot.slane %v2735_v59, 3 }
 0x261   : > { %v2075_v8 = vpop.f32.mrf.mxu1  ;;  %v5291_v27 = vpop.f32.mrf.mxu3 }
 0x262   : > { %3301 = vst [vmem:[%s5212_s12 + $0x30] sm:$0xff] %v3265_v17  ;;  %v2930_v7 = vadd.f32 %v5243_v9, %v2537_v55  ;;  %v2153_v12 = vadd.f32 %v2075_v8, %v4834_v57  ;;  %v2355_v57 = vrot.slane %v5247_v30, 2  ;;  %v3008_v55 = vrot.slane %v5247_v30, 3 }
 0x264   : > { %v3113_v21 = vpop.f32.mrf.mxu0  ;;  %v3190_v52 = vadd.f32 %v3110_v33, %v2930_v7  ;;  %2114 = vmatmul.bf16.gmra.mxu1 %v1969_v58  ;;  %2499 = vmatmul.bf16.gmra.mxu2 %v2354_v56  ;;  %v1971_v7 = vsel %vm1942_vm4, %v1968_v53, %v1970_v11  ;;  %v5319_v53 = vld [vmem:[%s4410_s29 + $0x98] sm:$0xff] }
 0x265   : > { %v2741_v4 = vshrl.u32 %v5319_v53, 16  ;;  %v2744_v59 = vshll.u32 %v5319_v53, 16 }
 0x266   : > { %v3230_v14 = vadd.f32 %v5200_v23, %v3190_v52  ;;  %2902 = vmatmul.bf16.gmra.mxu3 %v2730_v25 }
 0x267   : > { %3152 = vmatmul.bf16.gmra.mxu0 %v3007_v3  ;;  %v2460_v9 = vpop.f32.mrf.mxu2  ;;  %v2738_v3 = vor.u32 %v2737_v28, %v2734_v37  ;;  %v1972_v37 = vrot.slane %v4297_v13, 2  ;;  %v2357_v28 = vrot.slane %v5271_v1, 2 }
 0x268   : > { %v3266_v63 = vmax.f32 %v3230_v14, 0.0  ;;  %v2538_v20 = vadd.f32 %v2460_v9, %v2153_v12  ;;  %v3009_v14 = vsel %vm2980_vm5, %v3006_v48, %v3008_v55  ;;  %v5493_v9 = vld [vmem:[#allocation9_spill] sm:$0xff] }
 0x269   : > { %v2077_v46 = vpop.f32.mrf.mxu1  ;;  %v5303_v10 = vpop.f32.mrf.mxu3  ;;  %v2739_v30 = vsel %vm2587_vm3, %v2729_v61, %v2738_v3 }
 0x26a   : > { %3302 = vst [vmem:[%s5212_s12 + $0x38] sm:$0xff] %v3266_v63  ;;  %v2931_v33 = vadd.f32 %v5255_v6, %v2538_v20  ;;  %v2154_v17 = vadd.f32 %v2077_v46, %v4848_v49 }
 0x26c   : > { %v3115_v5 = vpop.f32.mrf.mxu0  ;;  %v3191_v50 = vadd.f32 %v3113_v21, %v2931_v33  ;;  %v2356_v21 = vsel %vm1942_vm4, %v2353_v45, %v2355_v57 }
 0x26e   : > { %v3231_v32 = vadd.f32 %v5200_v23, %v3191_v50 }
 0x26f   : > { %v2462_v8 = vpop.f32.mrf.mxu2 }
 0x270   : > { %v3267_v58 = vmax.f32 %v3231_v32, 0.0  ;;  %v2539_v6 = vadd.f32 %v2462_v8, %v2154_v17  ;;  %v2743_v32 = vrot.slane %v2741_v4, 2  ;;  %v2746_v17 = vrot.slane %v2744_v59, 3 }
 0x271   : > { %v2080_v56 = vpop.f32.mrf.mxu1  ;;  %v5315_v12 = vpop.f32.mrf.mxu3 }
 0x272   : > { %3303 = vst [vmem:[%s5212_s12 + $0x40] sm:$0xff] %v3267_v58  ;;  %v2932_v52 = vadd.f32 %v5267_v22, %v2539_v6  ;;  %v2155_v63 = vadd.f32 %v2080_v56, %v5493_v9  ;;  %v5494_v58 = vld [vmem:[#allocation10_spill] sm:$0xff]  ;;  %v3010_v56 = vrot.slane %v5271_v1, 3 }
 0x274   : > { %v3118_v25 = vpop.f32.mrf.mxu0  ;;  %v3192_v49 = vadd.f32 %v3115_v5, %v2932_v52  ;;  %2119 = vmatmul.bf16.gmra.mxu1 %v1971_v7  ;;  %2504 = vmatmul.bf16.gmra.mxu2 %v2356_v21  ;;  %v3011_v9 = vsel %vm2980_vm5, %v3008_v55, %v3010_v56 }
 0x276   : > { %v3232_v45 = vadd.f32 %v5200_v23, %v3192_v49  ;;  %2907 = vmatmul.bf16.gmra.mxu3 %v2739_v30  ;;  %v2747_v49 = vor.u32 %v2746_v17, %v2743_v32 }
 0x277   : > { %3157 = vmatmul.bf16.gmra.mxu0 %v3009_v14  ;;  %v2465_v22 = vpop.f32.mrf.mxu2  ;;  %v2358_v14 = vsel %vm1942_vm4, %v2355_v57, %v2357_v28 }
 0x278   : > { %v3268_v20 = vmax.f32 %v3232_v45, 0.0  ;;  %v2540_v46 = vadd.f32 %v2465_v22, %v2155_v63  ;;  %v2566_v63 = vld [vmem:[%s4410_s29 + $0xa0] sm:$0x7] }
 0x279   : > { %v2082_v48 = vpop.f32.mrf.mxu1  ;;  %v5327_v5 = vpop.f32.mrf.mxu3 }
 0x27a   : > { %3304 = vst [vmem:[%s5212_s12 + $0x48] sm:$0xff] %v3268_v20  ;;  %v2933_v33 = vadd.f32 %v5279_v34, %v2540_v46  ;;  %v2156_v6 = vadd.f32 %v2082_v48, %v5494_v58  ;;  %v2585_v20 = vunpack.c.l.b16 %v2566_v63 }
 0x27c   : > { %v3120_v61 = vpop.f32.mrf.mxu0  ;;  %v3193_v50 = vadd.f32 %v3118_v25, %v2933_v33  ;;  %v1973_v25 = vsel %vm1942_vm4, %v1970_v11, %v1972_v37  ;;  %v2748_v11 = vsel %vm2587_vm3, %v2738_v3, %v2747_v49  ;;  %v5343_v57 = vpack.c.b16 %v2585_v20, %v2585_v20 }
 0x27e   : > { %v3233_v8 = vadd.f32 %v5200_v23, %v3193_v50  ;;  %v2750_v50 = vshrl.u32 %v5343_v57, 16 }
 0x27f   : > { %v2467_v7 = vpop.f32.mrf.mxu2 }
 0x280   : > { %v3269_v34 = vmax.f32 %v3233_v8, 0.0  ;;  %v2541_v21 = vadd.f32 %v2467_v7, %v2156_v6  ;;  %v4298_v8 = vld [vmem:[%s4410_s29 + $0x88] sm:$0xff]  ;;  %v2359_v6 = vrot.slane %v5295_v62, 2  ;;  %v2752_v7 = vrot.slane %v2750_v50, 2 }
 0x281   : > { %v2085_v52 = vpop.f32.mrf.mxu1  ;;  %v5340_v22 = vpop.f32.mrf.mxu3  ;;  %v1974_v58 = vrot.slane %v4298_v8, 2 }
 0x282   : > { %3305 = vst [vmem:[%s5212_s12 + $0x50] sm:$0xff] %v3269_v34  ;;  %v2934_v30 = vadd.f32 %v5291_v27, %v2541_v21  ;;  %v5495_v27 = vld [vmem:[#allocation11_spill] sm:$0xff] }
 0x283   : > { %v2157_v48 = vadd.f32 %v2085_v52, %v5495_v27  ;;  %v5496_v52 = vld [vmem:[#allocation12_spill] sm:$0xff]  ;;  %v1975_v20 = vsel %vm1942_vm4, %v1972_v37, %v1974_v58 }
 0x284   : > { %v3123_v45 = vpop.f32.mrf.mxu0  ;;  %v3194_v1 = vadd.f32 %v3120_v61, %v2934_v30  ;;  %2124 = vmatmul.bf16.gmra.mxu1 %v1973_v25  ;;  %2509 = vmatmul.bf16.gmra.mxu2 %v2358_v14  ;;  %v2753_v61 = vshll.u32 %v5343_v57, 16  ;;  %v3012_v14 = vrot.slane %v5295_v62, 3 }
 0x286   : > { %v3234_v46 = vadd.f32 %v5200_v23, %v3194_v1  ;;  %2912 = vmatmul.bf16.gmra.mxu3 %v2748_v11  ;;  %v2755_v34 = vrot.slane %v2753_v61, 3  ;;  %v3013_v27 = vsel %vm2980_vm5, %v3010_v56, %v3012_v14 }
 0x287   : > { %3162 = vmatmul.bf16.gmra.mxu0 %v3011_v9  ;;  %v2470_v4 = vpop.f32.mrf.mxu2 }
 0x288   : > { %v3270_v55 = vmax.f32 %v3234_v46, 0.0  ;;  %v2542_v59 = vadd.f32 %v2470_v4, %v2157_v48  ;;  %v2756_v1 = vor.u32 %v2755_v34, %v2752_v7  ;;  %v3014_v7 = vrot.slane %v5319_v53, 3 }
 0x289   : > { %v2087_v33 = vpop.f32.mrf.mxu1  ;;  %v5351_v32 = vpop.f32.mrf.mxu3 }
 0x28a   : > { %3306 = vst [vmem:[%s5212_s12 + $0x58] sm:$0xff] %v3270_v55  ;;  %v2935_v13 = vadd.f32 %v5303_v10, %v2542_v59  ;;  %v2158_v25 = vadd.f32 %v2087_v33, %v5496_v52  ;;  %v2757_v62 = vsel %vm2587_vm3, %v2747_v49, %v2756_v1 }
 0x28c   : > { %v3125_v3 = vpop.f32.mrf.mxu0  ;;  %v3195_v17 = vadd.f32 %v3123_v45, %v2935_v13  ;;  %v2360_v45 = vsel %vm1942_vm4, %v2357_v28, %v2359_v6 }
 0x28e   : > { %v3235_v21 = vadd.f32 %v5200_v23, %v3195_v17  ;;  %v2361_v17 = vrot.slane %v5319_v53, 2 }
 0x28f   : > { %v2472_v30 = vpop.f32.mrf.mxu2 }
 0x290   : > { %v3271_v9 = vmax.f32 %v3235_v21, 0.0  ;;  %v2543_v10 = vadd.f32 %v2472_v30, %v2158_v25  ;;  %v2362_v30 = vsel %vm1942_vm4, %v2359_v6, %v2361_v17 }
 0x291   : > { %v2090_v63 = vpop.f32.mrf.mxu1  ;;  %v5363_v48 = vpop.f32.mrf.mxu3 }
 0x292   : > { %3307 = vst [vmem:[%s5212_s12 + $0x60] sm:$0xff] %v3271_v9  ;;  %v2936_v11 = vadd.f32 %v5315_v12, %v2543_v10  ;;  %v2159_v28 = vadd.f32 %v2090_v63, %v4924_v19  ;;  %v3015_v63 = vsel %vm2980_vm5, %v3012_v14, %v3014_v7 }
 0x294   : > { %v3128_v46 = vpop.f32.mrf.mxu0  ;;  %v3196_v4 = vadd.f32 %v3125_v3, %v2936_v11  ;;  %2129 = vmatmul.bf16.gmra.mxu1 %v1975_v20  ;;  %2514 = vmatmul.bf16.gmra.mxu2 %v2360_v45  ;;  %v4299_v3 = vld [vmem:[%s4410_s29 + $0x90] sm:$0xff]  ;;  %v2217_v20 = vld [vmem:[%s4410_s29 + $0xa0] sm:$0x3] }
 0x295   : > { %v1976_v49 = vrot.slane %v4299_v3, 2  ;;  %v2308_v53 = vunpack.c.l.b16 %v2217_v20 }
 0x296   : > { %v3236_v37 = vadd.f32 %v5200_v23, %v3196_v4  ;;  %2917 = vmatmul.bf16.gmra.mxu3 %v2757_v62 }
 0x297   : > { %3167 = vmatmul.bf16.gmra.mxu0 %v3013_v27  ;;  %v2475_v55 = vpop.f32.mrf.mxu2  ;;  %v1977_v25 = vsel %vm1942_vm4, %v1974_v58, %v1976_v49 }
 0x298   : > { %v3272_v59 = vmax.f32 %v3236_v37, 0.0  ;;  %v2544_v12 = vadd.f32 %v2475_v55, %v2159_v28  ;;  %v1978_v28 = vrot.slane %v4930_v42, 2 }
 0x299   : > { %v2092_v33 = vpop.f32.mrf.mxu1  ;;  %v5370_v61 = vpop.f32.mrf.mxu3 }
 0x29a   : > { %3308 = vst [vmem:[%s5212_s12 + $0x68] sm:$0xff] %v3272_v59  ;;  %v2937_v56 = vadd.f32 %v5327_v5, %v2544_v12  ;;  %v2160_v8 = vadd.f32 %v2092_v33, %v4935_v24  ;;  %v1979_v3 = vsel %vm1942_vm4, %v1976_v49, %v1978_v28 }
 0x29c   : > { %v3130_v50 = vpop.f32.mrf.mxu0  ;;  %v3197_v13 = vadd.f32 %v3128_v46, %v2937_v56 }
 0x29e   : > { %v3237_v19 = vadd.f32 %v5200_v23, %v3197_v13 }
 0x29f   : > { %v2477_v34 = vpop.f32.mrf.mxu2 }
 0x2a0   : > { %v3273_v21 = vmax.f32 %v3237_v19, 0.0  ;;  %v2545_v52 = vadd.f32 %v2477_v34, %v2160_v8 }
 0x2a1   : > { %v2095_v5 = vpop.f32.mrf.mxu1  ;;  %v2880_v45 = vpop.f32.mrf.mxu3 }
 0x2a2   : > { %3309 = vst [vmem:[%s5212_s12 + $0x70] sm:$0xff] %v3273_v21  ;;  %v2938_v9 = vadd.f32 %v5340_v22, %v2545_v52  ;;  %v2161_v58 = vadd.f32 %v2095_v5, %v4949_v41  ;;  %v2327_v22 = vpack.c.b16 %v2308_v53, %v2308_v53  ;;  %v3016_v41 = vrot.slane %v5343_v57, 3 }
 0x2a4   : > { %v3133_v10 = vpop.f32.mrf.mxu0  ;;  %v3198_v24 = vadd.f32 %v3130_v50, %v2938_v9  ;;  %2134 = vmatmul.bf16.gmra.mxu1 %v1977_v25  ;;  %2519 = vmatmul.bf16.gmra.mxu2 %v2362_v30  ;;  %v2363_v55 = vrot.slane %v2327_v22, 2  ;;  %v3017_v8 = vsel %vm2980_vm5, %v3014_v7, %v3016_v41 }
 0x2a6   : > { %v3238_v1 = vadd.f32 %v5200_v23, %v3198_v24 }
 0x2a7   : > { %3172 = vmatmul.bf16.gmra.mxu0 %v3015_v63  ;;  %v2480_v11 = vpop.f32.mrf.mxu2 }
 0x2a8   : > { %v3274_v6 = vmax.f32 %v3238_v1, 0.0  ;;  %v2546_v46 = vadd.f32 %v2480_v11, %v2161_v58 }
 0x2a9   : > { %v2097_v27 = vpop.f32.mrf.mxu1  ;;  %v2883_v62 = vpop.f32.mrf.mxu3 }
 0x2aa   : > { %3310 = vst [vmem:[%s5212_s12 + $0x78] sm:$0xff] %v3274_v6  ;;  %v2939_v14 = vadd.f32 %v5351_v32, %v2546_v46  ;;  %v2162_v12 = vadd.f32 %v2097_v27, %v4960_v31  ;;  %v2364_v32 = vsel %vm1942_vm4, %v2361_v17, %v2363_v55 }
 0x2ac   : > { %v3135_v4 = vpop.f32.mrf.mxu0  ;;  %v3199_v37 = vadd.f32 %v3133_v10, %v2939_v14 }
 0x2ae   : > { %v3239_v59 = vadd.f32 %v5200_v23, %v3199_v37 }
 0x2af   : > { %v2482_v33 = vpop.f32.mrf.mxu2 }
 0x2b0   : > { %v3275_v56 = vmax.f32 %v3239_v59, 0.0  ;;  %v2547_v50 = vadd.f32 %v2482_v33, %v2162_v12 }
 0x2b1   : > { %v2100_v13 = vpop.f32.mrf.mxu1  ;;  %v2885_v31 = vpop.f32.mrf.mxu3 }
 0x2b2   : > { %3311 = vst [vmem:[%s5212_s12 + $0x80] sm:$0xff] %v3275_v56  ;;  %v2940_v19 = vadd.f32 %v5363_v48, %v2547_v50  ;;  %v2163_v21 = vadd.f32 %v2100_v13, %v4977_v35 }
 0x2b4   : > { %v3138_v42 = vpop.f32.mrf.mxu0  ;;  %v3200_v34 = vadd.f32 %v3135_v4, %v2940_v19  ;;  %2139 = vmatmul.bf16.gmra.mxu1 %v1979_v3  ;;  %2524 = vmatmul.bf16.gmra.mxu2 %v2364_v32 }
 0x2b6   : > { %v3240_v57 = vadd.f32 %v5200_v23, %v3200_v34 }
 0x2b7   : > { %3177 = vmatmul.bf16.gmra.mxu0 %v3017_v8  ;;  %v2485_v49 = vpop.f32.mrf.mxu2 }
 0x2b8   : > { %v3276_v52 = vmax.f32 %v3240_v57, 0.0  ;;  %v2548_v17 = vadd.f32 %v2485_v49, %v2163_v21 }
 0x2b9   : > { %v2102_v5 = vpop.f32.mrf.mxu1  ;;  %v2888_v63 = vpop.f32.mrf.mxu3 }
 0x2ba   : > { %3312 = vst [vmem:[%s5212_s12 + $0x88] sm:$0xff] %v3276_v52  ;;  %v2941_v48 = vadd.f32 %v5370_v61, %v2548_v17  ;;  %v2164_v9 = vadd.f32 %v2102_v5, %v4989_v18 }
 0x2bc   : > { %v3140_v25 = vpop.f32.mrf.mxu0  ;;  %v3201_v30 = vadd.f32 %v3138_v42, %v2941_v48 }
 0x2be   : > { %v3241_v7 = vadd.f32 %v5200_v23, %v3201_v30 }
 0x2bf   : > { %v2487_v10 = vpop.f32.mrf.mxu2 }
 0x2c0   : > { %v3277_v20 = vmax.f32 %v3241_v7, 0.0  ;;  %v2549_v24 = vadd.f32 %v2487_v10, %v2164_v9 }
 0x2c1   : > { %v2105_v35 = vpop.f32.mrf.mxu1  ;;  %v2890_v18 = vpop.f32.mrf.mxu3 }
 0x2c2   : > { %3313 = vst [vmem:[%s5212_s12 + $0x90] sm:$0xff] %v3277_v20  ;;  %v2942_v53 = vadd.f32 %v2880_v45, %v2549_v24  ;;  %v2165_v61 = vadd.f32 %v2105_v35, %v5007_v40 }
 0x2c4   : > { %v3143_v1 = vpop.f32.mrf.mxu0  ;;  %v3202_v58 = vadd.f32 %v3140_v25, %v2942_v53 }
 0x2c6   : > { %v3242_v11 = vadd.f32 %v5200_v23, %v3202_v58 }
 0x2c7   : > { %v2490_v6 = vpop.f32.mrf.mxu2 }
 0x2c8   : > { %v3278_v46 = vmax.f32 %v3242_v11, 0.0  ;;  %v2550_v27 = vadd.f32 %v2490_v6, %v2165_v61 }
 0x2c9   : > { %v2107_v22 = vpop.f32.mrf.mxu1  ;;  %v2893_v56 = vpop.f32.mrf.mxu3 }
 0x2ca   : > { %3314 = vst [vmem:[%s5212_s12 + $0x98] sm:$0xff] %v3278_v46  ;;  %v2943_v14 = vadd.f32 %v2883_v62, %v2550_v27  ;;  %v2166_v45 = vadd.f32 %v2107_v22, %v5019_v43 }
 0x2cc   : > { %v3145_v4 = vpop.f32.mrf.mxu0  ;;  %v3203_v37 = vadd.f32 %v3143_v1, %v2943_v14 }
 0x2ce   : > { %v3243_v28 = vadd.f32 %v5200_v23, %v3203_v37 }
 0x2cf   : > { %v2492_v55 = vpop.f32.mrf.mxu2 }
 0x2d0   : > { %v3279_v59 = vmax.f32 %v3243_v28, 0.0  ;;  %v2551_v12 = vadd.f32 %v2492_v55, %v2166_v45 }
 0x2d1   : > { %v2110_v41 = vpop.f32.mrf.mxu1  ;;  %v2895_v57 = vpop.f32.mrf.mxu3 }
 0x2d2   : > { %3315 = vst [vmem:[%s5212_s12 + $0xa0] sm:$0xff] %v3279_v59  ;;  %v2944_v40 = vadd.f32 %v2885_v31, %v2551_v12  ;;  %v2167_v62 = vadd.f32 %v2110_v41, %v5031_v39 }
 0x2d4   : > { %v3148_v33 = vpop.f32.mrf.mxu0  ;;  %v3204_v50 = vadd.f32 %v3145_v4, %v2944_v40 }
 0x2d6   : > { %v3244_v13 = vadd.f32 %v5200_v23, %v3204_v50 }
 0x2d7   : > { %v2495_v3 = vpop.f32.mrf.mxu2 }
 0x2d8   : > { %v3280_v32 = vmax.f32 %v3244_v13, 0.0  ;;  %v2552_v19 = vadd.f32 %v2495_v3, %v2167_v62 }
 0x2d9   : > { %v2112_v42 = vpop.f32.mrf.mxu1  ;;  %v2898_v10 = vpop.f32.mrf.mxu3 }
 0x2da   : > { %3316 = vst [vmem:[%s5212_s12 + $0xa8] sm:$0xff] %v3280_v32  ;;  %v2945_v43 = vadd.f32 %v2888_v63, %v2552_v19  ;;  %v2168_v31 = vadd.f32 %v2112_v42, %v5043_v2 }
 0x2dc   : > { %v3150_v8 = vpop.f32.mrf.mxu0  ;;  %v3205_v34 = vadd.f32 %v3148_v33, %v2945_v43 }
 0x2de   : > { %v3245_v21 = vadd.f32 %v5200_v23, %v3205_v34 }
 0x2df   : > { %v2497_v49 = vpop.f32.mrf.mxu2 }
 0x2e0   : > { %v3281_v52 = vmax.f32 %v3245_v21, 0.0  ;;  %v2553_v17 = vadd.f32 %v2497_v49, %v2168_v31 }
 0x2e1   : > { %v2115_v5 = vpop.f32.mrf.mxu1 }
 0x2e2   : > { %3317 = vst [vmem:[%s5212_s12 + $0xb0] sm:$0xff] %v3281_v52  ;;  %v2946_v39 = vadd.f32 %v2890_v18, %v2553_v17  ;;  %v2169_v7 = vadd.f32 %v2115_v5, %v5055_v51  ;;  %v2900_v51 = vpop.f32.mrf.mxu3 }
 0x2e4   : > { %v3153_v48 = vpop.f32.mrf.mxu0  ;;  %v3206_v25 = vadd.f32 %v3150_v8, %v2946_v39 }
 0x2e6   : > { %v3246_v30 = vadd.f32 %v5200_v23, %v3206_v25 }
 0x2e7   : > { %v2500_v9 = vpop.f32.mrf.mxu2 }
 0x2e8   : > { %v3282_v63 = vmax.f32 %v3246_v30, 0.0  ;;  %v2554_v20 = vadd.f32 %v2500_v9, %v2169_v7 }
 0x2e9   : > { %v2117_v24 = vpop.f32.mrf.mxu1 }
 0x2ea   : > { %3318 = vst [vmem:[%s5212_s12 + $0xb8] sm:$0xff] %v3282_v63  ;;  %v2947_v2 = vadd.f32 %v2893_v56, %v2554_v20  ;;  %v2170_v58 = vadd.f32 %v2117_v24, %v5067_v38  ;;  %v2903_v12 = vpop.f32.mrf.mxu3 }
 0x2ec   : > { %v3155_v35 = vpop.f32.mrf.mxu0  ;;  %v3207_v53 = vadd.f32 %v3153_v48, %v2947_v2 }
 0x2ee   : > { %v3247_v1 = vadd.f32 %v5200_v23, %v3207_v53 }
 0x2ef   : > { %v2502_v11 = vpop.f32.mrf.mxu2 }
 0x2f0   : > { %v3283_v61 = vmax.f32 %v3247_v1, 0.0  ;;  %v2555_v6 = vadd.f32 %v2502_v11, %v2170_v58 }
 0x2f1   : > { %v2120_v46 = vpop.f32.mrf.mxu1 }
 0x2f2   : > { %3319 = vst [vmem:[%s5212_s12 + $0xc0] sm:$0xff] %v3283_v61  ;;  %v2948_v27 = vadd.f32 %v2895_v57, %v2555_v6  ;;  %v2171_v4 = vadd.f32 %v2120_v46, %v5079_v44  ;;  %v2905_v19 = vpop.f32.mrf.mxu3 }
 0x2f4   : > { %v3158_v22 = vpop.f32.mrf.mxu0  ;;  %v3208_v18 = vadd.f32 %v3155_v35, %v2948_v27 }
 0x2f6   : > { %v3248_v14 = vadd.f32 %v5200_v23, %v3208_v18 }
 0x2f7   : > { %v2505_v37 = vpop.f32.mrf.mxu2 }
 0x2f8   : > { %v3284_v28 = vmax.f32 %v3248_v14, 0.0  ;;  %v2556_v45 = vadd.f32 %v2505_v37, %v2171_v4 }
 0x2f9   : > { %v2122_v55 = vpop.f32.mrf.mxu1 }
 0x2fa   : > { %3320 = vst [vmem:[%s5212_s12 + $0xc8] sm:$0xff] %v3284_v28  ;;  %v2949_v38 = vadd.f32 %v2898_v10, %v2556_v45  ;;  %v2172_v33 = vadd.f32 %v2122_v55, %v5091_v15  ;;  %v2908_v39 = vpop.f32.mrf.mxu3 }
 0x2fc   : > { %v3160_v59 = vpop.f32.mrf.mxu0  ;;  %v3209_v41 = vadd.f32 %v3158_v22, %v2949_v38 }
 0x2fe   : > { %v3249_v40 = vadd.f32 %v5200_v23, %v3209_v41 }
 0x2ff   : > { %v2507_v56 = vpop.f32.mrf.mxu2 }
 0x300   : > { %v3285_v50 = vmax.f32 %v3249_v40, 0.0  ;;  %v2557_v13 = vadd.f32 %v2507_v56, %v2172_v33 }
 0x301   : > { %v2125_v62 = vpop.f32.mrf.mxu1 }
 0x302   : > { %3321 = vst [vmem:[%s5212_s12 + $0xd0] sm:$0xff] %v3285_v50  ;;  %v2950_v44 = vadd.f32 %v2900_v51, %v2557_v13  ;;  %v2173_v43 = vadd.f32 %v2125_v62, %v5103_v29 }
 0x304   : > { %v3163_v3 = vpop.f32.mrf.mxu0  ;;  %v3210_v32 = vadd.f32 %v3160_v59, %v2950_v44 }
 0x306   : > { %v3250_v42 = vadd.f32 %v5200_v23, %v3210_v32 }
 0x307   : > { %v2510_v8 = vpop.f32.mrf.mxu2 }
 0x308   : > { %v3286_v34 = vmax.f32 %v3250_v42, 0.0  ;;  %v2558_v57 = vadd.f32 %v2510_v8, %v2173_v43 }
 0x309   : > { %v2127_v21 = vpop.f32.mrf.mxu1 }
 0x30a   : > { %3322 = vst [vmem:[%s5212_s12 + $0xd8] sm:$0xff] %v3286_v34  ;;  %v2951_v15 = vadd.f32 %v2903_v12, %v2558_v57  ;;  %v2174_v17 = vadd.f32 %v2127_v21, %v5115_v0  ;;  %v2910_v0 = vpop.f32.mrf.mxu3 }
 0x30c   : > { %v3165_v31 = vpop.f32.mrf.mxu0  ;;  %v3211_v49 = vadd.f32 %v3163_v3, %v2951_v15  ;;  %v4300_v15 = vld [vmem:[%s4999_s5] ss:$0 sm:$0xff] }
 0x30e   : > { %v3251_v52 = vadd.f32 %v5200_v23, %v3211_v49 }
 0x30f   : > { %v2512_v5 = vpop.f32.mrf.mxu2 }
 0x310   : > { %v3287_v48 = vmax.f32 %v3251_v52, 0.0  ;;  %v2559_v25 = vadd.f32 %v2512_v5, %v2174_v17 }
 0x311   : > { %v2130_v30 = vpop.f32.mrf.mxu1 }
 0x312   : > { %3323 = vst [vmem:[%s5212_s12 + $0xe0] sm:$0xff] %v3287_v48  ;;  %v2952_v29 = vadd.f32 %v2905_v19, %v2559_v25  ;;  %v2175_v63 = vadd.f32 %v2130_v30, %v5127_v26  ;;  %v2913_v22 = vpop.f32.mrf.mxu3 }
 0x314   : > { %v3168_v7 = vpop.f32.mrf.mxu0  ;;  %v3212_v9 = vadd.f32 %v3165_v31, %v2952_v29 }
 0x316   : > { %v3252_v10 = vadd.f32 %v5200_v23, %v3212_v9 }
 0x317   : > { %v2515_v20 = vpop.f32.mrf.mxu2 }
 0x318   : > { %v3288_v24 = vmax.f32 %v3252_v10, 0.0  ;;  %v2560_v2 = vadd.f32 %v2515_v20, %v2175_v63 }
 0x319   : > { %v2132_v35 = vpop.f32.mrf.mxu1 }
 0x31a   : > { %3324 = vst [vmem:[%s5212_s12 + $0xe8] sm:$0xff] %v3288_v24  ;;  %v2953_v53 = vadd.f32 %v2908_v39, %v2560_v2  ;;  %v2176_v61 = vadd.f32 %v2132_v35, %v5139_v47  ;;  %v2915_v12 = vpop.f32.mrf.mxu3 }
 0x31c   : > { %v3170_v1 = vpop.f32.mrf.mxu0  ;;  %v3213_v58 = vadd.f32 %v3168_v7, %v2953_v53 }
 0x31e   : > { %v3253_v11 = vadd.f32 %v5200_v23, %v3213_v58 }
 0x31f   : > { %v2517_v6 = vpop.f32.mrf.mxu2 }
 0x320   : > { %v3289_v46 = vmax.f32 %v3253_v11, 0.0  ;;  %v2561_v51 = vadd.f32 %v2517_v6, %v2176_v61 }
 0x321   : > { %v2135_v27 = vpop.f32.mrf.mxu1 }
 0x322   : > { %3325 = vst [vmem:[%s5212_s12 + $0xf0] sm:$0xff] %v3289_v46  ;;  %v2954_v26 = vadd.f32 %v2910_v0, %v2561_v51  ;;  %v2177_v37 = vadd.f32 %v2135_v27, %v5151_v16  ;;  %v2918_v19 = vpop.f32.mrf.mxu3 }
 0x324   : > { %v3214_v18 = vadd.f32 %v3170_v1, %v2954_v26  ;;  %v3173_v14 = vpop.f32.mrf.mxu0 }
 0x326   : > { %v3254_v4 = vadd.f32 %v5200_v23, %v3214_v18 }
 0x327   : > { %v2520_v28 = vpop.f32.mrf.mxu2 }
 0x328   : > { %v3290_v45 = vmax.f32 %v3254_v4, 0.0  ;;  %v2562_v55 = vadd.f32 %v2520_v28, %v2177_v37 }
 0x329   : > { %v2137_v38 = vpop.f32.mrf.mxu1 }
 0x32a   : > { %3326 = vst [vmem:[%s5212_s12 + $0xf8] sm:$0xff] %v3290_v45  ;;  %v2955_v47 = vadd.f32 %v2913_v22, %v2562_v55  ;;  %v2178_v40 = vadd.f32 %v2137_v38, %v5163_v36  ;;  %v2920_v5 = vpop.f32.mrf.mxu3 }
 0x32c   : > { %v3215_v59 = vadd.f32 %v3173_v14, %v2955_v47  ;;  %v3175_v33 = vpop.f32.mrf.mxu0 }
 0x32e   : > { %v3255_v41 = vadd.f32 %v5200_v23, %v3215_v59 }
 0x32f   : > { %v2522_v56 = vpop.f32.mrf.mxu2 }
 0x330   : > { %v3291_v50 = vmax.f32 %v3255_v41, 0.0  ;;  %v2563_v13 = vadd.f32 %v2522_v56, %v2178_v40 }
 0x331   : > { %v2140_v16 = vpop.f32.mrf.mxu1 }
 0x332   : > { %3327 = vst [vmem:[%s5212_s12 + $0x100] sm:$0xff] %v3291_v50  ;;  %v2956_v62 = vadd.f32 %v2915_v12, %v2563_v13  ;;  %v2179_v32 = vadd.f32 %v2140_v16, %v5175_v54 }
 0x334   : > { %v3216_v44 = vadd.f32 %v3175_v33, %v2956_v62  ;;  %v3178_v36 = vpop.f32.mrf.mxu0 }
 0x336   : > { %v3256_v3 = vadd.f32 %v5200_v23, %v3216_v44 }
 0x337   : > { %v2525_v42 = vpop.f32.mrf.mxu2 }
 0x338   : > { %v3292_v43 = vmax.f32 %v3256_v3, 0.0  ;;  %v2564_v8 = vadd.f32 %v2525_v42, %v2179_v32 }
 0x339   : > { %v2142_v57 = vpop.f32.mrf.mxu1 }
 0x33a   : > { %3328 = vst [vmem:[%s5212_s12 + $0x108] sm:$0xff] %v3292_v43  ;;  %v2957_v34 = vadd.f32 %v2918_v19, %v2564_v8  ;;  %v2180_v49 = vadd.f32 %v2142_v57, %v5188_v60 }
 0x33c   : > { %v3217_v21 = vadd.f32 %v3178_v36, %v2957_v34  ;;  %v3180_v39 = vpop.f32.mrf.mxu0 }
 0x33e   : > { %v3257_v31 = vadd.f32 %v4300_v15, %v3217_v21 }
 0x33f   : > { %v2527_v52 = vpop.f32.mrf.mxu2 }
 0x340   : > { %v3293_v17 = vmax.f32 %v3257_v31, 0.0  ;;  %v2565_v23 = vadd.f32 %v2527_v52, %v2180_v49 }
 0x342   : > { %3329 = vst [vmem:[%s5212_s12 + $0x110] sm:$0xff] %v3293_v17  ;;  %v2958_v54 = vadd.f32 %v2920_v5, %v2565_v23 }
 0x344   : > { %v3218_v48 = vadd.f32 %v3180_v39, %v2958_v54 }
 0x346   : > { %v3258_v25 = vadd.f32 %v4300_v15, %v3218_v48 }
 0x348   : > { %v3294_v30 = vmax.f32 %v3258_v25, 0.0 }
 0x34a   : > { %3330 = vst [vmem:[%s5212_s12 + $0x118] sm:$0xff] %v3294_v30 }
 0x34b PF: > { %s13_s16 = sadd.s32 1, %s4339_s16   ;;  %s5497_s12 = smov %s4331_s14 }
 0x34c   : > { %p10_p7 = scmp.ge.s32.totalorder %s13_s16, 6   ;;  %s5498_s13 = smov %s4335_s15 }
 0x34d   : > { %s5499_s14 = smov %s5502_s17  ;;  %s5500_s15 = smov %s5506_s18 }
 0x34e   :  { %12 = sbr.rel (!%p10_p7) target bundleno = 3 (0x3), region = 76 }

// kernel: _forward.3
= control target key start
LH: loop header
LB: loop body
LE: loop exit
PB: predicated region body
PF: predicated region fallthrough
CT: control target
= control target key end

     0   :  { %s2431_s12 = smov 0   ;;  %s2433_s13 = smov 0   ;;  %s2841_s0 = inlined_call_operand.vmem [shape: bf16[2,2,104,128], index: 0, kind: input, shape index: {}]   ;;  %s2842_s1 = inlined_call_operand.vmem [shape: bf16[2,3,3,128,128], index: 1, kind: input, shape index: {}]   ;;  %s2843_s2 = inlined_call_operand.vmem [shape: f32[2,1,128], index: 2, kind: input, shape index: {}]   ;;  %s2844_s3 = inlined_call_operand.vmem [shape: f32[2,2,80,128], index: 3, kind: output, shape index: {}]  }
   0x1   :  { %s2435_s14 = smov 0   ;;  %s2437_s15 = smov 0  }
   0x2   :  { %s2439_s16 = smov 0  }
   0x3 LB: > { %s22_s17 = sadd.s32 1, %s2401_s14  ;;  %s25_s18 = sadd.s32 1, %s2405_s15  ;;  %s2409_s16 = sphi %s2439_s16, %s13_s16   ;;  %s2405_s15 = sphi %s2437_s15, %s2848_s15   ;;  %s2401_s14 = sphi %s2435_s14, %s2847_s14   ;;  %s2397_s13 = sphi %s2433_s13, %s2846_s13   ;;  %s2393_s12 = sphi %s2431_s12, %s2845_s12  }
   0x4   : > { %p23_p0 = scmp.ge.s32.totalorder %s22_s17, 2  ;;  %p1748_p1 = scmp.ge.s32.totalorder %s2409_s16, 1 }
   0x5   : > { %p175_p2 = scmp.lt.s32.totalorder %s2409_s16, 5 }
   0x6   : > { %s2850_s17 = smov (%p23_p0, %s22_s17), 0  ;;  %s2852_s18 = smov (!%p23_p0, %s25_s18), %s2405_s15 }
   0x7   : > { %p176_p3 = pnand %p1748_p1, %p175_p2  ;;  %p27_p4 = scmp.ge.s32.totalorder %s2852_s18, 2 }
   0x8   : > { %p215_p5 = scmp.lt.s32.totalorder (!%p176_p3), %s2397_s13, 1  ;;  %p217_p6 = scmp.lt.s32.totalorder (!%p176_p3), %s2393_s12, 1 }
   0x9   : > { %s2854_s18 = smov (%p27_p4, %s2852_s18), 0  ;;  %179 = sbr.rel (%p176_p3) target bundleno = 380 (0x17c), region = 32 }
   0xe   : > { %s2856_s13 = smov (!%p215_p5, %s2397_s13), 1  ;;  %s2858_s12 = smov (!%p217_p6, %s2393_s12), 1  ;;  %vm313_vm0 = vsmask.f32 7424  ;;  %vm553_vm1 = vcmask 1046528   ;;  %vm1019_vm4 = vcmask 1045504  }
   0xf   : > { %s2327_s19 = smul.u32 576, %s2856_s13  ;;  %vm847_vm2 = vsmask.f32 6400  ;;  %vm1313_vm3 = vsmask.f32 5376  ;;  %vm1485_vm5 = vcmask 1044480   ;;  %s231_s5 = scalar_lea.vmem %s2843_s2, %s2856_s13 }
  0x10   : > { %s2325_s23 = smul.u32 13, %s2858_s12 }
  0x11   : > { %s2469_s22 = scalar_lea.vmem %s2842_s1, %s2327_s19  ;;  %s2326_s24 = smul.u32 26, %s2856_s13 }
  0x12   : > { %v2237_v0 = vld [vmem:[%s2469_s22 + $0x78] sm:$0xff]  ;;  %v2236_v1 = vld [vmem:[%s2469_s22 + $0x70] sm:$0xff]  ;;  %v2235_v4 = vld [vmem:[%s2469_s22 + $0x68] sm:$0xff]  ;;  %s2328_s6 = smul.u32 10, %s2858_s12 }
  0x13   : > { %411 = vmatpush.bf16.msra.mxu0 %v2237_v0  ;;  %2309 = vmatpush.bf16.msra.mxu1 %v2237_v0  ;;  %v2257_v2 = vld [vmem:[%s2469_s22 + $0xf8] sm:$0xff]  ;;  %v2256_v3 = vld [vmem:[%s2469_s22 + $0xf0] sm:$0xff]  ;;  %s221_s25 = sadd.s32 %s2326_s24, %s2325_s23  ;;  %v2255_v5 = vld [vmem:[%s2469_s22 + $0xe8] sm:$0xff]  ;;  %s2329_s7 = smul.u32 20, %s2856_s13 }
  0x14   : > { %2310 = vmatpush.bf16.msra.mxu2 %v2237_v0  ;;  %782 = vmatpush.bf16.msra.mxu3 %v2257_v2  ;;  %s1749_s26 = sshll.u32 %s221_s25, 2  ;;  %v2234_v6 = vld [vmem:[%s2469_s22 + $0x60] sm:$0xff]  ;;  %v2233_v9 = vld [vmem:[%s2469_s22 + $0x58] sm:$0xff]  ;;  %v2232_v17 = vld [vmem:[%s2469_s22 + $0x50] sm:$0xff] }
  0x15   : > { %s2483_s29 = scalar_lea.vmem %s2841_s0, %s1749_s26  ;;  %v2254_v7 = vld [vmem:[%s2469_s22 + $0xe0] sm:$0xff]  ;;  %v2253_v14 = vld [vmem:[%s2469_s22 + $0xd8] sm:$0xff]  ;;  %v2252_v24 = vld [vmem:[%s2469_s22 + $0xd0] sm:$0xff]  ;;  %s238_s8 = sadd.s32 %s2329_s7, %s2328_s6 }
  0x16   : > { %v267_v8 = vld [vmem:[%s2483_s29 + $0x28] sm:$0x1]  ;;  %v2489_v10 = vld [vmem:[%s2483_s29] sm:$0xff]   ;;  %v2492_v11 = vld [vmem:[%s2483_s29 + $0x10] sm:$0xff]  ;;  %s1751_s11 = sshll.u32 %s238_s8, 3 }
  0x17   : > { %412 = vmatpush.bf16.msra.mxu0 %v2236_v1  ;;  %2311 = vmatpush.bf16.msra.mxu1 %v2236_v1  ;;  %v2495_v12 = vld [vmem:[%s2483_s29 + $0x20] sm:$0xff]  ;;  %v306_v13 = vunpack.c.l.b16 %v267_v8  ;;  %v2499_v15 = vld [vmem:[%s2483_s29 + $0x8] sm:$0xff]  ;;  %v317_v16 = vshll.u32 %v2489_v10, 16  ;;  %v2504_v18 = vld [vmem:[%s2483_s29 + $0x18] sm:$0xff]  ;;  %v330_v19 = vshll.u32 %v2492_v11, 16  ;;  %v315_v25 = vshrl.u32 %v2489_v10, 16  ;;  %s2797_s20 = scalar_lea.vmem %s2844_s3, %s1751_s11 }
  0x18   : > { %2312 = vmatpush.bf16.msra.mxu2 %v2236_v1  ;;  %783 = vmatpush.bf16.msra.mxu3 %v2256_v3  ;;  %v346_v21 = vshll.u32 %v2495_v12, 16  ;;  %v662_v22 = vld [vmem:[%s2483_s29 + $0x4] sm:$0xe]  ;;  %v2512_v23 = vld [vmem:[%s2483_s29 + $0x8] sm:$0xff]   ;;  %v322_v27 = vshll.u32 %v2499_v15, 16  ;;  %v334_v28 = vshrl.u32 %v2492_v11, 16 }
  0x19   : > { %v2507_v20 = vpack.c.b16 %v306_v13, %v306_v13  ;;  %v319_v26 = vrot.slane %v317_v16, 1  ;;  %v2231_v29 = vld [vmem:[%s2469_s22 + $0x48] sm:$0xff]  ;;  %v2519_v30 = vrot.slane %v330_v19, 1  ;;  %v338_v31 = vshll.u32 %v2504_v18, 16  ;;  %v2230_v39 = vld [vmem:[%s2469_s22 + $0x40] sm:$0xff]  ;;  %v2229_v45 = vld [vmem:[%s2469_s22 + $0x38] sm:$0xff] }
  0x1a   : > { %v701_v32 = vunpack.c.l.b16 %v662_v22  ;;  %v702_v33 = vunpack.c.l.b16 %v2512_v23  ;;  %v2523_v34 = vrot.slane %v346_v21, 1  ;;  %v350_v35 = vshrl.u32 %v2495_v12, 16  ;;  %v2251_v37 = vld [vmem:[%s2469_s22 + $0xc8] sm:$0xff]  ;;  %v2245_v48 = vld [vmem:[%s2469_s22 + $0xb8] sm:$0xff]  ;;  %v2250_v52 = vld [vmem:[%s2469_s22 + $0xc0] sm:$0xff] }
  0x1b   : > { %413 = vmatpush.bf16.msra.mxu0 %v2235_v4  ;;  %2313 = vmatpush.bf16.msra.mxu1 %v2235_v4  ;;  %v354_v36 = vshll.u32 %v2507_v20, 16  ;;  %v324_v38 = vrot.slane %v322_v27, 1  ;;  %v320_v40 = vor.u32 %v319_v26, %v315_v25  ;;  %v336_v41 = vor.u32 %v334_v28, %v2519_v30  ;;  %v2531_v43 = vld [vmem:[%s2483_s29 + $0xc] sm:$0xff]  ;;  %v2265_v49 = vld [vmem:[%s2469_s22 + $0x138] sm:$0xff]  ;;  %v2226_v3 = vld [vmem:[%s2469_s22 + $0x20] sm:$0xff] }
  0x1c   : > { %2314 = vmatpush.bf16.msra.mxu2 %v2235_v4  ;;  %784 = vmatpush.bf16.msra.mxu3 %v2255_v5  ;;  %v340_v42 = vrot.slane %v338_v31, 1  ;;  %v2535_v44 = vpack.c.b16 %v702_v33, %v701_v32  ;;  %v352_v46 = vor.u32 %v350_v35, %v2523_v34  ;;  %v719_v54 = vrot.slane %v2531_v43, 1  ;;  %v2228_v56 = vld [vmem:[%s2469_s22 + $0x30] sm:$0xff]  ;;  %v2293_v57 = vld [vmem:[%s2469_s22 + $0x1f8] sm:$0xff]  ;;  %v2227_v61 = vld [vmem:[%s2469_s22 + $0x28] sm:$0xff] }
  0x1d   : > { %v356_v47 = vrot.slane %v354_v36, 1  ;;  %v325_v50 = vsel %vm313_vm0, %v320_v40, %v324_v38  ;;  %v2244_v58 = vld [vmem:[%s2469_s22 + $0xb0] sm:$0xff]  ;;  %v2243_v63 = vld [vmem:[%s2469_s22 + $0xa8] sm:$0xff]  ;;  %v326_v1 = vshrl.u32 %v2499_v15, 16  ;;  %v342_v2 = vshrl.u32 %v2504_v18, 16  ;;  %v2242_v4 = vld [vmem:[%s2469_s22 + $0xa0] sm:$0xff] }
  0x1e   : > { %v341_v51 = vsel %vm313_vm0, %v336_v41, %v340_v42  ;;  %v718_v53 = vrot.slane %v2535_v44, 1  ;;  %v2264_v59 = vld [vmem:[%s2469_s22 + $0x130] sm:$0xff]  ;;  %v2263_v0 = vld [vmem:[%s2469_s22 + $0x128] sm:$0xff]  ;;  %v2262_v5 = vld [vmem:[%s2469_s22 + $0x120] sm:$0xff]  ;;  %v849_v27 = vshrl.u32 %v2535_v44, 16  ;;  %v860_v31 = vshll.u32 %v2531_v43, 16 }
  0x1f   : > { %414 = vmatpush.bf16.msra.mxu0 %v2234_v6  ;;  %2315 = vmatpush.bf16.msra.mxu1 %v2234_v6  ;;  %v357_v55 = vsel %vm313_vm0, %v352_v46, %v356_v47  ;;  %v2292_v62 = vld [vmem:[%s2469_s22 + $0x1f0] sm:$0xff]  ;;  %v2241_v13 = vld [vmem:[%s2469_s22 + $0x98] sm:$0xff]  ;;  %v2306_v25 = vld [vmem:[%s2483_s29] sm:$0xf0]  ;;  %v555_v46 = vrot.slane %v2499_v15, 1 }
  0x20   : > { %2316 = vmatpush.bf16.msra.mxu2 %v2234_v6  ;;  %785 = vmatpush.bf16.msra.mxu3 %v2254_v7  ;;  %v720_v60 = vsel %vm553_vm1, %v718_v53, %v719_v54  ;;  %v328_v6 = vor.u32 %v326_v1, %v324_v38  ;;  %v344_v7 = vor.u32 %v342_v2, %v340_v42  ;;  %v2562_v8 = vld [vmem:[%s2483_s29 + $0x14] sm:$0xff]  ;;  %v2307_v26 = vld [vmem:[%s2483_s29] sm:$0xe]  ;;  %v2291_v28 = vld [vmem:[%s2469_s22 + $0x1e8] sm:$0xff]  ;;  %v851_v38 = vrot.slane %v849_v27, 1 }
  0x21   : > { %v721_v19 = vrot.slane %v2562_v8, 1  ;;  %v2224_v21 = vld [vmem:[%s2469_s22 + $0x10] sm:$0xff]  ;;  %v2239_v35 = vld [vmem:[%s2469_s22 + $0x88] sm:$0xff]  ;;  %v862_v41 = vrot.slane %v860_v31, 2  ;;  %v2222_v42 = vld [vmem:[%s2469_s22] sm:$0xff] }
  0x22   : > { %v333_v16 = vsel %vm313_vm0, %v328_v6, %v2519_v30  ;;  %v2240_v22 = vld [vmem:[%s2469_s22 + $0x90] sm:$0xff]  ;;  %v857_v30 = vshrl.u32 %v2531_v43, 16  ;;  %v2259_v36 = vld [vmem:[%s2469_s22 + $0x108] sm:$0xff]  ;;  %v2258_v47 = vld [vmem:[%s2469_s22 + $0x100] sm:$0xff] }
  0x23   : > { %415 = vmatpush.bf16.msra.mxu0 %v2233_v9  ;;  %2317 = vmatpush.bf16.msra.mxu1 %v2233_v9  ;;  %v722_v32 = vsel %vm553_vm1, %v719_v54, %v721_v19  ;;  %v2596_v53 = vld [vmem:[%s2483_s29 + $0x1c] sm:$0xff]  ;;  %v2299_v2 = vld [vmem:[%s2469_s22 + $0x228] sm:$0xff]  ;;  %v2268_v27 = vld [vmem:[%s2469_s22 + $0x150] sm:$0xff] }
  0x24   : > { %2318 = vmatpush.bf16.msra.mxu2 %v2233_v9  ;;  %786 = vmatpush.bf16.msra.mxu3 %v2253_v14  ;;  %v2225_v9 = vld [vmem:[%s2469_s22 + $0x18] sm:$0xff]  ;;  %v859_v40 = vrot.slane %v857_v30, 1  ;;  %v2270_v6 = vld [vmem:[%s2469_s22 + $0x160] sm:$0xff]  ;;  %v2279_v31 = vld [vmem:[%s2469_s22 + $0x188] sm:$0xff] }
  0x25   : > { %v2261_v14 = vld [vmem:[%s2469_s22 + $0x118] sm:$0xff] }
  0x27   : > { %416 = vmatpush.bf16.msra.mxu0 %v2232_v17  ;;  %2319 = vmatpush.bf16.msra.mxu1 %v2232_v17 }
  0x28   : > { %2320 = vmatpush.bf16.msra.mxu2 %v2232_v17  ;;  %787 = vmatpush.bf16.msra.mxu3 %v2252_v24  ;;  %v349_v17 = vsel %vm313_vm0, %v344_v7, %v2523_v34  ;;  %v2260_v24 = vld [vmem:[%s2469_s22 + $0x110] sm:$0xff]  ;;  %v2223_v34 = vld [vmem:[%s2469_s22 + $0x8] sm:$0xff]  ;;  %v2298_v7 = vld [vmem:[%s2469_s22 + $0x220] sm:$0xff] }
  0x2b   : > { %417 = vmatpush.bf16.msra.mxu0 %v2231_v29  ;;  %2321 = vmatpush.bf16.msra.mxu1 %v2231_v29 }
  0x2c   : > { %2322 = vmatpush.bf16.msra.mxu2 %v2231_v29  ;;  %788 = vmatpush.bf16.msra.mxu3 %v2251_v37  ;;  %v852_v29 = vshll.u32 %v2535_v44, 16  ;;  %v2308_v37 = vor.u32 %v2307_v26, %v2306_v25  ;;  %v2238_v44 = vld [vmem:[%s2469_s22 + $0x80] sm:$0xff]  ;;  %v2297_v25 = vld [vmem:[%s2469_s22 + $0x218] sm:$0xff]  ;;  %v2288_v26 = vld [vmem:[%s2469_s22 + $0x1d0] sm:$0xff] }
  0x2f   : > { %418 = vmatpush.bf16.msra.mxu0 %v2230_v39  ;;  %2323 = vmatpush.bf16.msra.mxu1 %v2230_v39 }
  0x30   : > { %2324 = vmatpush.bf16.msra.mxu2 %v2230_v39  ;;  %789 = vmatpush.bf16.msra.mxu3 %v2250_v52  ;;  %v854_v39 = vrot.slane %v852_v29, 2  ;;  %v2301_v52 = vld [vmem:[%s2469_s22 + $0x238] sm:$0xff]  ;;  %v878_v29 = vshll.u32 %v2596_v53, 16 }
  0x32   : > { %419 = vmatmul.bf16.vlgmr.msra.gmra.mxu0 %v325_v50  ;;  %429 = vmatmul.bf16.vlgmr.msra.gmra.mxu1 %v341_v51  ;;  %v855_v50 = vor.u32 %v854_v39, %v851_v38  ;;  %v863_v51 = vor.u32 %v862_v41, %v859_v40  ;;  %v559_v38 = vrot.slane %v2504_v18, 1 }
  0x33   : > { %498 = vmatpush.bf16.msrb.mxu1 %v2229_v45  ;;  %954 = vmatpush.bf16.msrb.mxu0 %v2265_v49  ;;  %v554_v45 = vrot.slane %v2308_v37, 1  ;;  %v2273_v49 = vld [vmem:[%s2469_s22 + $0x178] sm:$0xff] }
  0x34   : > { %618 = vmatpush.bf16.msrb.mxu2 %v2245_v48  ;;  %1420 = vmatpush.bf16.msrb.mxu3 %v2293_v57  ;;  %v2285_v48 = vld [vmem:[%s2469_s22 + $0x1b8] sm:$0xff]  ;;  %v2272_v57 = vld [vmem:[%s2469_s22 + $0x170] sm:$0xff] }
  0x35   : > { %439 = vmatmul.bf16.vlgmr.msra.gmra.mxu2 %v357_v55  ;;  %790 = vmatmul.bf16.vlgmr.msra.gmra.mxu3 %v720_v60  ;;  %v556_v54 = vsel %vm553_vm1, %v554_v45, %v555_v46  ;;  %v864_v55 = vsel %vm847_vm2, %v855_v50, %v863_v51  ;;  %v2290_v60 = vld [vmem:[%s2469_s22 + $0x1e0] sm:$0xff] }
  0x37   : > { %499 = vmatpush.bf16.msrb.mxu1 %v2228_v56  ;;  %955 = vmatpush.bf16.msrb.mxu0 %v2264_v59  ;;  %v2284_v56 = vld [vmem:[%s2469_s22 + $0x1b0] sm:$0xff] }
  0x38   : > { %619 = vmatpush.bf16.msrb.mxu2 %v2244_v58  ;;  %1421 = vmatpush.bf16.msrb.mxu3 %v2292_v62  ;;  %v723_v58 = vrot.slane %v2596_v53, 1  ;;  %v2300_v59 = vld [vmem:[%s2469_s22 + $0x230] sm:$0xff]  ;;  %v869_v62 = vshll.u32 %v2562_v8, 16 }
  0x3a   : > { %v724_v1 = vsel %vm553_vm1, %v721_v19, %v723_v58 }
  0x3b   : > { %500 = vmatpush.bf16.msrb.mxu1 %v2227_v61  ;;  %956 = vmatpush.bf16.msrb.mxu0 %v2263_v0  ;;  %v866_v61 = vshrl.u32 %v2562_v8, 16  ;;  %v2271_v0 = vld [vmem:[%s2469_s22 + $0x168] sm:$0xff] }
  0x3c   : > { %620 = vmatpush.bf16.msrb.mxu2 %v2243_v63  ;;  %1422 = vmatpush.bf16.msrb.mxu3 %v2291_v28  ;;  %v2283_v63 = vld [vmem:[%s2469_s22 + $0x1a8] sm:$0xff]  ;;  %v875_v28 = vshrl.u32 %v2596_v53, 16 }
  0x3f   : > { %501 = vmatpush.bf16.msrb.mxu1 %v2226_v3  ;;  %957 = vmatpush.bf16.msrb.mxu0 %v2262_v5  ;;  %v868_v3 = vrot.slane %v866_v61, 1  ;;  %v2282_v5 = vld [vmem:[%s2469_s22 + $0x1a0] sm:$0xff] }
  0x40   : > { %621 = vmatpush.bf16.msrb.mxu2 %v2242_v4  ;;  %1423 = vmatpush.bf16.msrb.mxu3 %v2290_v60  ;;  %v871_v4 = vrot.slane %v869_v62, 2  ;;  %v826_v60 = vld [vmem:[%s2483_s29 + $0x2c] sm:$0x3] }
  0x42   : > { %424 = vmatmul.bf16.gmra.mxu0 %v333_v16  ;;  %434 = vmatmul.bf16.gmra.mxu1 %v349_v17  ;;  %v2621_v16 = vld [vmem:[%s2483_s29 + $0x24] sm:$0xff]  ;;  %v2269_v17 = vld [vmem:[%s2469_s22 + $0x158] sm:$0xff] }
  0x43   : > { %502 = vmatpush.bf16.msrb.mxu1 %v2225_v9  ;;  %958 = vmatpush.bf16.msrb.mxu0 %v2261_v14  ;;  %v557_v9 = vrot.slane %v2492_v11, 1  ;;  %v2281_v14 = vld [vmem:[%s2469_s22 + $0x198] sm:$0xff]  ;;  %v887_v50 = vshll.u32 %v2621_v16, 16 }
  0x44   : > { %622 = vmatpush.bf16.msrb.mxu2 %v2241_v13  ;;  %v872_v13 = vor.u32 %v871_v4, %v868_v3 }
  0x45   : > { %795 = vmatmul.bf16.gmra.mxu3 %v722_v32  ;;  %v558_v19 = vsel %vm553_vm1, %v555_v46, %v557_v9  ;;  %v2296_v32 = vld [vmem:[%s2469_s22 + $0x210] sm:$0xff]  ;;  %v560_v41 = vsel %vm553_vm1, %v557_v9, %v559_v38  ;;  %v2294_v9 = vld [vmem:[%s2469_s22 + $0x200] sm:$0xff] }
  0x47   : > { %503 = vmatpush.bf16.msrb.mxu1 %v2224_v21  ;;  %959 = vmatpush.bf16.msrb.mxu0 %v2260_v24  ;;  %v873_v21 = vsel %vm847_vm2, %v863_v51, %v872_v13  ;;  %v2280_v24 = vld [vmem:[%s2469_s22 + $0x190] sm:$0xff]  ;;  %v2278_v51 = vld [vmem:[%s2469_s22 + $0x180] sm:$0xff] }
  0x48   : > { %623 = vmatpush.bf16.msrb.mxu2 %v2240_v22  ;;  %v725_v22 = vrot.slane %v2621_v16, 1 }
  0x4a   : > { %v726_v30 = vsel %vm553_vm1, %v723_v58, %v725_v22 }
  0x4b   : > { %504 = vmatpush.bf16.msrb.mxu1 %v2223_v34  ;;  %960 = vmatpush.bf16.msrb.mxu0 %v2259_v36  ;;  %v672_v34 = vld [vmem:[%s2483_s29 + $0x2c] sm:$0x1]  ;;  %v880_v36 = vrot.slane %v878_v29, 2 }
  0x4c   : > { %624 = vmatpush.bf16.msrb.mxu2 %v2239_v35  ;;  %v2287_v35 = vld [vmem:[%s2469_s22 + $0x1c8] sm:$0xff]  ;;  %v711_v37 = vunpack.c.l.b16 %v672_v34 }
  0x4e   : > { %v717_v40 = vpack.c.b16 %v711_v37, %v711_v37  ;;  %v1464_v37 = vld [vmem:[%s2483_s29 + $0x8] sm:$0x8] }
  0x4f   : > { %505 = vmatpush.bf16.msrb.mxu1 %v2222_v42  ;;  %961 = vmatpush.bf16.msrb.mxu0 %v2258_v47  ;;  %v1128_v42 = vld [vmem:[%s2483_s29 + $0x8] sm:$0xc]  ;;  %v1168_v47 = vunpack.c.h.b16 %v2512_v23 }
  0x50   : > { %625 = vmatpush.bf16.msrb.mxu2 %v2238_v44  ;;  %v727_v45 = vrot.slane %v717_v40, 1  ;;  %v1167_v46 = vunpack.c.l.b16 %v1128_v42 }
  0x52   : > { %506 = vmatmul.bf16.vlgmr.msrb.gmra.mxu1 %v2489_v10  ;;  %962 = vmatmul.bf16.vlgmr.msrb.gmra.mxu0 %v864_v55  ;;  %v2289_v10 = vld [vmem:[%s2469_s22 + $0x1d8] sm:$0xff]  ;;  %v728_v55 = vsel %vm553_vm1, %v725_v22, %v727_v45  ;;  %v2658_v58 = vpack.c.b16 %v1168_v47, %v1167_v46 }
  0x53   : > { %1084 = vmatpush.bf16.msra.mxu1 %v2273_v49  ;;  %1550 = vmatpush.bf16.msra.mxu0 %v2301_v52  ;;  %v884_v49 = vshrl.u32 %v2621_v16, 16  ;;  %v2295_v52 = vld [vmem:[%s2469_s22 + $0x208] sm:$0xff] }
  0x54   : > { %1248 = vmatpush.bf16.msra.mxu2 %v2285_v48  ;;  %1424 = vmatpush.bf16.msrb.mxu3 %v2289_v10  ;;  %v2267_v48 = vld [vmem:[%s2469_s22 + $0x148] sm:$0xff]  ;;  %v1315_v61 = vshrl.u32 %v2658_v58, 16  ;;  %v1318_v62 = vshll.u32 %v2658_v58, 16  ;;  %v845_v10 = vunpack.c.l.b16 %v826_v60 }
  0x55   : > { %626 = vmatmul.bf16.vlgmr.msrb.gmra.mxu2 %v556_v54  ;;  %800 = vmatmul.bf16.gmra.mxu3 %v724_v1  ;;  %v2286_v54 = vld [vmem:[%s2469_s22 + $0x1c0] sm:$0xff]  ;;  %v561_v1 = vrot.slane %v2495_v12, 1 }
  0x56   : > { %v1317_v3 = vrot.slane %v1315_v61, 2  ;;  %v1320_v4 = vrot.slane %v1318_v62, 3 }
  0x57   : > { %1085 = vmatpush.bf16.msra.mxu1 %v2272_v57  ;;  %1551 = vmatpush.bf16.msra.mxu0 %v2300_v59  ;;  %v2654_v57 = vld [vmem:[%s2483_s29 + $0x10] sm:$0xff]  ;;  %v889_v59 = vrot.slane %v887_v50, 2 }
  0x58   : > { %1249 = vmatpush.bf16.msra.mxu2 %v2284_v56  ;;  %1425 = vmatpush.bf16.msrb.mxu3 %v2288_v26  ;;  %v2266_v56 = vld [vmem:[%s2469_s22 + $0x140] sm:$0xff]  ;;  %v1185_v46 = vrot.slane %v2654_v57, 2 }
  0x5b   : > { %1086 = vmatpush.bf16.msra.mxu1 %v2271_v0  ;;  %1552 = vmatpush.bf16.msra.mxu0 %v2299_v2  ;;  %v1326_v0 = vshll.u32 %v2654_v57, 16 }
  0x5c   : > { %1250 = vmatpush.bf16.msra.mxu2 %v2283_v63  ;;  %1426 = vmatpush.bf16.msrb.mxu3 %v2287_v35  ;;  %v1323_v63 = vshrl.u32 %v2654_v57, 16 }
  0x5f   : > { %1087 = vmatpush.bf16.msra.mxu1 %v2270_v6  ;;  %1553 = vmatpush.bf16.msra.mxu0 %v2298_v7  ;;  %v1328_v6 = vrot.slane %v1326_v0, 3  ;;  %v562_v7 = vsel %vm553_vm1, %v559_v38, %v561_v1  ;;  %v1292_v0 = vld [vmem:[%s2483_s29 + $0x30] sm:$0x7] }
  0x60   : > { %1251 = vmatpush.bf16.msra.mxu2 %v2282_v5  ;;  %1427 = vmatpush.bf16.msrb.mxu3 %v2286_v54  ;;  %v1325_v5 = vrot.slane %v1323_v63, 2 }
  0x62   : > { %511 = vmatmul.bf16.gmra.mxu1 %v2499_v15  ;;  %967 = vmatmul.bf16.gmra.mxu0 %v873_v21  ;;  %v877_v15 = vrot.slane %v875_v28, 1 }
  0x63   : > { %1088 = vmatpush.bf16.msra.mxu1 %v2269_v17  ;;  %1554 = vmatpush.bf16.msra.mxu0 %v2297_v25  ;;  %v1321_v17 = vor.u32 %v1320_v4, %v1317_v3  ;;  %v2676_v25 = vld [vmem:[%s2483_s29 + $0x18] sm:$0xff] }
  0x64   : > { %1252 = vmatpush.bf16.msra.mxu2 %v2281_v14  ;;  %v881_v39 = vor.u32 %v880_v36, %v877_v15  ;;  %v2669_v14 = vpack.c.b16 %v845_v10, %v845_v10  ;;  %v1332_v28 = vshrl.u32 %v2676_v25, 16  ;;  %v1335_v29 = vshll.u32 %v2676_v25, 16  ;;  %v998_v15 = vld [vmem:[%s2483_s29 + $0x4] sm:$0xc] }
  0x65   : > { %631 = vmatmul.bf16.gmra.mxu2 %v558_v19  ;;  %805 = vmatmul.bf16.gmra.mxu3 %v726_v30  ;;  %v1329_v19 = vor.u32 %v1328_v6, %v1325_v5  ;;  %v1017_v38 = vunpack.c.l.b16 %v998_v15  ;;  %v1489_v60 = vrot.slane %v2676_v25, 3  ;;  %v1311_v5 = vunpack.c.l.b16 %v1292_v0 }
  0x66   : > { %v882_v44 = vsel %vm847_vm2, %v872_v13, %v881_v39  ;;  %v893_v21 = vshrl.u32 %v2669_v14, 16  ;;  %v896_v22 = vshll.u32 %v2669_v14, 16 }
  0x67   : > { %1089 = vmatpush.bf16.msra.mxu1 %v2268_v27  ;;  %1555 = vmatpush.bf16.msra.mxu0 %v2296_v32  ;;  %v1337_v32 = vrot.slane %v1335_v29, 3  ;;  %v2723_v6 = vpack.c.b16 %v1311_v5, %v1311_v5 }
  0x68   : > { %1253 = vmatpush.bf16.msra.mxu2 %v2280_v24  ;;  %v1330_v24 = vsel %vm1313_vm3, %v1321_v17, %v1329_v19  ;;  %v895_v26 = vrot.slane %v893_v21, 1  ;;  %v898_v27 = vrot.slane %v896_v22, 2  ;;  %v1025_v22 = vrot.slane %v2596_v53, 2 }
  0x69   : > { %v1362_v17 = vshll.u32 %v2723_v6, 16 }
  0x6a   : > { %v899_v30 = vor.u32 %v898_v27, %v895_v26 }
  0x6b   : > { %1090 = vmatpush.bf16.msra.mxu1 %v2267_v48  ;;  %1556 = vmatpush.bf16.msra.mxu0 %v2295_v52  ;;  %v1364_v26 = vrot.slane %v1362_v17, 3 }
  0x6c   : > { %1254 = vmatpush.bf16.msra.mxu2 %v2279_v31  ;;  %v1334_v31 = vrot.slane %v1332_v28, 2 }
  0x6e   : > { %v1338_v36 = vor.u32 %v1337_v32, %v1334_v31 }
  0x6f   : > { %1091 = vmatpush.bf16.msra.mxu1 %v2266_v56  ;;  %1557 = vmatpush.bf16.msra.mxu0 %v2294_v9  ;;  %v2709_v56 = vld [vmem:[%s2483_s29 + $0x28] sm:$0xff] }
  0x70   : > { %1255 = vmatpush.bf16.msra.mxu2 %v2278_v51  ;;  %v1339_v40 = vsel %vm1313_vm3, %v1329_v19, %v1338_v36 }
  0x72   : > { %516 = vmatmul.bf16.gmra.mxu1 %v2492_v11  ;;  %972 = vmatmul.bf16.gmra.mxu0 %v882_v44  ;;  %v886_v11 = vrot.slane %v884_v49, 1  ;;  %v1021_v49 = vrot.slane %v2531_v43, 2 }
  0x74   : > { %v890_v2 = vor.u32 %v889_v59, %v886_v11  ;;  %v1187_v11 = vrot.slane %v2676_v25, 2  ;;  %v1023_v59 = vrot.slane %v2562_v8, 2 }
  0x75   : > { %636 = vmatmul.bf16.gmra.mxu2 %v560_v41  ;;  %810 = vmatmul.bf16.gmra.mxu3 %v728_v55  ;;  %v2688_v41 = vld [vmem:[%s2483_s29 + $0x20] sm:$0xff] }
  0x76   : > { %v891_v13 = vsel %vm847_vm2, %v881_v39, %v890_v2  ;;  %v900_v35 = vsel %vm847_vm2, %v890_v2, %v899_v30  ;;  %v1483_v39 = vunpack.c.l.b16 %v1464_v37  ;;  %v1341_v44 = vshrl.u32 %v2688_v41, 16 }
  0x77   : > { %v1344_v45 = vshll.u32 %v2688_v41, 16  ;;  %v1188_v63 = vsel %vm1019_vm4, %v1185_v46, %v1187_v11  ;;  %v1024_v10 = vsel %vm1019_vm4, %v1021_v49, %v1023_v59  ;;  %v1189_v19 = vrot.slane %v2688_v41, 2 }
  0x78   : > { %v1484_v42 = vpack.c.b16 %v1168_v47, %v1483_v39  ;;  %v1343_v51 = vrot.slane %v1341_v44, 2  ;;  %v1027_v39 = vrot.slane %v2621_v16, 2 }
  0x79   : > { %v1346_v23 = vrot.slane %v1344_v45, 3  ;;  %v1190_v27 = vsel %vm1019_vm4, %v1187_v11, %v1189_v19 }
  0x7a   : > { %v1486_v50 = vrot.slane %v1484_v42, 3  ;;  %v1028_v45 = vsel %vm1019_vm4, %v1025_v22, %v1027_v39 }
  0x7b   : > { %v1347_v55 = vor.u32 %v1346_v23, %v1343_v51 }
  0x7d   : > { %v1348_v43 = vsel %vm1313_vm3, %v1338_v36, %v1347_v55  ;;  %v1191_v36 = vrot.slane %v2709_v56, 2 }
  0x82   : > { %521 = vmatmul.bf16.gmra.mxu1 %v2504_v18  ;;  %977 = vmatmul.bf16.gmra.mxu0 %v891_v13  ;;  %v563_v18 = vrot.slane %v2507_v20, 1  ;;  %v1018_v20 = vpack.c.b16 %v702_v33, %v1017_v38  ;;  %v1487_v33 = vrot.slane %v2654_v57, 3  ;;  %v1350_v57 = vshrl.u32 %v2709_v56, 16 }
  0x83   : > { %v1359_v13 = vshrl.u32 %v2723_v6, 16 }
  0x84   : > { %v564_v34 = vsel %vm553_vm1, %v561_v1, %v563_v18  ;;  %v1020_v48 = vrot.slane %v1018_v20, 2  ;;  %v1488_v54 = vsel %vm1485_vm5, %v1486_v50, %v1487_v33  ;;  %v1352_v61 = vrot.slane %v1350_v57, 2  ;;  %v1138_v20 = vld [vmem:[%s2483_s29 + $0x30] sm:$0x3] }
  0x85   : > { %641 = vmatmul.bf16.gmra.mxu2 %v562_v7  ;;  %1428 = vmatmul.bf16.vlgmr.msrb.gmra.mxu3 %v1330_v24  ;;  %v1490_v3 = vsel %vm1485_vm5, %v1487_v33, %v1489_v60  ;;  %v1491_v24 = vrot.slane %v2688_v41, 3  ;;  %v1361_v25 = vrot.slane %v1359_v13, 2  ;;  %v1026_v18 = vsel %vm1019_vm4, %v1023_v59, %v1025_v22 }
  0x86   : > { %v1022_v52 = vsel %vm1019_vm4, %v1020_v48, %v1021_v49  ;;  %v1192_v41 = vsel %vm1019_vm4, %v1189_v19, %v1191_v36  ;;  %v1177_v48 = vunpack.c.l.b16 %v1138_v20  ;;  %v1029_v57 = vrot.slane %v2669_v14, 2 }
  0x87   : > { %v1492_v30 = vsel %vm1485_vm5, %v1489_v60, %v1491_v24  ;;  %v1365_v31 = vor.u32 %v1364_v26, %v1361_v25 }
  0x88   : > { %v1183_v16 = vpack.c.b16 %v1177_v48, %v1177_v48 }
  0x92   : > { %526 = vmatmul.bf16.gmra.mxu1 %v2495_v12  ;;  %982 = vmatmul.bf16.gmra.mxu0 %v900_v35  ;;  %v1184_v12 = vrot.slane %v2658_v58, 2  ;;  %v1353_v58 = vshll.u32 %v2709_v56, 16 }
  0x94   : > { %v1186_v47 = vsel %vm1019_vm4, %v1184_v12, %v1185_v46  ;;  %v1355_v62 = vrot.slane %v1353_v58, 3  ;;  %v1495_v58 = vrot.slane %v2723_v6, 3 }
  0x95   : > { %646 = vmatmul.bf16.gmra.mxu2 %v564_v34  ;;  %1433 = vmatmul.bf16.gmra.mxu3 %v1339_v40  ;;  %v1493_v40 = vrot.slane %v2709_v56, 3 }
  0x96   : > { %v1356_v4 = vor.u32 %v1355_v62, %v1352_v61 }
  0x97   : > { %v1494_v12 = vsel %vm1485_vm5, %v1491_v24, %v1493_v40  ;;  %v1496_v0 = vsel %vm1485_vm5, %v1493_v40, %v1495_v58 }
  0x98   : > { %v1357_v8 = vsel %vm1313_vm3, %v1347_v55, %v1356_v4  ;;  %v1366_v53 = vsel %vm1313_vm3, %v1356_v4, %v1365_v31  ;;  %v1193_v55 = vrot.slane %v1183_v16, 2 }
  0x9a   : > { %v1194_v59 = vsel %vm1019_vm4, %v1191_v36, %v1193_v55 }
  0xa2   : > { %1092 = vmatmul.bf16.vlgmr.msra.gmra.mxu1 %v1022_v52  ;;  %1558 = vmatmul.bf16.vlgmr.msra.gmra.mxu0 %v1488_v54 }
  0xa5   : > { %1256 = vmatmul.bf16.vlgmr.msra.gmra.mxu2 %v1186_v47  ;;  %1438 = vmatmul.bf16.gmra.mxu3 %v1348_v43 }
  0xaf   : > { %v420_v1 = vpop.f32.mrf.mxu0  ;;  %v2718_v2 = vpop.f32.mrf.mxu1 }
  0xb2   : > { %1097 = vmatmul.bf16.gmra.mxu1 %v1024_v10  ;;  %1563 = vmatmul.bf16.gmra.mxu0 %v1490_v3 }
  0xb5   : > { %1261 = vmatmul.bf16.gmra.mxu2 %v1188_v63  ;;  %1443 = vmatmul.bf16.gmra.mxu3 %v1357_v8  ;;  %v1030_v63 = vsel %vm1019_vm4, %v1027_v39, %v1029_v57 }
  0xb7   : > { %v422_v7 = vpop.f32.mrf.mxu0  ;;  %v2725_v9 = vpop.f32.mrf.mxu1 }
  0xb8   : > { %v791_v21 = vpop.f32.mrf.mxu3  ;;  %v2737_v32 = vpop.f32.mrf.mxu2 }
  0xbf   : > { %v425_v28 = vpop.f32.mrf.mxu0  ;;  %v2733_v29 = vpop.f32.mrf.mxu1 }
  0xc0   : > { %v793_v34 = vpop.f32.mrf.mxu3  ;;  %v2743_v38 = vpop.f32.mrf.mxu2 }
  0xc2   : > { %1102 = vmatmul.bf16.gmra.mxu1 %v1026_v18  ;;  %1568 = vmatmul.bf16.gmra.mxu0 %v1492_v30 }
  0xc5   : > { %1266 = vmatmul.bf16.gmra.mxu2 %v1190_v27  ;;  %1448 = vmatmul.bf16.gmra.mxu3 %v1366_v53 }
  0xc7   : > { %v427_v35 = vpop.f32.mrf.mxu0  ;;  %v2740_v15 = vpop.f32.mrf.mxu1 }
  0xc8   : > { %v796_v37 = vpop.f32.mrf.mxu3 }
  0xcf   : > { %v507_v42 = vpop.f32.mrf.mxu1  ;;  %v963_v44 = vpop.f32.mrf.mxu0 }
  0xd0   : > { %v508_v46 = vadd.f32 %v507_v42, %v420_v1  ;;  %v798_v49 = vpop.f32.mrf.mxu3 }
  0xd2   : > { %1107 = vmatmul.bf16.gmra.mxu1 %v1028_v45  ;;  %1573 = vmatmul.bf16.gmra.mxu0 %v1494_v12 }
  0xd5   : > { %1271 = vmatmul.bf16.gmra.mxu2 %v1192_v41 }
  0xd7   : > { %v509_v23 = vpop.f32.mrf.mxu1  ;;  %v965_v47 = vpop.f32.mrf.mxu0 }
  0xd8   : > { %v627_v50 = vpop.f32.mrf.mxu2  ;;  %v510_v52 = vadd.f32 %v509_v23, %v422_v7  ;;  %v801_v43 = vpop.f32.mrf.mxu3 }
  0xd9   : > { %v652_v33 = vadd.f32 %v627_v50, %v508_v46 }
  0xdb   : > { %v816_v51 = vadd.f32 %v791_v21, %v652_v33 }
  0xdd   : > { %v2751_v54 = vadd.f32 %v963_v44, %v816_v51 }
  0xdf   : > { %v512_v61 = vpop.f32.mrf.mxu1  ;;  %v968_v62 = vpop.f32.mrf.mxu0 }
  0xe0   : > { %v629_v56 = vpop.f32.mrf.mxu2  ;;  %v513_v1 = vadd.f32 %v512_v61, %v425_v28  ;;  %v803_v3 = vpop.f32.mrf.mxu3 }
  0xe1   : > { %v653_v11 = vadd.f32 %v629_v56, %v510_v52 }
  0xe2   : > { %1112 = vmatmul.bf16.gmra.mxu1 %v1030_v63  ;;  %1578 = vmatmul.bf16.gmra.mxu0 %v1496_v0 }
  0xe3   : > { %v817_v60 = vadd.f32 %v793_v34, %v653_v11 }
  0xe5   : > { %1276 = vmatmul.bf16.gmra.mxu2 %v1194_v59  ;;  %v2758_v10 = vadd.f32 %v965_v47, %v817_v60 }
  0xe7   : > { %v514_v8 = vpop.f32.mrf.mxu1  ;;  %v970_v6 = vpop.f32.mrf.mxu0 }
  0xe8   : > { %v632_v14 = vpop.f32.mrf.mxu2  ;;  %v515_v7 = vadd.f32 %v514_v8, %v427_v35  ;;  %v806_v17 = vpop.f32.mrf.mxu3 }
  0xe9   : > { %v654_v4 = vadd.f32 %v632_v14, %v513_v1 }
  0xeb   : > { %v818_v5 = vadd.f32 %v796_v37, %v654_v4 }
  0xed   : > { %v2760_v13 = vadd.f32 %v968_v62, %v818_v5 }
  0xef   : > { %v517_v24 = vpop.f32.mrf.mxu1  ;;  %v973_v25 = vpop.f32.mrf.mxu0 }
  0xf0   : > { %v634_v19 = vpop.f32.mrf.mxu2  ;;  %v518_v26 = vadd.f32 %v517_v24, %v2718_v2  ;;  %v808_v30 = vpop.f32.mrf.mxu3 }
  0xf1   : > { %v655_v21 = vadd.f32 %v634_v19, %v515_v7 }
  0xf3   : > { %v819_v22 = vadd.f32 %v798_v49, %v655_v21 }
  0xf5   : > { %v2763_v27 = vadd.f32 %v970_v6, %v819_v22 }
  0xf7   : > { %v519_v34 = vpop.f32.mrf.mxu1  ;;  %v975_v53 = vpop.f32.mrf.mxu0 }
  0xf8   : > { %v637_v28 = vpop.f32.mrf.mxu2  ;;  %v520_v35 = vadd.f32 %v519_v34, %v2725_v9  ;;  %v811_v41 = vpop.f32.mrf.mxu3 }
  0xf9   : > { %v656_v18 = vadd.f32 %v637_v28, %v518_v26 }
  0xfb   : > { %v820_v31 = vadd.f32 %v801_v43, %v656_v18 }
  0xfd   : > { %v2766_v36 = vadd.f32 %v973_v25, %v820_v31 }
  0xff   : > { %v522_v20 = vpop.f32.mrf.mxu1  ;;  %v978_v42 = vpop.f32.mrf.mxu0 }
 0x100   : > { %v639_v37 = vpop.f32.mrf.mxu2  ;;  %v523_v2 = vadd.f32 %v522_v20, %v2733_v29  ;;  %v813_v9 = vpop.f32.mrf.mxu3 }
 0x101   : > { %v657_v39 = vadd.f32 %v639_v37, %v520_v35 }
 0x103   : > { %v821_v40 = vadd.f32 %v803_v3, %v657_v39 }
 0x105   : > { %v2769_v44 = vadd.f32 %v975_v53, %v821_v40 }
 0x107   : > { %v524_v48 = vpop.f32.mrf.mxu1  ;;  %v980_v49 = vpop.f32.mrf.mxu0 }
 0x108   : > { %v642_v45 = vpop.f32.mrf.mxu2  ;;  %v525_v50 = vadd.f32 %v524_v48, %v2740_v15  ;;  %v1429_v43 = vpop.f32.mrf.mxu3 }
 0x109   : > { %v658_v12 = vadd.f32 %v642_v45, %v523_v2 }
 0x10b   : > { %v822_v46 = vadd.f32 %v806_v17, %v658_v12 }
 0x10d   : > { %v2772_v33 = vadd.f32 %v978_v42, %v822_v46 }
 0x10f   : > { %v527_v47 = vpop.f32.mrf.mxu1  ;;  %v983_v52 = vpop.f32.mrf.mxu0 }
 0x110   : > { %v644_v16 = vpop.f32.mrf.mxu2  ;;  %v528_v55 = vadd.f32 %v527_v47, %v2737_v32  ;;  %v1431_v63 = vpop.f32.mrf.mxu3 }
 0x111   : > { %v659_v51 = vadd.f32 %v644_v16, %v525_v50 }
 0x113   : > { %v823_v23 = vadd.f32 %v808_v30, %v659_v51 }
 0x115   : > { %v2775_v29 = vadd.f32 %v980_v49, %v823_v23 }
 0x117   : > { %v529_v11 = vpop.f32.mrf.mxu1  ;;  %v985_v15 = vpop.f32.mrf.mxu0 }
 0x118   : > { %v647_v56 = vpop.f32.mrf.mxu2  ;;  %v530_v59 = vadd.f32 %v529_v11, %v2743_v38  ;;  %v2790_v38 = vld [vmem:[%s231_s5] ss:$0 sm:$0xff]  ;;  %v1434_v6 = vpop.f32.mrf.mxu3 }
 0x119   : > { %v660_v57 = vadd.f32 %v647_v56, %v528_v55 }
 0x11b   : > { %v824_v58 = vadd.f32 %v811_v41, %v660_v57 }
 0x11d   : > { %v2778_v60 = vadd.f32 %v983_v52, %v824_v58 }
 0x11f   : > { %v1093_v32 = vpop.f32.mrf.mxu1  ;;  %v1559_v1 = vpop.f32.mrf.mxu0 }
 0x120   : > { %v649_v61 = vpop.f32.mrf.mxu2  ;;  %v1118_v3 = vadd.f32 %v1093_v32, %v2751_v54 }
 0x121   : > { %v661_v62 = vadd.f32 %v649_v61, %v530_v59 }
 0x123   : > { %v825_v0 = vadd.f32 %v813_v9, %v661_v62 }
 0x125   : > { %v2782_v14 = vadd.f32 %v985_v15, %v825_v0 }
 0x127   : > { %v1095_v7 = vpop.f32.mrf.mxu1  ;;  %v1561_v17 = vpop.f32.mrf.mxu0 }
 0x128   : > { %v1257_v4 = vpop.f32.mrf.mxu2  ;;  %v1119_v54 = vadd.f32 %v1095_v7, %v2758_v10  ;;  %v1436_v10 = vpop.f32.mrf.mxu3 }
 0x129   : > { %v1282_v5 = vadd.f32 %v1257_v4, %v1118_v3 }
 0x12b   : > { %v1454_v8 = vadd.f32 %v1429_v43, %v1282_v5 }
 0x12d   : > { %v1584_v19 = vadd.f32 %v1559_v1, %v1454_v8 }
 0x12f   : > { %v1598_v21 = vadd.f32 %v2790_v38, %v1584_v19  ;;  %v1098_v28 = vpop.f32.mrf.mxu1  ;;  %v1564_v18 = vpop.f32.mrf.mxu0 }
 0x130   : > { %v1259_v22 = vpop.f32.mrf.mxu2  ;;  %v1120_v31 = vadd.f32 %v1098_v28, %v2760_v13  ;;  %v1439_v12 = vpop.f32.mrf.mxu3 }
 0x131   : > { %v1608_v24 = vmax.f32 %v1598_v21, 0.0  ;;  %v1283_v25 = vadd.f32 %v1259_v22, %v1119_v54 }
 0x133   : > { %1618 = vst [vmem:[%s2797_s20] sm:$0xff] %v1608_v24  ;;  %v1455_v26 = vadd.f32 %v1431_v63, %v1283_v25 }
 0x135   : > { %v1585_v30 = vadd.f32 %v1561_v17, %v1455_v26 }
 0x137   : > { %v1599_v34 = vadd.f32 %v2790_v38, %v1585_v30  ;;  %v1100_v40 = vpop.f32.mrf.mxu1  ;;  %v1566_v41 = vpop.f32.mrf.mxu0 }
 0x138   : > { %v1262_v53 = vpop.f32.mrf.mxu2  ;;  %v1121_v42 = vadd.f32 %v1100_v40, %v2763_v27  ;;  %v1441_v52 = vpop.f32.mrf.mxu3 }
 0x139   : > { %v1609_v35 = vmax.f32 %v1599_v34, 0.0  ;;  %v1284_v37 = vadd.f32 %v1262_v53, %v1120_v31 }
 0x13b   : > { %1619 = vst [vmem:[%s2797_s20 + $0x8] sm:$0xff] %v1609_v35  ;;  %v1456_v39 = vadd.f32 %v1434_v6, %v1284_v37 }
 0x13d   : > { %v1586_v20 = vadd.f32 %v1564_v18, %v1456_v39 }
 0x13f   : > { %v1600_v2 = vadd.f32 %v2790_v38, %v1586_v20  ;;  %v1103_v49 = vpop.f32.mrf.mxu1  ;;  %v1569_v50 = vpop.f32.mrf.mxu0 }
 0x140   : > { %v1264_v45 = vpop.f32.mrf.mxu2  ;;  %v1122_v16 = vadd.f32 %v1103_v49, %v2766_v36  ;;  %v1444_v62 = vpop.f32.mrf.mxu3 }
 0x141   : > { %v1610_v13 = vmax.f32 %v1600_v2, 0.0  ;;  %v1285_v46 = vadd.f32 %v1264_v45, %v1121_v42 }
 0x143   : > { %1620 = vst [vmem:[%s2797_s20 + $0x10] sm:$0xff] %v1610_v13  ;;  %v1457_v48 = vadd.f32 %v1436_v10, %v1285_v46 }
 0x145   : > { %v1587_v9 = vadd.f32 %v1566_v41, %v1457_v48 }
 0x147   : > { %v1601_v51 = vadd.f32 %v2790_v38, %v1587_v9  ;;  %v1105_v43 = vpop.f32.mrf.mxu1  ;;  %v1571_v56 = vpop.f32.mrf.mxu0 }
 0x148   : > { %v1267_v23 = vpop.f32.mrf.mxu2  ;;  %v1123_v58 = vadd.f32 %v1105_v43, %v2769_v44  ;;  %v1446_v19 = vpop.f32.mrf.mxu3 }
 0x149   : > { %v1611_v47 = vmax.f32 %v1601_v51, 0.0  ;;  %v1286_v27 = vadd.f32 %v1267_v23, %v1122_v16 }
 0x14b   : > { %1621 = vst [vmem:[%s2797_s20 + $0x18] sm:$0xff] %v1611_v47  ;;  %v1458_v55 = vadd.f32 %v1439_v12, %v1286_v27 }
 0x14d   : > { %v1588_v57 = vadd.f32 %v1569_v50, %v1458_v55 }
 0x14f   : > { %v1602_v11 = vadd.f32 %v2790_v38, %v1588_v57  ;;  %v1108_v63 = vpop.f32.mrf.mxu1  ;;  %v1574_v1 = vpop.f32.mrf.mxu0 }
 0x150   : > { %v1269_v15 = vpop.f32.mrf.mxu2  ;;  %v1124_v32 = vadd.f32 %v1108_v63, %v2772_v33  ;;  %v1449_v31 = vpop.f32.mrf.mxu3 }
 0x151   : > { %v1612_v59 = vmax.f32 %v1602_v11, 0.0  ;;  %v1287_v36 = vadd.f32 %v1269_v15, %v1123_v58 }
 0x153   : > { %1622 = vst [vmem:[%s2797_s20 + $0x20] sm:$0xff] %v1612_v59  ;;  %v1459_v61 = vadd.f32 %v1441_v52, %v1287_v36 }
 0x155   : > { %v1589_v0 = vadd.f32 %v1571_v56, %v1459_v61 }
 0x157   : > { %v1603_v3 = vadd.f32 %v2790_v38, %v1589_v0  ;;  %v1110_v6 = vpop.f32.mrf.mxu1  ;;  %v1576_v21 = vpop.f32.mrf.mxu0 }
 0x158   : > { %v1272_v4 = vpop.f32.mrf.mxu2  ;;  %v1125_v17 = vadd.f32 %v1110_v6, %v2775_v29  ;;  %v1451_v2 = vpop.f32.mrf.mxu3 }
 0x159   : > { %v1613_v5 = vmax.f32 %v1603_v3, 0.0  ;;  %v1288_v44 = vadd.f32 %v1272_v4, %v1124_v32 }
 0x15b   : > { %1623 = vst [vmem:[%s2797_s20 + $0x28] sm:$0xff] %v1613_v5  ;;  %v1460_v8 = vadd.f32 %v1444_v62, %v1288_v44 }
 0x15d   : > { %v1590_v7 = vadd.f32 %v1574_v1, %v1460_v8 }
 0x15f   : > { %v1604_v54 = vadd.f32 %v2790_v38, %v1590_v7  ;;  %v1113_v26 = vpop.f32.mrf.mxu1  ;;  %v1579_v53 = vpop.f32.mrf.mxu0 }
 0x160   : > { %v1274_v22 = vpop.f32.mrf.mxu2  ;;  %v1126_v18 = vadd.f32 %v1113_v26, %v2778_v60 }
 0x161   : > { %v1614_v33 = vmax.f32 %v1604_v54, 0.0  ;;  %v1289_v24 = vadd.f32 %v1274_v22, %v1125_v17 }
 0x163   : > { %1624 = vst [vmem:[%s2797_s20 + $0x30] sm:$0xff] %v1614_v33  ;;  %v1461_v25 = vadd.f32 %v1446_v19, %v1289_v24 }
 0x165   : > { %v1591_v28 = vadd.f32 %v1576_v21, %v1461_v25 }
 0x167   : > { %v1605_v30 = vadd.f32 %v2790_v38, %v1591_v28  ;;  %v1115_v37 = vpop.f32.mrf.mxu1  ;;  %v1581_v12 = vpop.f32.mrf.mxu0 }
 0x168   : > { %v1277_v10 = vpop.f32.mrf.mxu2  ;;  %v1127_v40 = vadd.f32 %v1115_v37, %v2782_v14 }
 0x169   : > { %v1615_v29 = vmax.f32 %v1605_v30, 0.0  ;;  %v1290_v34 = vadd.f32 %v1277_v10, %v1126_v18 }
 0x16b   : > { %1625 = vst [vmem:[%s2797_s20 + $0x38] sm:$0xff] %v1615_v29  ;;  %v1462_v35 = vadd.f32 %v1449_v31, %v1290_v34 }
 0x16d   : > { %v1592_v39 = vadd.f32 %v1579_v53, %v1462_v35 }
 0x16f   : > { %v1606_v41 = vadd.f32 %v2790_v38, %v1592_v39 }
 0x170   : > { %v1279_v20 = vpop.f32.mrf.mxu2 }
 0x171   : > { %v1616_v42 = vmax.f32 %v1606_v41, 0.0  ;;  %v1291_v60 = vadd.f32 %v1279_v20, %v1127_v40 }
 0x173   : > { %1626 = vst [vmem:[%s2797_s20 + $0x40] sm:$0xff] %v1616_v42  ;;  %v1463_v45 = vadd.f32 %v1451_v2, %v1291_v60 }
 0x175   : > { %v1593_v13 = vadd.f32 %v1581_v12, %v1463_v45 }
 0x177   : > { %v1607_v46 = vadd.f32 %v2790_v38, %v1593_v13 }
 0x179   : > { %v1617_v48 = vmax.f32 %v1607_v46, 0.0 }
 0x17b   : > { %1627 = vst [vmem:[%s2797_s20 + $0x48] sm:$0xff] %v1617_v48 }
 0x17c PF: > { %s13_s16 = sadd.s32 1, %s2409_s16   ;;  %s2845_s12 = smov %s2401_s14 }
 0x17d   : > { %p10_p7 = scmp.ge.s32.totalorder %s13_s16, 6   ;;  %s2846_s13 = smov %s2405_s15 }
 0x17e   : > { %s2847_s14 = smov %s2850_s17  ;;  %s2848_s15 = smov %s2854_s18 }
 0x17f   :  { %12 = sbr.rel (!%p10_p7) target bundleno = 3 (0x3), region = 76 }

</bundles_post_ra>
